<compile_context>
chip_gen: v7x
topology: tpu7x:2x2x1
jax: 0.10.0
libtpu: 0.0.40
codegen_flags: <defaults>
</compile_context>

<pallas_src>
import jax
import jax.numpy as jnp
from jax.experimental import pallas as pl
from jax.experimental.pallas import tpu as pltpu

VOCAB = 260          # 0..255 bytes + <bos>=256, <eos>=257, <pad>=258, <unk>=259
VPAD = 384           # vocab padded to 3 * 128 lanes (lane-dense logits)
EMB = 32
HID = 32
BOS = 256
EOS = 257
PAD = 258
NEG_INF = -1e30


# ---------------------------------------------------------------------------
# Fused encoder + decoder + log-softmax + NLLLoss kernel (single invocation)
# ---------------------------------------------------------------------------
def _seq2seq_kernel(src_ref, len_ref, tgt_ref,
                    enc_emb_ref, enc_w_ref, enc_b_ref,
                    dec_emb_ref, dec_w_ref, dec_b_ref,
                    wout_ref, bout_ref,
                    loss_ref):
    T_src, B = src_ref.shape
    T_tgt = tgt_ref.shape[0]

    def embed(emb_ref, toks):
        # emb_ref: (VOCAB, 1, EMB) VMEM; toks: list of B scalars (SMEM reads
        # or static ints).  Dynamic leading-axis gather, no one-hot matmul.
        return jnp.concatenate([emb_ref[tok] for tok in toks], axis=0)  # (B, EMB)

    def gru(x, h, w_ref, b_ref):
        # Single MXU push: [x|h](B,64) @ (64,128) block matrix ->
        # lanes [0:32]=r-preact, [32:64]=z-preact, [64:96]=gi_n, [96:128]=gh_n.
        xh = jnp.concatenate([x, h], axis=-1)                          # (B, 64)
        g = jnp.dot(xh, w_ref[...], preferred_element_type=jnp.float32) + b_ref[...]
        r = jax.nn.sigmoid(g[:, 0 * HID:1 * HID])
        z = jax.nn.sigmoid(g[:, 1 * HID:2 * HID])
        n = jnp.tanh(g[:, 2 * HID:3 * HID] + r * g[:, 3 * HID:4 * HID])
        return (1.0 - z) * n + z * h

    # ------------------------------ encoder -------------------------------
    lens = [len_ref[b] for b in range(B)]                              # SMEM scalars
    h = jnp.zeros((B, HID), jnp.float32)
    for t in range(T_src):
        toks = [src_ref[t, b] for b in range(B)]
        x = embed(enc_emb_ref, toks)
        h_new = gru(x, h, enc_w_ref, enc_b_ref)
        # pack_padded_sequence semantics: freeze row b once t >= length[b]
        rows = []
        for b in range(B):
            keep = (t < lens[b]).astype(jnp.float32)                   # scalar
            rows.append(keep * h_new[b:b + 1, :] + (1.0 - keep) * h[b:b + 1, :])
        h = jnp.concatenate(rows, axis=0)

    # ------------------------------ decoder -------------------------------
    # enc_n_directions == dec_n_directions == 1 -> decoder_hidden = encoder h.
    # TODO(synk): teacher forcing fixed to ratio=1.0 (the PyTorch coin flip
    # random.random() < ratio is non-deterministic).
    col_iota = jax.lax.broadcasted_iota(jnp.int32, (B, VPAD), 1)       # hoisted
    tot = jnp.zeros((B, 1), jnp.float32)
    cnt = jnp.zeros((B, 1), jnp.float32)
    for t in range(T_tgt):
        toks = [BOS] * B if t == 0 else [tgt_ref[t - 1, b] for b in range(B)]
        x = embed(dec_emb_ref, toks)
        h = gru(x, h, dec_w_ref, dec_b_ref)

        # Vocab projection over the 384-lane padded vocab; padded bias columns
        # are -1e30 so they vanish from the log-softmax normalization.
        logits = (jnp.dot(h, wout_ref[...], preferred_element_type=jnp.float32)
                  + bout_ref[...])                                     # (B, VPAD)
        m = jnp.max(logits, axis=-1, keepdims=True)
        lse = jnp.log(jnp.sum(jnp.exp(logits - m), axis=-1, keepdims=True)) + m

        # NLLLoss(ignore_index=PAD): per-row accumulation; reduce once at end.
        tgt_col = jnp.concatenate(
            [jnp.full((1, 1), tgt_ref[t, b], dtype=jnp.int32) for b in range(B)],
            axis=0)                                                    # (B, 1)
        onehot = (col_iota == tgt_col).astype(jnp.float32)             # (B, VPAD)
        picked = jnp.sum(logits * onehot, axis=-1, keepdims=True)      # (B, 1)
        valid = (tgt_col != PAD).astype(jnp.float32)                   # (B, 1)
        tot = tot + (picked - lse) * valid
        cnt = cnt + valid

    total = jnp.sum(tot, keepdims=True)                                # (1, 1)
    count = jnp.sum(cnt, keepdims=True)                                # (1, 1)
    loss_ref[...] = -total / jnp.maximum(count, 1.0)


# ---------------------------------------------------------------------------
# One-time parameter packing (hoisted out of the per-forward path)
# ---------------------------------------------------------------------------
def _pack_gru(wih, whh, bih, bhh):
    """torch-layout (in,3H)/(H,3H)/(1,3H) -> block matrix (in+H, 4H) + (1, 4H).

    Column blocks: [ [Wir;Whr] | [Wiz;Whz] | [Win;0] | [0;Whn] ]
    Bias blocks:   [ bir+bhr   | biz+bhz   | bin     | bhn     ]
    """
    wir, wiz, win = wih[:, :HID], wih[:, HID:2 * HID], wih[:, 2 * HID:]
    whr, whz, whn = whh[:, :HID], whh[:, HID:2 * HID], whh[:, 2 * HID:]
    bir, biz, bin_ = bih[:, :HID], bih[:, HID:2 * HID], bih[:, 2 * HID:]
    bhr, bhz, bhn = bhh[:, :HID], bhh[:, HID:2 * HID], bhh[:, 2 * HID:]
    zi = jnp.zeros((wih.shape[0], HID), jnp.float32)
    zh = jnp.zeros((whh.shape[0], HID), jnp.float32)
    top = jnp.concatenate([wir, wiz, win, zi], axis=1)                 # (EMB, 4H)
    bot = jnp.concatenate([whr, whz, zh, whn], axis=1)                 # (HID, 4H)
    w_big = jnp.concatenate([top, bot], axis=0)                        # (EMB+HID, 4H)
    b_big = jnp.concatenate([bir + bhr, biz + bhz, bin_, bhn], axis=1)  # (1, 4H)
    return w_big, b_big


def pack_params(params):
    enc_w, enc_b = _pack_gru(params["enc_wih"], params["enc_whh"],
                             params["enc_bih"], params["enc_bhh"])
    dec_w, dec_b = _pack_gru(params["dec_wih"], params["dec_whh"],
                             params["dec_bih"], params["dec_bhh"])
    wout = jnp.pad(params["dec_wout"], ((0, 0), (0, VPAD - VOCAB)))
    bout = jnp.pad(params["dec_bout"], ((0, 0), (0, VPAD - VOCAB)),
                   constant_values=NEG_INF)
    return {
        "enc_emb3": params["enc_emb"].reshape(VOCAB, 1, EMB),
        "enc_w": enc_w, "enc_b": enc_b,
        "dec_emb3": params["dec_emb"].reshape(VOCAB, 1, EMB),
        "dec_w": dec_w, "dec_b": dec_b,
        "wout": wout, "bout": bout,
    }


# ---------------------------------------------------------------------------
# Forward wrapper (single pallas_call, no grid)
# ---------------------------------------------------------------------------
def seq2seq_forward(packed, input_batches, input_lengths,
                    target_batches, max_target_length):
    src = input_batches.astype(jnp.int32)                        # (T_src, B)
    lens = input_lengths.astype(jnp.int32)                       # (B,)
    tgt = target_batches[:max_target_length].astype(jnp.int32)   # (T_tgt, B)

    smem = pl.BlockSpec(memory_space=pltpu.MemorySpace.SMEM)
    vmem = pl.BlockSpec(memory_space=pltpu.MemorySpace.VMEM)

    loss = pl.pallas_call(
        _seq2seq_kernel,
        out_shape=jax.ShapeDtypeStruct((1, 1), jnp.float32),
        in_specs=[smem, smem, smem,            # tokens / lengths / targets
                  vmem, vmem, vmem,            # encoder emb / W_big / b_big
                  vmem, vmem, vmem,            # decoder emb / W_big / b_big
                  vmem, vmem],                 # wout / bout
        out_specs=vmem,
    )(src, lens, tgt,
      packed["enc_emb3"], packed["enc_w"], packed["enc_b"],
      packed["dec_emb3"], packed["dec_w"], packed["dec_b"],
      packed["wout"], packed["bout"])
    return loss[0, 0]

# TODO(synk): predict=True greedy/fuzzy-sampling decode branch (Python
# random.uniform control flow + data-dependent loop length) is not implemented;
# training branch only.


# ---------------------------------------------------------------------------
# Pure-JAX reference (same math, no Pallas) for a correctness cross-check
# ---------------------------------------------------------------------------
def _reference_loss(params, input_batches, input_lengths,
                    target_batches, max_target_length):
    def cell(x, h, wih, whh, bih, bhh):
        gi = x @ wih + bih
        gh = h @ whh + bhh
        r = jax.nn.sigmoid(gi[:, :HID] + gh[:, :HID])
        z = jax.nn.sigmoid(gi[:, HID:2 * HID] + gh[:, HID:2 * HID])
        n = jnp.tanh(gi[:, 2 * HID:] + r * gh[:, 2 * HID:])
        return (1.0 - z) * n + z * h

    src_len, batch = input_batches.shape
    h = jnp.zeros((batch, HID), jnp.float32)
    for t in range(src_len):
        x = params["enc_emb"][input_batches[t]]
        h_new = cell(x, h, params["enc_wih"], params["enc_whh"],
                     params["enc_bih"], params["enc_bhh"])
        mask = (t < input_lengths).astype(jnp.float32)[:, None]
        h = mask * h_new + (1.0 - mask) * h

    dec_h = h
    dec_in = jnp.full((batch,), BOS, dtype=jnp.int32)
    total, count = 0.0, 0.0
    for t in range(max_target_length):
        x = params["dec_emb"][dec_in]
        dec_h = cell(x, dec_h, params["dec_wih"], params["dec_whh"],
                     params["dec_bih"], params["dec_bhh"])
        logits = dec_h @ params["dec_wout"] + params["dec_bout"]
        logp = jax.nn.log_softmax(logits, axis=-1)
        tgt_t = target_batches[t]
        picked = jnp.take_along_axis(logp, tgt_t[:, None], axis=1)[:, 0]
        valid = (tgt_t != PAD).astype(jnp.float32)
        total = total + jnp.sum(picked * valid)
        count = count + jnp.sum(valid)
        dec_in = tgt_t
    return -total / jnp.maximum(count, 1.0)


# ---------------------------------------------------------------------------
if __name__ == "__main__":
    key = jax.random.PRNGKey(0)
    keys = jax.random.split(key, 16)

    def uni(k, shape, scale):
        return jax.random.uniform(k, shape, jnp.float32, -scale, scale)

    s = 1.0 / (HID ** 0.5)
    params = {
        "enc_emb":  uni(keys[0], (VOCAB, EMB), 0.1),
        "enc_wih":  uni(keys[1], (EMB, 3 * HID), s),
        "enc_whh":  uni(keys[2], (HID, 3 * HID), s),
        "enc_bih":  uni(keys[3], (1, 3 * HID), s),
        "enc_bhh":  uni(keys[4], (1, 3 * HID), s),
        "dec_emb":  uni(keys[5], (VOCAB, EMB), 0.1),
        "dec_wih":  uni(keys[6], (EMB, 3 * HID), s),
        "dec_whh":  uni(keys[7], (HID, 3 * HID), s),
        "dec_bih":  uni(keys[8], (1, 3 * HID), s),
        "dec_bhh":  uni(keys[9], (1, 3 * HID), s),
        "dec_wout": uni(keys[10], (HID, VOCAB), s),
        "dec_bout": uni(keys[11], (1, VOCAB), s),
    }

    # One-time kernel-layout packing (hoisted out of the forward path).
    packed = jax.tree_util.tree_map(jax.block_until_ready, pack_params(params))

    B, SRC_LEN, TGT_LEN = 2, 8, 8
    input_batches = jax.random.randint(keys[12], (SRC_LEN, B), 0, 256, dtype=jnp.int32)
    input_lengths = jnp.array([SRC_LEN, SRC_LEN - 2], dtype=jnp.int32)

    target_batches = jax.random.randint(keys[13], (TGT_LEN, B), 0, 256, dtype=jnp.int32)
    target_lengths = [TGT_LEN, TGT_LEN - 3]
    # pad each target sequence past its length; put EOS at the last valid step
    tgt = target_batches
    for b, L in enumerate(target_lengths):
        tgt = tgt.at[L - 1, b].set(EOS)
        if L < TGT_LEN:
            tgt = tgt.at[L:, b].set(PAD)
    target_batches = tgt
    max_target_length = max(target_lengths)

    loss = seq2seq_forward(packed, input_batches, input_lengths,
                           target_batches, max_target_length)
    loss = jax.block_until_ready(loss)
    assert jnp.isfinite(loss), "loss is not finite"

    ref = jax.block_until_ready(
        _reference_loss(params, input_batches, input_lengths,
                        target_batches, max_target_length))
    assert jnp.allclose(loss, ref, rtol=5e-3, atol=5e-3), (loss, ref)

    print("KERNEL_OK")
</pallas_src>

<mosaic_0001>
module attributes {stable_mosaic.version = 11 : i64} {
  func.func @_seq2seq_kernel(%arg0: memref<8x2xi32, #tpu.memory_space<smem>>, %arg1: memref<2xi32, #tpu.memory_space<smem>>, %arg2: memref<8x2xi32, #tpu.memory_space<smem>>, %arg3: memref<260x1x32xf32, #tpu.memory_space<vmem>>, %arg4: memref<64x128xf32, #tpu.memory_space<vmem>>, %arg5: memref<1x128xf32, #tpu.memory_space<vmem>>, %arg6: memref<260x1x32xf32, #tpu.memory_space<vmem>>, %arg7: memref<64x128xf32, #tpu.memory_space<vmem>>, %arg8: memref<1x128xf32, #tpu.memory_space<vmem>>, %arg9: memref<32x384xf32, #tpu.memory_space<vmem>>, %arg10: memref<1x384xf32, #tpu.memory_space<vmem>>, %arg11: memref<1x1xf32, #tpu.memory_space<vmem>>) attributes {dimension_semantics = [], scalar_prefetch = 0 : i64, scratch_operands = 0 : i64, tpu.core_type = #tpu.core_type<tc>} {
    %c0 = arith.constant 0 : index
    %0 = memref.load %arg1[%c0] : memref<2xi32, #tpu.memory_space<smem>>
    %c1 = arith.constant 1 : index
    %1 = memref.load %arg1[%c1] : memref<2xi32, #tpu.memory_space<smem>>
    %cst = arith.constant 0.000000e+00 : f32
    %2 = vector.broadcast %cst : f32 to vector<2x32xf32>
    %c0_0 = arith.constant 0 : index
    %c0_1 = arith.constant 0 : index
    %3 = memref.load %arg0[%c0_0, %c0_1] : memref<8x2xi32, #tpu.memory_space<smem>>
    %c0_2 = arith.constant 0 : index
    %c1_3 = arith.constant 1 : index
    %4 = memref.load %arg0[%c0_2, %c1_3] : memref<8x2xi32, #tpu.memory_space<smem>>
    %5 = arith.index_cast %3 : i32 to index
    %c0_4 = arith.constant 0 : index
    %c0_5 = arith.constant 0 : index
    %6 = vector.load %arg3[%5, %c0_4, %c0_5] : memref<260x1x32xf32, #tpu.memory_space<vmem>>, vector<1x1x32xf32>
    %7 = vector.shape_cast %6 : vector<1x1x32xf32> to vector<1x32xf32>
    %8 = arith.index_cast %4 : i32 to index
    %c0_6 = arith.constant 0 : index
    %c0_7 = arith.constant 0 : index
    %9 = vector.load %arg3[%8, %c0_6, %c0_7] : memref<260x1x32xf32, #tpu.memory_space<vmem>>, vector<1x1x32xf32>
    %10 = vector.shape_cast %9 : vector<1x1x32xf32> to vector<1x32xf32>
    %11 = tpu.concatenate %7, %10 in 0 : vector<1x32xf32>, vector<1x32xf32> -> vector<2x32xf32>
    %12 = tpu.concatenate %11, %2 in 1 : vector<2x32xf32>, vector<2x32xf32> -> vector<2x64xf32>
    %c0_8 = arith.constant 0 : index
    %c0_9 = arith.constant 0 : index
    %13 = vector.load %arg4[%c0_8, %c0_9] : memref<64x128xf32, #tpu.memory_space<vmem>>, vector<64x128xf32>
    %cst_10 = arith.constant dense<0.000000e+00> : vector<2x128xf32>
    %14 = tpu.matmul %12, %13, %cst_10 {dimension_numbers = #tpu.dot_dimension_numbers<[1], [0], [0], [1], [0, 0, 1, 1], [], []>} : vector<2x64xf32>, vector<64x128xf32>, vector<2x128xf32> -> vector<2x128xf32>
    %c0_11 = arith.constant 0 : index
    %c0_12 = arith.constant 0 : index
    %15 = vector.load %arg5[%c0_11, %c0_12] : memref<1x128xf32, #tpu.memory_space<vmem>>, vector<1x128xf32>
    %16 = vector.broadcast %15 : vector<1x128xf32> to vector<2x128xf32>
    %17 = arith.addf %14, %16 : vector<2x128xf32>
    %18 = vector.extract_strided_slice %17 {offsets = [0, 0], sizes = [2, 32], strides = [1, 1]} : vector<2x128xf32> to vector<2x32xf32>
    %19 = arith.negf %18 : vector<2x32xf32>
    %20 = math.exp %19 : vector<2x32xf32>
    %cst_13 = arith.constant 1.000000e+00 : f32
    %21 = vector.broadcast %cst_13 : f32 to vector<2x32xf32>
    %22 = arith.addf %21, %20 : vector<2x32xf32>
    %23 = arith.divf %21, %22 : vector<2x32xf32>
    %24 = vector.extract_strided_slice %17 {offsets = [0, 32], sizes = [2, 32], strides = [1, 1]} : vector<2x128xf32> to vector<2x32xf32>
    %25 = arith.negf %24 : vector<2x32xf32>
    %26 = math.exp %25 : vector<2x32xf32>
    %cst_14 = arith.constant 1.000000e+00 : f32
    %27 = vector.broadcast %cst_14 : f32 to vector<2x32xf32>
    %28 = arith.addf %27, %26 : vector<2x32xf32>
    %29 = arith.divf %27, %28 : vector<2x32xf32>
    %30 = vector.extract_strided_slice %17 {offsets = [0, 64], sizes = [2, 32], strides = [1, 1]} : vector<2x128xf32> to vector<2x32xf32>
    %31 = vector.extract_strided_slice %17 {offsets = [0, 96], sizes = [2, 32], strides = [1, 1]} : vector<2x128xf32> to vector<2x32xf32>
    %32 = arith.mulf %23, %31 : vector<2x32xf32>
    %33 = arith.addf %30, %32 : vector<2x32xf32>
    %34 = math.tanh %33 : vector<2x32xf32>
    %cst_15 = arith.constant 1.000000e+00 : f32
    %35 = vector.broadcast %cst_15 : f32 to vector<2x32xf32>
    %36 = arith.subf %35, %29 : vector<2x32xf32>
    %37 = arith.mulf %36, %34 : vector<2x32xf32>
    %38 = arith.mulf %29, %2 : vector<2x32xf32>
    %39 = arith.addf %37, %38 : vector<2x32xf32>
    %c0_i32 = arith.constant 0 : i32
    %40 = arith.cmpi sgt, %0, %c0_i32 : i32
    %41 = arith.extui %40 : i1 to i32
    %42 = arith.sitofp %41 : i32 to f32
    %43 = vector.extract_strided_slice %39 {offsets = [0, 0], sizes = [1, 32], strides = [1, 1]} : vector<2x32xf32> to vector<1x32xf32>
    %44 = vector.broadcast %42 : f32 to vector<1x32xf32>
    %45 = arith.mulf %44, %43 : vector<1x32xf32>
    %cst_16 = arith.constant 1.000000e+00 : f32
    %46 = arith.subf %cst_16, %42 : f32
    %47 = vector.extract_strided_slice %2 {offsets = [0, 0], sizes = [1, 32], strides = [1, 1]} : vector<2x32xf32> to vector<1x32xf32>
    %48 = vector.broadcast %46 : f32 to vector<1x32xf32>
    %49 = arith.mulf %48, %47 : vector<1x32xf32>
    %50 = arith.addf %45, %49 : vector<1x32xf32>
    %c0_i32_17 = arith.constant 0 : i32
    %51 = arith.cmpi sgt, %1, %c0_i32_17 : i32
    %52 = arith.extui %51 : i1 to i32
    %53 = arith.sitofp %52 : i32 to f32
    %54 = vector.extract_strided_slice %39 {offsets = [1, 0], sizes = [1, 32], strides = [1, 1]} : vector<2x32xf32> to vector<1x32xf32>
    %55 = vector.broadcast %53 : f32 to vector<1x32xf32>
    %56 = arith.mulf %55, %54 : vector<1x32xf32>
    %cst_18 = arith.constant 1.000000e+00 : f32
    %57 = arith.subf %cst_18, %53 : f32
    %58 = vector.extract_strided_slice %2 {offsets = [1, 0], sizes = [1, 32], strides = [1, 1]} : vector<2x32xf32> to vector<1x32xf32>
    %59 = vector.broadcast %57 : f32 to vector<1x32xf32>
    %60 = arith.mulf %59, %58 : vector<1x32xf32>
    %61 = arith.addf %56, %60 : vector<1x32xf32>
    %62 = tpu.concatenate %50, %61 in 0 : vector<1x32xf32>, vector<1x32xf32> -> vector<2x32xf32>
    %c1_19 = arith.constant 1 : index
    %c0_20 = arith.constant 0 : index
    %63 = memref.load %arg0[%c1_19, %c0_20] : memref<8x2xi32, #tpu.memory_space<smem>>
    %c1_21 = arith.constant 1 : index
    %c1_22 = arith.constant 1 : index
    %64 = memref.load %arg0[%c1_21, %c1_22] : memref<8x2xi32, #tpu.memory_space<smem>>
    %65 = arith.index_cast %63 : i32 to index
    %c0_23 = arith.constant 0 : index
    %c0_24 = arith.constant 0 : index
    %66 = vector.load %arg3[%65, %c0_23, %c0_24] : memref<260x1x32xf32, #tpu.memory_space<vmem>>, vector<1x1x32xf32>
    %67 = vector.shape_cast %66 : vector<1x1x32xf32> to vector<1x32xf32>
    %68 = arith.index_cast %64 : i32 to index
    %c0_25 = arith.constant 0 : index
    %c0_26 = arith.constant 0 : index
    %69 = vector.load %arg3[%68, %c0_25, %c0_26] : memref<260x1x32xf32, #tpu.memory_space<vmem>>, vector<1x1x32xf32>
    %70 = vector.shape_cast %69 : vector<1x1x32xf32> to vector<1x32xf32>
    %71 = tpu.concatenate %67, %70 in 0 : vector<1x32xf32>, vector<1x32xf32> -> vector<2x32xf32>
    %72 = tpu.concatenate %71, %62 in 1 : vector<2x32xf32>, vector<2x32xf32> -> vector<2x64xf32>
    %c0_27 = arith.constant 0 : index
    %c0_28 = arith.constant 0 : index
    %73 = vector.load %arg4[%c0_27, %c0_28] : memref<64x128xf32, #tpu.memory_space<vmem>>, vector<64x128xf32>
    %cst_29 = arith.constant dense<0.000000e+00> : vector<2x128xf32>
    %74 = tpu.matmul %72, %73, %cst_29 {dimension_numbers = #tpu.dot_dimension_numbers<[1], [0], [0], [1], [0, 0, 1, 1], [], []>} : vector<2x64xf32>, vector<64x128xf32>, vector<2x128xf32> -> vector<2x128xf32>
    %c0_30 = arith.constant 0 : index
    %c0_31 = arith.constant 0 : index
    %75 = vector.load %arg5[%c0_30, %c0_31] : memref<1x128xf32, #tpu.memory_space<vmem>>, vector<1x128xf32>
    %76 = vector.broadcast %75 : vector<1x128xf32> to vector<2x128xf32>
    %77 = arith.addf %74, %76 : vector<2x128xf32>
    %78 = vector.extract_strided_slice %77 {offsets = [0, 0], sizes = [2, 32], strides = [1, 1]} : vector<2x128xf32> to vector<2x32xf32>
    %79 = arith.negf %78 : vector<2x32xf32>
    %80 = math.exp %79 : vector<2x32xf32>
    %cst_32 = arith.constant 1.000000e+00 : f32
    %81 = vector.broadcast %cst_32 : f32 to vector<2x32xf32>
    %82 = arith.addf %81, %80 : vector<2x32xf32>
    %83 = arith.divf %81, %82 : vector<2x32xf32>
    %84 = vector.extract_strided_slice %77 {offsets = [0, 32], sizes = [2, 32], strides = [1, 1]} : vector<2x128xf32> to vector<2x32xf32>
    %85 = arith.negf %84 : vector<2x32xf32>
    %86 = math.exp %85 : vector<2x32xf32>
    %cst_33 = arith.constant 1.000000e+00 : f32
    %87 = vector.broadcast %cst_33 : f32 to vector<2x32xf32>
    %88 = arith.addf %87, %86 : vector<2x32xf32>
    %89 = arith.divf %87, %88 : vector<2x32xf32>
    %90 = vector.extract_strided_slice %77 {offsets = [0, 64], sizes = [2, 32], strides = [1, 1]} : vector<2x128xf32> to vector<2x32xf32>
    %91 = vector.extract_strided_slice %77 {offsets = [0, 96], sizes = [2, 32], strides = [1, 1]} : vector<2x128xf32> to vector<2x32xf32>
    %92 = arith.mulf %83, %91 : vector<2x32xf32>
    %93 = arith.addf %90, %92 : vector<2x32xf32>
    %94 = math.tanh %93 : vector<2x32xf32>
    %cst_34 = arith.constant 1.000000e+00 : f32
    %95 = vector.broadcast %cst_34 : f32 to vector<2x32xf32>
    %96 = arith.subf %95, %89 : vector<2x32xf32>
    %97 = arith.mulf %96, %94 : vector<2x32xf32>
    %98 = arith.mulf %89, %62 : vector<2x32xf32>
    %99 = arith.addf %97, %98 : vector<2x32xf32>
    %c1_i32 = arith.constant 1 : i32
    %100 = arith.cmpi sgt, %0, %c1_i32 : i32
    %101 = arith.extui %100 : i1 to i32
    %102 = arith.sitofp %101 : i32 to f32
    %103 = vector.extract_strided_slice %99 {offsets = [0, 0], sizes = [1, 32], strides = [1, 1]} : vector<2x32xf32> to vector<1x32xf32>
    %104 = vector.broadcast %102 : f32 to vector<1x32xf32>
    %105 = arith.mulf %104, %103 : vector<1x32xf32>
    %cst_35 = arith.constant 1.000000e+00 : f32
    %106 = arith.subf %cst_35, %102 : f32
    %107 = vector.extract_strided_slice %62 {offsets = [0, 0], sizes = [1, 32], strides = [1, 1]} : vector<2x32xf32> to vector<1x32xf32>
    %108 = vector.broadcast %106 : f32 to vector<1x32xf32>
    %109 = arith.mulf %108, %107 : vector<1x32xf32>
    %110 = arith.addf %105, %109 : vector<1x32xf32>
    %c1_i32_36 = arith.constant 1 : i32
    %111 = arith.cmpi sgt, %1, %c1_i32_36 : i32
    %112 = arith.extui %111 : i1 to i32
    %113 = arith.sitofp %112 : i32 to f32
    %114 = vector.extract_strided_slice %99 {offsets = [1, 0], sizes = [1, 32], strides = [1, 1]} : vector<2x32xf32> to vector<1x32xf32>
    %115 = vector.broadcast %113 : f32 to vector<1x32xf32>
    %116 = arith.mulf %115, %114 : vector<1x32xf32>
    %cst_37 = arith.constant 1.000000e+00 : f32
    %117 = arith.subf %cst_37, %113 : f32
    %118 = vector.extract_strided_slice %62 {offsets = [1, 0], sizes = [1, 32], strides = [1, 1]} : vector<2x32xf32> to vector<1x32xf32>
    %119 = vector.broadcast %117 : f32 to vector<1x32xf32>
    %120 = arith.mulf %119, %118 : vector<1x32xf32>
    %121 = arith.addf %116, %120 : vector<1x32xf32>
    %122 = tpu.concatenate %110, %121 in 0 : vector<1x32xf32>, vector<1x32xf32> -> vector<2x32xf32>
    %c2 = arith.constant 2 : index
    %c0_38 = arith.constant 0 : index
    %123 = memref.load %arg0[%c2, %c0_38] : memref<8x2xi32, #tpu.memory_space<smem>>
    %c2_39 = arith.constant 2 : index
    %c1_40 = arith.constant 1 : index
    %124 = memref.load %arg0[%c2_39, %c1_40] : memref<8x2xi32, #tpu.memory_space<smem>>
    %125 = arith.index_cast %123 : i32 to index
    %c0_41 = arith.constant 0 : index
    %c0_42 = arith.constant 0 : index
    %126 = vector.load %arg3[%125, %c0_41, %c0_42] : memref<260x1x32xf32, #tpu.memory_space<vmem>>, vector<1x1x32xf32>
    %127 = vector.shape_cast %126 : vector<1x1x32xf32> to vector<1x32xf32>
    %128 = arith.index_cast %124 : i32 to index
    %c0_43 = arith.constant 0 : index
    %c0_44 = arith.constant 0 : index
    %129 = vector.load %arg3[%128, %c0_43, %c0_44] : memref<260x1x32xf32, #tpu.memory_space<vmem>>, vector<1x1x32xf32>
    %130 = vector.shape_cast %129 : vector<1x1x32xf32> to vector<1x32xf32>
    %131 = tpu.concatenate %127, %130 in 0 : vector<1x32xf32>, vector<1x32xf32> -> vector<2x32xf32>
    %132 = tpu.concatenate %131, %122 in 1 : vector<2x32xf32>, vector<2x32xf32> -> vector<2x64xf32>
    %c0_45 = arith.constant 0 : index
    %c0_46 = arith.constant 0 : index
    %133 = vector.load %arg4[%c0_45, %c0_46] : memref<64x128xf32, #tpu.memory_space<vmem>>, vector<64x128xf32>
    %cst_47 = arith.constant dense<0.000000e+00> : vector<2x128xf32>
    %134 = tpu.matmul %132, %133, %cst_47 {dimension_numbers = #tpu.dot_dimension_numbers<[1], [0], [0], [1], [0, 0, 1, 1], [], []>} : vector<2x64xf32>, vector<64x128xf32>, vector<2x128xf32> -> vector<2x128xf32>
    %c0_48 = arith.constant 0 : index
    %c0_49 = arith.constant 0 : index
    %135 = vector.load %arg5[%c0_48, %c0_49] : memref<1x128xf32, #tpu.memory_space<vmem>>, vector<1x128xf32>
    %136 = vector.broadcast %135 : vector<1x128xf32> to vector<2x128xf32>
    %137 = arith.addf %134, %136 : vector<2x128xf32>
    %138 = vector.extract_strided_slice %137 {offsets = [0, 0], sizes = [2, 32], strides = [1, 1]} : vector<2x128xf32> to vector<2x32xf32>
    %139 = arith.negf %138 : vector<2x32xf32>
    %140 = math.exp %139 : vector<2x32xf32>
    %cst_50 = arith.constant 1.000000e+00 : f32
    %141 = vector.broadcast %cst_50 : f32 to vector<2x32xf32>
    %142 = arith.addf %141, %140 : vector<2x32xf32>
    %143 = arith.divf %141, %142 : vector<2x32xf32>
    %144 = vector.extract_strided_slice %137 {offsets = [0, 32], sizes = [2, 32], strides = [1, 1]} : vector<2x128xf32> to vector<2x32xf32>
    %145 = arith.negf %144 : vector<2x32xf32>
    %146 = math.exp %145 : vector<2x32xf32>
    %cst_51 = arith.constant 1.000000e+00 : f32
    %147 = vector.broadcast %cst_51 : f32 to vector<2x32xf32>
    %148 = arith.addf %147, %146 : vector<2x32xf32>
    %149 = arith.divf %147, %148 : vector<2x32xf32>
    %150 = vector.extract_strided_slice %137 {offsets = [0, 64], sizes = [2, 32], strides = [1, 1]} : vector<2x128xf32> to vector<2x32xf32>
    %151 = vector.extract_strided_slice %137 {offsets = [0, 96], sizes = [2, 32], strides = [1, 1]} : vector<2x128xf32> to vector<2x32xf32>
    %152 = arith.mulf %143, %151 : vector<2x32xf32>
    %153 = arith.addf %150, %152 : vector<2x32xf32>
    %154 = math.tanh %153 : vector<2x32xf32>
    %cst_52 = arith.constant 1.000000e+00 : f32
    %155 = vector.broadcast %cst_52 : f32 to vector<2x32xf32>
    %156 = arith.subf %155, %149 : vector<2x32xf32>
    %157 = arith.mulf %156, %154 : vector<2x32xf32>
    %158 = arith.mulf %149, %122 : vector<2x32xf32>
    %159 = arith.addf %157, %158 : vector<2x32xf32>
    %c2_i32 = arith.constant 2 : i32
    %160 = arith.cmpi sgt, %0, %c2_i32 : i32
    %161 = arith.extui %160 : i1 to i32
    %162 = arith.sitofp %161 : i32 to f32
    %163 = vector.extract_strided_slice %159 {offsets = [0, 0], sizes = [1, 32], strides = [1, 1]} : vector<2x32xf32> to vector<1x32xf32>
    %164 = vector.broadcast %162 : f32 to vector<1x32xf32>
    %165 = arith.mulf %164, %163 : vector<1x32xf32>
    %cst_53 = arith.constant 1.000000e+00 : f32
    %166 = arith.subf %cst_53, %162 : f32
    %167 = vector.extract_strided_slice %122 {offsets = [0, 0], sizes = [1, 32], strides = [1, 1]} : vector<2x32xf32> to vector<1x32xf32>
    %168 = vector.broadcast %166 : f32 to vector<1x32xf32>
    %169 = arith.mulf %168, %167 : vector<1x32xf32>
    %170 = arith.addf %165, %169 : vector<1x32xf32>
    %c2_i32_54 = arith.constant 2 : i32
    %171 = arith.cmpi sgt, %1, %c2_i32_54 : i32
    %172 = arith.extui %171 : i1 to i32
    %173 = arith.sitofp %172 : i32 to f32
    %174 = vector.extract_strided_slice %159 {offsets = [1, 0], sizes = [1, 32], strides = [1, 1]} : vector<2x32xf32> to vector<1x32xf32>
    %175 = vector.broadcast %173 : f32 to vector<1x32xf32>
    %176 = arith.mulf %175, %174 : vector<1x32xf32>
    %cst_55 = arith.constant 1.000000e+00 : f32
    %177 = arith.subf %cst_55, %173 : f32
    %178 = vector.extract_strided_slice %122 {offsets = [1, 0], sizes = [1, 32], strides = [1, 1]} : vector<2x32xf32> to vector<1x32xf32>
    %179 = vector.broadcast %177 : f32 to vector<1x32xf32>
    %180 = arith.mulf %179, %178 : vector<1x32xf32>
    %181 = arith.addf %176, %180 : vector<1x32xf32>
    %182 = tpu.concatenate %170, %181 in 0 : vector<1x32xf32>, vector<1x32xf32> -> vector<2x32xf32>
    %c3 = arith.constant 3 : index
    %c0_56 = arith.constant 0 : index
    %183 = memref.load %arg0[%c3, %c0_56] : memref<8x2xi32, #tpu.memory_space<smem>>
    %c3_57 = arith.constant 3 : index
    %c1_58 = arith.constant 1 : index
    %184 = memref.load %arg0[%c3_57, %c1_58] : memref<8x2xi32, #tpu.memory_space<smem>>
    %185 = arith.index_cast %183 : i32 to index
    %c0_59 = arith.constant 0 : index
    %c0_60 = arith.constant 0 : index
    %186 = vector.load %arg3[%185, %c0_59, %c0_60] : memref<260x1x32xf32, #tpu.memory_space<vmem>>, vector<1x1x32xf32>
    %187 = vector.shape_cast %186 : vector<1x1x32xf32> to vector<1x32xf32>
    %188 = arith.index_cast %184 : i32 to index
    %c0_61 = arith.constant 0 : index
    %c0_62 = arith.constant 0 : index
    %189 = vector.load %arg3[%188, %c0_61, %c0_62] : memref<260x1x32xf32, #tpu.memory_space<vmem>>, vector<1x1x32xf32>
    %190 = vector.shape_cast %189 : vector<1x1x32xf32> to vector<1x32xf32>
    %191 = tpu.concatenate %187, %190 in 0 : vector<1x32xf32>, vector<1x32xf32> -> vector<2x32xf32>
    %192 = tpu.concatenate %191, %182 in 1 : vector<2x32xf32>, vector<2x32xf32> -> vector<2x64xf32>
    %c0_63 = arith.constant 0 : index
    %c0_64 = arith.constant 0 : index
    %193 = vector.load %arg4[%c0_63, %c0_64] : memref<64x128xf32, #tpu.memory_space<vmem>>, vector<64x128xf32>
    %cst_65 = arith.constant dense<0.000000e+00> : vector<2x128xf32>
    %194 = tpu.matmul %192, %193, %cst_65 {dimension_numbers = #tpu.dot_dimension_numbers<[1], [0], [0], [1], [0, 0, 1, 1], [], []>} : vector<2x64xf32>, vector<64x128xf32>, vector<2x128xf32> -> vector<2x128xf32>
    %c0_66 = arith.constant 0 : index
    %c0_67 = arith.constant 0 : index
    %195 = vector.load %arg5[%c0_66, %c0_67] : memref<1x128xf32, #tpu.memory_space<vmem>>, vector<1x128xf32>
    %196 = vector.broadcast %195 : vector<1x128xf32> to vector<2x128xf32>
    %197 = arith.addf %194, %196 : vector<2x128xf32>
    %198 = vector.extract_strided_slice %197 {offsets = [0, 0], sizes = [2, 32], strides = [1, 1]} : vector<2x128xf32> to vector<2x32xf32>
    %199 = arith.negf %198 : vector<2x32xf32>
    %200 = math.exp %199 : vector<2x32xf32>
    %cst_68 = arith.constant 1.000000e+00 : f32
    %201 = vector.broadcast %cst_68 : f32 to vector<2x32xf32>
    %202 = arith.addf %201, %200 : vector<2x32xf32>
    %203 = arith.divf %201, %202 : vector<2x32xf32>
    %204 = vector.extract_strided_slice %197 {offsets = [0, 32], sizes = [2, 32], strides = [1, 1]} : vector<2x128xf32> to vector<2x32xf32>
    %205 = arith.negf %204 : vector<2x32xf32>
    %206 = math.exp %205 : vector<2x32xf32>
    %cst_69 = arith.constant 1.000000e+00 : f32
    %207 = vector.broadcast %cst_69 : f32 to vector<2x32xf32>
    %208 = arith.addf %207, %206 : vector<2x32xf32>
    %209 = arith.divf %207, %208 : vector<2x32xf32>
    %210 = vector.extract_strided_slice %197 {offsets = [0, 64], sizes = [2, 32], strides = [1, 1]} : vector<2x128xf32> to vector<2x32xf32>
    %211 = vector.extract_strided_slice %197 {offsets = [0, 96], sizes = [2, 32], strides = [1, 1]} : vector<2x128xf32> to vector<2x32xf32>
    %212 = arith.mulf %203, %211 : vector<2x32xf32>
    %213 = arith.addf %210, %212 : vector<2x32xf32>
    %214 = math.tanh %213 : vector<2x32xf32>
    %cst_70 = arith.constant 1.000000e+00 : f32
    %215 = vector.broadcast %cst_70 : f32 to vector<2x32xf32>
    %216 = arith.subf %215, %209 : vector<2x32xf32>
    %217 = arith.mulf %216, %214 : vector<2x32xf32>
    %218 = arith.mulf %209, %182 : vector<2x32xf32>
    %219 = arith.addf %217, %218 : vector<2x32xf32>
    %c3_i32 = arith.constant 3 : i32
    %220 = arith.cmpi sgt, %0, %c3_i32 : i32
    %221 = arith.extui %220 : i1 to i32
    %222 = arith.sitofp %221 : i32 to f32
    %223 = vector.extract_strided_slice %219 {offsets = [0, 0], sizes = [1, 32], strides = [1, 1]} : vector<2x32xf32> to vector<1x32xf32>
    %224 = vector.broadcast %222 : f32 to vector<1x32xf32>
    %225 = arith.mulf %224, %223 : vector<1x32xf32>
    %cst_71 = arith.constant 1.000000e+00 : f32
    %226 = arith.subf %cst_71, %222 : f32
    %227 = vector.extract_strided_slice %182 {offsets = [0, 0], sizes = [1, 32], strides = [1, 1]} : vector<2x32xf32> to vector<1x32xf32>
    %228 = vector.broadcast %226 : f32 to vector<1x32xf32>
    %229 = arith.mulf %228, %227 : vector<1x32xf32>
    %230 = arith.addf %225, %229 : vector<1x32xf32>
    %c3_i32_72 = arith.constant 3 : i32
    %231 = arith.cmpi sgt, %1, %c3_i32_72 : i32
    %232 = arith.extui %231 : i1 to i32
    %233 = arith.sitofp %232 : i32 to f32
    %234 = vector.extract_strided_slice %219 {offsets = [1, 0], sizes = [1, 32], strides = [1, 1]} : vector<2x32xf32> to vector<1x32xf32>
    %235 = vector.broadcast %233 : f32 to vector<1x32xf32>
    %236 = arith.mulf %235, %234 : vector<1x32xf32>
    %cst_73 = arith.constant 1.000000e+00 : f32
    %237 = arith.subf %cst_73, %233 : f32
    %238 = vector.extract_strided_slice %182 {offsets = [1, 0], sizes = [1, 32], strides = [1, 1]} : vector<2x32xf32> to vector<1x32xf32>
    %239 = vector.broadcast %237 : f32 to vector<1x32xf32>
    %240 = arith.mulf %239, %238 : vector<1x32xf32>
    %241 = arith.addf %236, %240 : vector<1x32xf32>
    %242 = tpu.concatenate %230, %241 in 0 : vector<1x32xf32>, vector<1x32xf32> -> vector<2x32xf32>
    %c4 = arith.constant 4 : index
    %c0_74 = arith.constant 0 : index
    %243 = memref.load %arg0[%c4, %c0_74] : memref<8x2xi32, #tpu.memory_space<smem>>
    %c4_75 = arith.constant 4 : index
    %c1_76 = arith.constant 1 : index
    %244 = memref.load %arg0[%c4_75, %c1_76] : memref<8x2xi32, #tpu.memory_space<smem>>
    %245 = arith.index_cast %243 : i32 to index
    %c0_77 = arith.constant 0 : index
    %c0_78 = arith.constant 0 : index
    %246 = vector.load %arg3[%245, %c0_77, %c0_78] : memref<260x1x32xf32, #tpu.memory_space<vmem>>, vector<1x1x32xf32>
    %247 = vector.shape_cast %246 : vector<1x1x32xf32> to vector<1x32xf32>
    %248 = arith.index_cast %244 : i32 to index
    %c0_79 = arith.constant 0 : index
    %c0_80 = arith.constant 0 : index
    %249 = vector.load %arg3[%248, %c0_79, %c0_80] : memref<260x1x32xf32, #tpu.memory_space<vmem>>, vector<1x1x32xf32>
    %250 = vector.shape_cast %249 : vector<1x1x32xf32> to vector<1x32xf32>
    %251 = tpu.concatenate %247, %250 in 0 : vector<1x32xf32>, vector<1x32xf32> -> vector<2x32xf32>
    %252 = tpu.concatenate %251, %242 in 1 : vector<2x32xf32>, vector<2x32xf32> -> vector<2x64xf32>
    %c0_81 = arith.constant 0 : index
    %c0_82 = arith.constant 0 : index
    %253 = vector.load %arg4[%c0_81, %c0_82] : memref<64x128xf32, #tpu.memory_space<vmem>>, vector<64x128xf32>
    %cst_83 = arith.constant dense<0.000000e+00> : vector<2x128xf32>
    %254 = tpu.matmul %252, %253, %cst_83 {dimension_numbers = #tpu.dot_dimension_numbers<[1], [0], [0], [1], [0, 0, 1, 1], [], []>} : vector<2x64xf32>, vector<64x128xf32>, vector<2x128xf32> -> vector<2x128xf32>
    %c0_84 = arith.constant 0 : index
    %c0_85 = arith.constant 0 : index
    %255 = vector.load %arg5[%c0_84, %c0_85] : memref<1x128xf32, #tpu.memory_space<vmem>>, vector<1x128xf32>
    %256 = vector.broadcast %255 : vector<1x128xf32> to vector<2x128xf32>
    %257 = arith.addf %254, %256 : vector<2x128xf32>
    %258 = vector.extract_strided_slice %257 {offsets = [0, 0], sizes = [2, 32], strides = [1, 1]} : vector<2x128xf32> to vector<2x32xf32>
    %259 = arith.negf %258 : vector<2x32xf32>
    %260 = math.exp %259 : vector<2x32xf32>
    %cst_86 = arith.constant 1.000000e+00 : f32
    %261 = vector.broadcast %cst_86 : f32 to vector<2x32xf32>
    %262 = arith.addf %261, %260 : vector<2x32xf32>
    %263 = arith.divf %261, %262 : vector<2x32xf32>
    %264 = vector.extract_strided_slice %257 {offsets = [0, 32], sizes = [2, 32], strides = [1, 1]} : vector<2x128xf32> to vector<2x32xf32>
    %265 = arith.negf %264 : vector<2x32xf32>
    %266 = math.exp %265 : vector<2x32xf32>
    %cst_87 = arith.constant 1.000000e+00 : f32
    %267 = vector.broadcast %cst_87 : f32 to vector<2x32xf32>
    %268 = arith.addf %267, %266 : vector<2x32xf32>
    %269 = arith.divf %267, %268 : vector<2x32xf32>
    %270 = vector.extract_strided_slice %257 {offsets = [0, 64], sizes = [2, 32], strides = [1, 1]} : vector<2x128xf32> to vector<2x32xf32>
    %271 = vector.extract_strided_slice %257 {offsets = [0, 96], sizes = [2, 32], strides = [1, 1]} : vector<2x128xf32> to vector<2x32xf32>
    %272 = arith.mulf %263, %271 : vector<2x32xf32>
    %273 = arith.addf %270, %272 : vector<2x32xf32>
    %274 = math.tanh %273 : vector<2x32xf32>
    %cst_88 = arith.constant 1.000000e+00 : f32
    %275 = vector.broadcast %cst_88 : f32 to vector<2x32xf32>
    %276 = arith.subf %275, %269 : vector<2x32xf32>
    %277 = arith.mulf %276, %274 : vector<2x32xf32>
    %278 = arith.mulf %269, %242 : vector<2x32xf32>
    %279 = arith.addf %277, %278 : vector<2x32xf32>
    %c4_i32 = arith.constant 4 : i32
    %280 = arith.cmpi sgt, %0, %c4_i32 : i32
    %281 = arith.extui %280 : i1 to i32
    %282 = arith.sitofp %281 : i32 to f32
    %283 = vector.extract_strided_slice %279 {offsets = [0, 0], sizes = [1, 32], strides = [1, 1]} : vector<2x32xf32> to vector<1x32xf32>
    %284 = vector.broadcast %282 : f32 to vector<1x32xf32>
    %285 = arith.mulf %284, %283 : vector<1x32xf32>
    %cst_89 = arith.constant 1.000000e+00 : f32
    %286 = arith.subf %cst_89, %282 : f32
    %287 = vector.extract_strided_slice %242 {offsets = [0, 0], sizes = [1, 32], strides = [1, 1]} : vector<2x32xf32> to vector<1x32xf32>
    %288 = vector.broadcast %286 : f32 to vector<1x32xf32>
    %289 = arith.mulf %288, %287 : vector<1x32xf32>
    %290 = arith.addf %285, %289 : vector<1x32xf32>
    %c4_i32_90 = arith.constant 4 : i32
    %291 = arith.cmpi sgt, %1, %c4_i32_90 : i32
    %292 = arith.extui %291 : i1 to i32
    %293 = arith.sitofp %292 : i32 to f32
    %294 = vector.extract_strided_slice %279 {offsets = [1, 0], sizes = [1, 32], strides = [1, 1]} : vector<2x32xf32> to vector<1x32xf32>
    %295 = vector.broadcast %293 : f32 to vector<1x32xf32>
    %296 = arith.mulf %295, %294 : vector<1x32xf32>
    %cst_91 = arith.constant 1.000000e+00 : f32
    %297 = arith.subf %cst_91, %293 : f32
    %298 = vector.extract_strided_slice %242 {offsets = [1, 0], sizes = [1, 32], strides = [1, 1]} : vector<2x32xf32> to vector<1x32xf32>
    %299 = vector.broadcast %297 : f32 to vector<1x32xf32>
    %300 = arith.mulf %299, %298 : vector<1x32xf32>
    %301 = arith.addf %296, %300 : vector<1x32xf32>
    %302 = tpu.concatenate %290, %301 in 0 : vector<1x32xf32>, vector<1x32xf32> -> vector<2x32xf32>
    %c5 = arith.constant 5 : index
    %c0_92 = arith.constant 0 : index
    %303 = memref.load %arg0[%c5, %c0_92] : memref<8x2xi32, #tpu.memory_space<smem>>
    %c5_93 = arith.constant 5 : index
    %c1_94 = arith.constant 1 : index
    %304 = memref.load %arg0[%c5_93, %c1_94] : memref<8x2xi32, #tpu.memory_space<smem>>
    %305 = arith.index_cast %303 : i32 to index
    %c0_95 = arith.constant 0 : index
    %c0_96 = arith.constant 0 : index
    %306 = vector.load %arg3[%305, %c0_95, %c0_96] : memref<260x1x32xf32, #tpu.memory_space<vmem>>, vector<1x1x32xf32>
    %307 = vector.shape_cast %306 : vector<1x1x32xf32> to vector<1x32xf32>
    %308 = arith.index_cast %304 : i32 to index
    %c0_97 = arith.constant 0 : index
    %c0_98 = arith.constant 0 : index
    %309 = vector.load %arg3[%308, %c0_97, %c0_98] : memref<260x1x32xf32, #tpu.memory_space<vmem>>, vector<1x1x32xf32>
    %310 = vector.shape_cast %309 : vector<1x1x32xf32> to vector<1x32xf32>
    %311 = tpu.concatenate %307, %310 in 0 : vector<1x32xf32>, vector<1x32xf32> -> vector<2x32xf32>
    %312 = tpu.concatenate %311, %302 in 1 : vector<2x32xf32>, vector<2x32xf32> -> vector<2x64xf32>
    %c0_99 = arith.constant 0 : index
    %c0_100 = arith.constant 0 : index
    %313 = vector.load %arg4[%c0_99, %c0_100] : memref<64x128xf32, #tpu.memory_space<vmem>>, vector<64x128xf32>
    %cst_101 = arith.constant dense<0.000000e+00> : vector<2x128xf32>
    %314 = tpu.matmul %312, %313, %cst_101 {dimension_numbers = #tpu.dot_dimension_numbers<[1], [0], [0], [1], [0, 0, 1, 1], [], []>} : vector<2x64xf32>, vector<64x128xf32>, vector<2x128xf32> -> vector<2x128xf32>
    %c0_102 = arith.constant 0 : index
    %c0_103 = arith.constant 0 : index
    %315 = vector.load %arg5[%c0_102, %c0_103] : memref<1x128xf32, #tpu.memory_space<vmem>>, vector<1x128xf32>
    %316 = vector.broadcast %315 : vector<1x128xf32> to vector<2x128xf32>
    %317 = arith.addf %314, %316 : vector<2x128xf32>
    %318 = vector.extract_strided_slice %317 {offsets = [0, 0], sizes = [2, 32], strides = [1, 1]} : vector<2x128xf32> to vector<2x32xf32>
    %319 = arith.negf %318 : vector<2x32xf32>
    %320 = math.exp %319 : vector<2x32xf32>
    %cst_104 = arith.constant 1.000000e+00 : f32
    %321 = vector.broadcast %cst_104 : f32 to vector<2x32xf32>
    %322 = arith.addf %321, %320 : vector<2x32xf32>
    %323 = arith.divf %321, %322 : vector<2x32xf32>
    %324 = vector.extract_strided_slice %317 {offsets = [0, 32], sizes = [2, 32], strides = [1, 1]} : vector<2x128xf32> to vector<2x32xf32>
    %325 = arith.negf %324 : vector<2x32xf32>
    %326 = math.exp %325 : vector<2x32xf32>
    %cst_105 = arith.constant 1.000000e+00 : f32
    %327 = vector.broadcast %cst_105 : f32 to vector<2x32xf32>
    %328 = arith.addf %327, %326 : vector<2x32xf32>
    %329 = arith.divf %327, %328 : vector<2x32xf32>
    %330 = vector.extract_strided_slice %317 {offsets = [0, 64], sizes = [2, 32], strides = [1, 1]} : vector<2x128xf32> to vector<2x32xf32>
    %331 = vector.extract_strided_slice %317 {offsets = [0, 96], sizes = [2, 32], strides = [1, 1]} : vector<2x128xf32> to vector<2x32xf32>
    %332 = arith.mulf %323, %331 : vector<2x32xf32>
    %333 = arith.addf %330, %332 : vector<2x32xf32>
    %334 = math.tanh %333 : vector<2x32xf32>
    %cst_106 = arith.constant 1.000000e+00 : f32
    %335 = vector.broadcast %cst_106 : f32 to vector<2x32xf32>
    %336 = arith.subf %335, %329 : vector<2x32xf32>
    %337 = arith.mulf %336, %334 : vector<2x32xf32>
    %338 = arith.mulf %329, %302 : vector<2x32xf32>
    %339 = arith.addf %337, %338 : vector<2x32xf32>
    %c5_i32 = arith.constant 5 : i32
    %340 = arith.cmpi sgt, %0, %c5_i32 : i32
    %341 = arith.extui %340 : i1 to i32
    %342 = arith.sitofp %341 : i32 to f32
    %343 = vector.extract_strided_slice %339 {offsets = [0, 0], sizes = [1, 32], strides = [1, 1]} : vector<2x32xf32> to vector<1x32xf32>
    %344 = vector.broadcast %342 : f32 to vector<1x32xf32>
    %345 = arith.mulf %344, %343 : vector<1x32xf32>
    %cst_107 = arith.constant 1.000000e+00 : f32
    %346 = arith.subf %cst_107, %342 : f32
    %347 = vector.extract_strided_slice %302 {offsets = [0, 0], sizes = [1, 32], strides = [1, 1]} : vector<2x32xf32> to vector<1x32xf32>
    %348 = vector.broadcast %346 : f32 to vector<1x32xf32>
    %349 = arith.mulf %348, %347 : vector<1x32xf32>
    %350 = arith.addf %345, %349 : vector<1x32xf32>
    %c5_i32_108 = arith.constant 5 : i32
    %351 = arith.cmpi sgt, %1, %c5_i32_108 : i32
    %352 = arith.extui %351 : i1 to i32
    %353 = arith.sitofp %352 : i32 to f32
    %354 = vector.extract_strided_slice %339 {offsets = [1, 0], sizes = [1, 32], strides = [1, 1]} : vector<2x32xf32> to vector<1x32xf32>
    %355 = vector.broadcast %353 : f32 to vector<1x32xf32>
    %356 = arith.mulf %355, %354 : vector<1x32xf32>
    %cst_109 = arith.constant 1.000000e+00 : f32
    %357 = arith.subf %cst_109, %353 : f32
    %358 = vector.extract_strided_slice %302 {offsets = [1, 0], sizes = [1, 32], strides = [1, 1]} : vector<2x32xf32> to vector<1x32xf32>
    %359 = vector.broadcast %357 : f32 to vector<1x32xf32>
    %360 = arith.mulf %359, %358 : vector<1x32xf32>
    %361 = arith.addf %356, %360 : vector<1x32xf32>
    %362 = tpu.concatenate %350, %361 in 0 : vector<1x32xf32>, vector<1x32xf32> -> vector<2x32xf32>
    %c6 = arith.constant 6 : index
    %c0_110 = arith.constant 0 : index
    %363 = memref.load %arg0[%c6, %c0_110] : memref<8x2xi32, #tpu.memory_space<smem>>
    %c6_111 = arith.constant 6 : index
    %c1_112 = arith.constant 1 : index
    %364 = memref.load %arg0[%c6_111, %c1_112] : memref<8x2xi32, #tpu.memory_space<smem>>
    %365 = arith.index_cast %363 : i32 to index
    %c0_113 = arith.constant 0 : index
    %c0_114 = arith.constant 0 : index
    %366 = vector.load %arg3[%365, %c0_113, %c0_114] : memref<260x1x32xf32, #tpu.memory_space<vmem>>, vector<1x1x32xf32>
    %367 = vector.shape_cast %366 : vector<1x1x32xf32> to vector<1x32xf32>
    %368 = arith.index_cast %364 : i32 to index
    %c0_115 = arith.constant 0 : index
    %c0_116 = arith.constant 0 : index
    %369 = vector.load %arg3[%368, %c0_115, %c0_116] : memref<260x1x32xf32, #tpu.memory_space<vmem>>, vector<1x1x32xf32>
    %370 = vector.shape_cast %369 : vector<1x1x32xf32> to vector<1x32xf32>
    %371 = tpu.concatenate %367, %370 in 0 : vector<1x32xf32>, vector<1x32xf32> -> vector<2x32xf32>
    %372 = tpu.concatenate %371, %362 in 1 : vector<2x32xf32>, vector<2x32xf32> -> vector<2x64xf32>
    %c0_117 = arith.constant 0 : index
    %c0_118 = arith.constant 0 : index
    %373 = vector.load %arg4[%c0_117, %c0_118] : memref<64x128xf32, #tpu.memory_space<vmem>>, vector<64x128xf32>
    %cst_119 = arith.constant dense<0.000000e+00> : vector<2x128xf32>
    %374 = tpu.matmul %372, %373, %cst_119 {dimension_numbers = #tpu.dot_dimension_numbers<[1], [0], [0], [1], [0, 0, 1, 1], [], []>} : vector<2x64xf32>, vector<64x128xf32>, vector<2x128xf32> -> vector<2x128xf32>
    %c0_120 = arith.constant 0 : index
    %c0_121 = arith.constant 0 : index
    %375 = vector.load %arg5[%c0_120, %c0_121] : memref<1x128xf32, #tpu.memory_space<vmem>>, vector<1x128xf32>
    %376 = vector.broadcast %375 : vector<1x128xf32> to vector<2x128xf32>
    %377 = arith.addf %374, %376 : vector<2x128xf32>
    %378 = vector.extract_strided_slice %377 {offsets = [0, 0], sizes = [2, 32], strides = [1, 1]} : vector<2x128xf32> to vector<2x32xf32>
    %379 = arith.negf %378 : vector<2x32xf32>
    %380 = math.exp %379 : vector<2x32xf32>
    %cst_122 = arith.constant 1.000000e+00 : f32
    %381 = vector.broadcast %cst_122 : f32 to vector<2x32xf32>
    %382 = arith.addf %381, %380 : vector<2x32xf32>
    %383 = arith.divf %381, %382 : vector<2x32xf32>
    %384 = vector.extract_strided_slice %377 {offsets = [0, 32], sizes = [2, 32], strides = [1, 1]} : vector<2x128xf32> to vector<2x32xf32>
    %385 = arith.negf %384 : vector<2x32xf32>
    %386 = math.exp %385 : vector<2x32xf32>
    %cst_123 = arith.constant 1.000000e+00 : f32
    %387 = vector.broadcast %cst_123 : f32 to vector<2x32xf32>
    %388 = arith.addf %387, %386 : vector<2x32xf32>
    %389 = arith.divf %387, %388 : vector<2x32xf32>
    %390 = vector.extract_strided_slice %377 {offsets = [0, 64], sizes = [2, 32], strides = [1, 1]} : vector<2x128xf32> to vector<2x32xf32>
    %391 = vector.extract_strided_slice %377 {offsets = [0, 96], sizes = [2, 32], strides = [1, 1]} : vector<2x128xf32> to vector<2x32xf32>
    %392 = arith.mulf %383, %391 : vector<2x32xf32>
    %393 = arith.addf %390, %392 : vector<2x32xf32>
    %394 = math.tanh %393 : vector<2x32xf32>
    %cst_124 = arith.constant 1.000000e+00 : f32
    %395 = vector.broadcast %cst_124 : f32 to vector<2x32xf32>
    %396 = arith.subf %395, %389 : vector<2x32xf32>
    %397 = arith.mulf %396, %394 : vector<2x32xf32>
    %398 = arith.mulf %389, %362 : vector<2x32xf32>
    %399 = arith.addf %397, %398 : vector<2x32xf32>
    %c6_i32 = arith.constant 6 : i32
    %400 = arith.cmpi sgt, %0, %c6_i32 : i32
    %401 = arith.extui %400 : i1 to i32
    %402 = arith.sitofp %401 : i32 to f32
    %403 = vector.extract_strided_slice %399 {offsets = [0, 0], sizes = [1, 32], strides = [1, 1]} : vector<2x32xf32> to vector<1x32xf32>
    %404 = vector.broadcast %402 : f32 to vector<1x32xf32>
    %405 = arith.mulf %404, %403 : vector<1x32xf32>
    %cst_125 = arith.constant 1.000000e+00 : f32
    %406 = arith.subf %cst_125, %402 : f32
    %407 = vector.extract_strided_slice %362 {offsets = [0, 0], sizes = [1, 32], strides = [1, 1]} : vector<2x32xf32> to vector<1x32xf32>
    %408 = vector.broadcast %406 : f32 to vector<1x32xf32>
    %409 = arith.mulf %408, %407 : vector<1x32xf32>
    %410 = arith.addf %405, %409 : vector<1x32xf32>
    %c6_i32_126 = arith.constant 6 : i32
    %411 = arith.cmpi sgt, %1, %c6_i32_126 : i32
    %412 = arith.extui %411 : i1 to i32
    %413 = arith.sitofp %412 : i32 to f32
    %414 = vector.extract_strided_slice %399 {offsets = [1, 0], sizes = [1, 32], strides = [1, 1]} : vector<2x32xf32> to vector<1x32xf32>
    %415 = vector.broadcast %413 : f32 to vector<1x32xf32>
    %416 = arith.mulf %415, %414 : vector<1x32xf32>
    %cst_127 = arith.constant 1.000000e+00 : f32
    %417 = arith.subf %cst_127, %413 : f32
    %418 = vector.extract_strided_slice %362 {offsets = [1, 0], sizes = [1, 32], strides = [1, 1]} : vector<2x32xf32> to vector<1x32xf32>
    %419 = vector.broadcast %417 : f32 to vector<1x32xf32>
    %420 = arith.mulf %419, %418 : vector<1x32xf32>
    %421 = arith.addf %416, %420 : vector<1x32xf32>
    %422 = tpu.concatenate %410, %421 in 0 : vector<1x32xf32>, vector<1x32xf32> -> vector<2x32xf32>
    %c7 = arith.constant 7 : index
    %c0_128 = arith.constant 0 : index
    %423 = memref.load %arg0[%c7, %c0_128] : memref<8x2xi32, #tpu.memory_space<smem>>
    %c7_129 = arith.constant 7 : index
    %c1_130 = arith.constant 1 : index
    %424 = memref.load %arg0[%c7_129, %c1_130] : memref<8x2xi32, #tpu.memory_space<smem>>
    %425 = arith.index_cast %423 : i32 to index
    %c0_131 = arith.constant 0 : index
    %c0_132 = arith.constant 0 : index
    %426 = vector.load %arg3[%425, %c0_131, %c0_132] : memref<260x1x32xf32, #tpu.memory_space<vmem>>, vector<1x1x32xf32>
    %427 = vector.shape_cast %426 : vector<1x1x32xf32> to vector<1x32xf32>
    %428 = arith.index_cast %424 : i32 to index
    %c0_133 = arith.constant 0 : index
    %c0_134 = arith.constant 0 : index
    %429 = vector.load %arg3[%428, %c0_133, %c0_134] : memref<260x1x32xf32, #tpu.memory_space<vmem>>, vector<1x1x32xf32>
    %430 = vector.shape_cast %429 : vector<1x1x32xf32> to vector<1x32xf32>
    %431 = tpu.concatenate %427, %430 in 0 : vector<1x32xf32>, vector<1x32xf32> -> vector<2x32xf32>
    %432 = tpu.concatenate %431, %422 in 1 : vector<2x32xf32>, vector<2x32xf32> -> vector<2x64xf32>
    %c0_135 = arith.constant 0 : index
    %c0_136 = arith.constant 0 : index
    %433 = vector.load %arg4[%c0_135, %c0_136] : memref<64x128xf32, #tpu.memory_space<vmem>>, vector<64x128xf32>
    %cst_137 = arith.constant dense<0.000000e+00> : vector<2x128xf32>
    %434 = tpu.matmul %432, %433, %cst_137 {dimension_numbers = #tpu.dot_dimension_numbers<[1], [0], [0], [1], [0, 0, 1, 1], [], []>} : vector<2x64xf32>, vector<64x128xf32>, vector<2x128xf32> -> vector<2x128xf32>
    %c0_138 = arith.constant 0 : index
    %c0_139 = arith.constant 0 : index
    %435 = vector.load %arg5[%c0_138, %c0_139] : memref<1x128xf32, #tpu.memory_space<vmem>>, vector<1x128xf32>
    %436 = vector.broadcast %435 : vector<1x128xf32> to vector<2x128xf32>
    %437 = arith.addf %434, %436 : vector<2x128xf32>
    %438 = vector.extract_strided_slice %437 {offsets = [0, 0], sizes = [2, 32], strides = [1, 1]} : vector<2x128xf32> to vector<2x32xf32>
    %439 = arith.negf %438 : vector<2x32xf32>
    %440 = math.exp %439 : vector<2x32xf32>
    %cst_140 = arith.constant 1.000000e+00 : f32
    %441 = vector.broadcast %cst_140 : f32 to vector<2x32xf32>
    %442 = arith.addf %441, %440 : vector<2x32xf32>
    %443 = arith.divf %441, %442 : vector<2x32xf32>
    %444 = vector.extract_strided_slice %437 {offsets = [0, 32], sizes = [2, 32], strides = [1, 1]} : vector<2x128xf32> to vector<2x32xf32>
    %445 = arith.negf %444 : vector<2x32xf32>
    %446 = math.exp %445 : vector<2x32xf32>
    %cst_141 = arith.constant 1.000000e+00 : f32
    %447 = vector.broadcast %cst_141 : f32 to vector<2x32xf32>
    %448 = arith.addf %447, %446 : vector<2x32xf32>
    %449 = arith.divf %447, %448 : vector<2x32xf32>
    %450 = vector.extract_strided_slice %437 {offsets = [0, 64], sizes = [2, 32], strides = [1, 1]} : vector<2x128xf32> to vector<2x32xf32>
    %451 = vector.extract_strided_slice %437 {offsets = [0, 96], sizes = [2, 32], strides = [1, 1]} : vector<2x128xf32> to vector<2x32xf32>
    %452 = arith.mulf %443, %451 : vector<2x32xf32>
    %453 = arith.addf %450, %452 : vector<2x32xf32>
    %454 = math.tanh %453 : vector<2x32xf32>
    %cst_142 = arith.constant 1.000000e+00 : f32
    %455 = vector.broadcast %cst_142 : f32 to vector<2x32xf32>
    %456 = arith.subf %455, %449 : vector<2x32xf32>
    %457 = arith.mulf %456, %454 : vector<2x32xf32>
    %458 = arith.mulf %449, %422 : vector<2x32xf32>
    %459 = arith.addf %457, %458 : vector<2x32xf32>
    %c7_i32 = arith.constant 7 : i32
    %460 = arith.cmpi sgt, %0, %c7_i32 : i32
    %461 = arith.extui %460 : i1 to i32
    %462 = arith.sitofp %461 : i32 to f32
    %463 = vector.extract_strided_slice %459 {offsets = [0, 0], sizes = [1, 32], strides = [1, 1]} : vector<2x32xf32> to vector<1x32xf32>
    %464 = vector.broadcast %462 : f32 to vector<1x32xf32>
    %465 = arith.mulf %464, %463 : vector<1x32xf32>
    %cst_143 = arith.constant 1.000000e+00 : f32
    %466 = arith.subf %cst_143, %462 : f32
    %467 = vector.extract_strided_slice %422 {offsets = [0, 0], sizes = [1, 32], strides = [1, 1]} : vector<2x32xf32> to vector<1x32xf32>
    %468 = vector.broadcast %466 : f32 to vector<1x32xf32>
    %469 = arith.mulf %468, %467 : vector<1x32xf32>
    %470 = arith.addf %465, %469 : vector<1x32xf32>
    %c7_i32_144 = arith.constant 7 : i32
    %471 = arith.cmpi sgt, %1, %c7_i32_144 : i32
    %472 = arith.extui %471 : i1 to i32
    %473 = arith.sitofp %472 : i32 to f32
    %474 = vector.extract_strided_slice %459 {offsets = [1, 0], sizes = [1, 32], strides = [1, 1]} : vector<2x32xf32> to vector<1x32xf32>
    %475 = vector.broadcast %473 : f32 to vector<1x32xf32>
    %476 = arith.mulf %475, %474 : vector<1x32xf32>
    %cst_145 = arith.constant 1.000000e+00 : f32
    %477 = arith.subf %cst_145, %473 : f32
    %478 = vector.extract_strided_slice %422 {offsets = [1, 0], sizes = [1, 32], strides = [1, 1]} : vector<2x32xf32> to vector<1x32xf32>
    %479 = vector.broadcast %477 : f32 to vector<1x32xf32>
    %480 = arith.mulf %479, %478 : vector<1x32xf32>
    %481 = arith.addf %476, %480 : vector<1x32xf32>
    %482 = tpu.concatenate %470, %481 in 0 : vector<1x32xf32>, vector<1x32xf32> -> vector<2x32xf32>
    %483 = tpu.iota {dimensions = array<i32: 1>} : vector<2x384xi32>
    %cst_146 = arith.constant 0.000000e+00 : f32
    %484 = vector.broadcast %cst_146 : f32 to vector<2x1xf32>
    %cst_147 = arith.constant 0.000000e+00 : f32
    %485 = vector.broadcast %cst_147 : f32 to vector<2x1xf32>
    %c256 = arith.constant 256 : index
    %c0_148 = arith.constant 0 : index
    %c0_149 = arith.constant 0 : index
    %486 = vector.load %arg6[%c256, %c0_148, %c0_149] : memref<260x1x32xf32, #tpu.memory_space<vmem>>, vector<1x1x32xf32>
    %487 = vector.shape_cast %486 : vector<1x1x32xf32> to vector<1x32xf32>
    %c256_150 = arith.constant 256 : index
    %c0_151 = arith.constant 0 : index
    %c0_152 = arith.constant 0 : index
    %488 = vector.load %arg6[%c256_150, %c0_151, %c0_152] : memref<260x1x32xf32, #tpu.memory_space<vmem>>, vector<1x1x32xf32>
    %489 = vector.shape_cast %488 : vector<1x1x32xf32> to vector<1x32xf32>
    %490 = tpu.concatenate %487, %489 in 0 : vector<1x32xf32>, vector<1x32xf32> -> vector<2x32xf32>
    %491 = tpu.concatenate %490, %482 in 1 : vector<2x32xf32>, vector<2x32xf32> -> vector<2x64xf32>
    %c0_153 = arith.constant 0 : index
    %c0_154 = arith.constant 0 : index
    %492 = vector.load %arg7[%c0_153, %c0_154] : memref<64x128xf32, #tpu.memory_space<vmem>>, vector<64x128xf32>
    %cst_155 = arith.constant dense<0.000000e+00> : vector<2x128xf32>
    %493 = tpu.matmul %491, %492, %cst_155 {dimension_numbers = #tpu.dot_dimension_numbers<[1], [0], [0], [1], [0, 0, 1, 1], [], []>} : vector<2x64xf32>, vector<64x128xf32>, vector<2x128xf32> -> vector<2x128xf32>
    %c0_156 = arith.constant 0 : index
    %c0_157 = arith.constant 0 : index
    %494 = vector.load %arg8[%c0_156, %c0_157] : memref<1x128xf32, #tpu.memory_space<vmem>>, vector<1x128xf32>
    %495 = vector.broadcast %494 : vector<1x128xf32> to vector<2x128xf32>
    %496 = arith.addf %493, %495 : vector<2x128xf32>
    %497 = vector.extract_strided_slice %496 {offsets = [0, 0], sizes = [2, 32], strides = [1, 1]} : vector<2x128xf32> to vector<2x32xf32>
    %498 = arith.negf %497 : vector<2x32xf32>
    %499 = math.exp %498 : vector<2x32xf32>
    %cst_158 = arith.constant 1.000000e+00 : f32
    %500 = vector.broadcast %cst_158 : f32 to vector<2x32xf32>
    %501 = arith.addf %500, %499 : vector<2x32xf32>
    %502 = arith.divf %500, %501 : vector<2x32xf32>
    %503 = vector.extract_strided_slice %496 {offsets = [0, 32], sizes = [2, 32], strides = [1, 1]} : vector<2x128xf32> to vector<2x32xf32>
    %504 = arith.negf %503 : vector<2x32xf32>
    %505 = math.exp %504 : vector<2x32xf32>
    %cst_159 = arith.constant 1.000000e+00 : f32
    %506 = vector.broadcast %cst_159 : f32 to vector<2x32xf32>
    %507 = arith.addf %506, %505 : vector<2x32xf32>
    %508 = arith.divf %506, %507 : vector<2x32xf32>
    %509 = vector.extract_strided_slice %496 {offsets = [0, 64], sizes = [2, 32], strides = [1, 1]} : vector<2x128xf32> to vector<2x32xf32>
    %510 = vector.extract_strided_slice %496 {offsets = [0, 96], sizes = [2, 32], strides = [1, 1]} : vector<2x128xf32> to vector<2x32xf32>
    %511 = arith.mulf %502, %510 : vector<2x32xf32>
    %512 = arith.addf %509, %511 : vector<2x32xf32>
    %513 = math.tanh %512 : vector<2x32xf32>
    %cst_160 = arith.constant 1.000000e+00 : f32
    %514 = vector.broadcast %cst_160 : f32 to vector<2x32xf32>
    %515 = arith.subf %514, %508 : vector<2x32xf32>
    %516 = arith.mulf %515, %513 : vector<2x32xf32>
    %517 = arith.mulf %508, %482 : vector<2x32xf32>
    %518 = arith.addf %516, %517 : vector<2x32xf32>
    %c0_161 = arith.constant 0 : index
    %c0_162 = arith.constant 0 : index
    %519 = vector.load %arg9[%c0_161, %c0_162] : memref<32x384xf32, #tpu.memory_space<vmem>>, vector<32x384xf32>
    %cst_163 = arith.constant dense<0.000000e+00> : vector<2x384xf32>
    %520 = tpu.matmul %518, %519, %cst_163 {dimension_numbers = #tpu.dot_dimension_numbers<[1], [0], [0], [1], [0, 0, 1, 1], [], []>} : vector<2x32xf32>, vector<32x384xf32>, vector<2x384xf32> -> vector<2x384xf32>
    %c0_164 = arith.constant 0 : index
    %c0_165 = arith.constant 0 : index
    %521 = vector.load %arg10[%c0_164, %c0_165] : memref<1x384xf32, #tpu.memory_space<vmem>>, vector<1x384xf32>
    %522 = vector.broadcast %521 : vector<1x384xf32> to vector<2x384xf32>
    %523 = arith.addf %520, %522 : vector<2x384xf32>
    %cst_166 = arith.constant dense<0xFF800000> : vector<2xf32>
    %524 = vector.multi_reduction <maximumf>, %523, %cst_166 [1] : vector<2x384xf32> to vector<2xf32>
    %525 = vector.shape_cast %524 : vector<2xf32> to vector<2x1xf32>
    %526 = vector.broadcast %525 : vector<2x1xf32> to vector<2x384xf32>
    %527 = arith.subf %523, %526 : vector<2x384xf32>
    %528 = math.exp %527 : vector<2x384xf32>
    %cst_167 = arith.constant dense<0.000000e+00> : vector<2xf32>
    %529 = vector.multi_reduction <add>, %528, %cst_167 [1] : vector<2x384xf32> to vector<2xf32>
    %530 = vector.shape_cast %529 : vector<2xf32> to vector<2x1xf32>
    %531 = math.log %530 : vector<2x1xf32>
    %532 = arith.addf %531, %525 : vector<2x1xf32>
    %c0_168 = arith.constant 0 : index
    %c0_169 = arith.constant 0 : index
    %533 = memref.load %arg2[%c0_168, %c0_169] : memref<8x2xi32, #tpu.memory_space<smem>>
    %534 = vector.broadcast %533 : i32 to vector<1x1xi32>
    %c0_170 = arith.constant 0 : index
    %c1_171 = arith.constant 1 : index
    %535 = memref.load %arg2[%c0_170, %c1_171] : memref<8x2xi32, #tpu.memory_space<smem>>
    %536 = vector.broadcast %535 : i32 to vector<1x1xi32>
    %537 = tpu.concatenate %534, %536 in 0 : vector<1x1xi32>, vector<1x1xi32> -> vector<2x1xi32>
    %538 = vector.broadcast %537 : vector<2x1xi32> to vector<2x384xi32>
    %539 = arith.cmpi eq, %483, %538 : vector<2x384xi32>
    %540 = arith.extui %539 : vector<2x384xi1> to vector<2x384xi32>
    %541 = arith.sitofp %540 : vector<2x384xi32> to vector<2x384xf32>
    %542 = arith.mulf %523, %541 : vector<2x384xf32>
    %cst_172 = arith.constant dense<0.000000e+00> : vector<2xf32>
    %543 = vector.multi_reduction <add>, %542, %cst_172 [1] : vector<2x384xf32> to vector<2xf32>
    %544 = vector.shape_cast %543 : vector<2xf32> to vector<2x1xf32>
    %c258_i32 = arith.constant 258 : i32
    %545 = vector.broadcast %c258_i32 : i32 to vector<2x1xi32>
    %546 = arith.cmpi ne, %537, %545 : vector<2x1xi32>
    %547 = arith.extui %546 : vector<2x1xi1> to vector<2x1xi32>
    %548 = arith.sitofp %547 : vector<2x1xi32> to vector<2x1xf32>
    %549 = arith.subf %544, %532 : vector<2x1xf32>
    %550 = arith.mulf %549, %548 : vector<2x1xf32>
    %551 = arith.addf %484, %550 : vector<2x1xf32>
    %552 = arith.addf %485, %548 : vector<2x1xf32>
    %c0_173 = arith.constant 0 : index
    %c0_174 = arith.constant 0 : index
    %553 = memref.load %arg2[%c0_173, %c0_174] : memref<8x2xi32, #tpu.memory_space<smem>>
    %c0_175 = arith.constant 0 : index
    %c1_176 = arith.constant 1 : index
    %554 = memref.load %arg2[%c0_175, %c1_176] : memref<8x2xi32, #tpu.memory_space<smem>>
    %555 = arith.index_cast %553 : i32 to index
    %c0_177 = arith.constant 0 : index
    %c0_178 = arith.constant 0 : index
    %556 = vector.load %arg6[%555, %c0_177, %c0_178] : memref<260x1x32xf32, #tpu.memory_space<vmem>>, vector<1x1x32xf32>
    %557 = vector.shape_cast %556 : vector<1x1x32xf32> to vector<1x32xf32>
    %558 = arith.index_cast %554 : i32 to index
    %c0_179 = arith.constant 0 : index
    %c0_180 = arith.constant 0 : index
    %559 = vector.load %arg6[%558, %c0_179, %c0_180] : memref<260x1x32xf32, #tpu.memory_space<vmem>>, vector<1x1x32xf32>
    %560 = vector.shape_cast %559 : vector<1x1x32xf32> to vector<1x32xf32>
    %561 = tpu.concatenate %557, %560 in 0 : vector<1x32xf32>, vector<1x32xf32> -> vector<2x32xf32>
    %562 = tpu.concatenate %561, %518 in 1 : vector<2x32xf32>, vector<2x32xf32> -> vector<2x64xf32>
    %c0_181 = arith.constant 0 : index
    %c0_182 = arith.constant 0 : index
    %563 = vector.load %arg7[%c0_181, %c0_182] : memref<64x128xf32, #tpu.memory_space<vmem>>, vector<64x128xf32>
    %cst_183 = arith.constant dense<0.000000e+00> : vector<2x128xf32>
    %564 = tpu.matmul %562, %563, %cst_183 {dimension_numbers = #tpu.dot_dimension_numbers<[1], [0], [0], [1], [0, 0, 1, 1], [], []>} : vector<2x64xf32>, vector<64x128xf32>, vector<2x128xf32> -> vector<2x128xf32>
    %c0_184 = arith.constant 0 : index
    %c0_185 = arith.constant 0 : index
    %565 = vector.load %arg8[%c0_184, %c0_185] : memref<1x128xf32, #tpu.memory_space<vmem>>, vector<1x128xf32>
    %566 = vector.broadcast %565 : vector<1x128xf32> to vector<2x128xf32>
    %567 = arith.addf %564, %566 : vector<2x128xf32>
    %568 = vector.extract_strided_slice %567 {offsets = [0, 0], sizes = [2, 32], strides = [1, 1]} : vector<2x128xf32> to vector<2x32xf32>
    %569 = arith.negf %568 : vector<2x32xf32>
    %570 = math.exp %569 : vector<2x32xf32>
    %cst_186 = arith.constant 1.000000e+00 : f32
    %571 = vector.broadcast %cst_186 : f32 to vector<2x32xf32>
    %572 = arith.addf %571, %570 : vector<2x32xf32>
    %573 = arith.divf %571, %572 : vector<2x32xf32>
    %574 = vector.extract_strided_slice %567 {offsets = [0, 32], sizes = [2, 32], strides = [1, 1]} : vector<2x128xf32> to vector<2x32xf32>
    %575 = arith.negf %574 : vector<2x32xf32>
    %576 = math.exp %575 : vector<2x32xf32>
    %cst_187 = arith.constant 1.000000e+00 : f32
    %577 = vector.broadcast %cst_187 : f32 to vector<2x32xf32>
    %578 = arith.addf %577, %576 : vector<2x32xf32>
    %579 = arith.divf %577, %578 : vector<2x32xf32>
    %580 = vector.extract_strided_slice %567 {offsets = [0, 64], sizes = [2, 32], strides = [1, 1]} : vector<2x128xf32> to vector<2x32xf32>
    %581 = vector.extract_strided_slice %567 {offsets = [0, 96], sizes = [2, 32], strides = [1, 1]} : vector<2x128xf32> to vector<2x32xf32>
    %582 = arith.mulf %573, %581 : vector<2x32xf32>
    %583 = arith.addf %580, %582 : vector<2x32xf32>
    %584 = math.tanh %583 : vector<2x32xf32>
    %cst_188 = arith.constant 1.000000e+00 : f32
    %585 = vector.broadcast %cst_188 : f32 to vector<2x32xf32>
    %586 = arith.subf %585, %579 : vector<2x32xf32>
    %587 = arith.mulf %586, %584 : vector<2x32xf32>
    %588 = arith.mulf %579, %518 : vector<2x32xf32>
    %589 = arith.addf %587, %588 : vector<2x32xf32>
    %c0_189 = arith.constant 0 : index
    %c0_190 = arith.constant 0 : index
    %590 = vector.load %arg9[%c0_189, %c0_190] : memref<32x384xf32, #tpu.memory_space<vmem>>, vector<32x384xf32>
    %cst_191 = arith.constant dense<0.000000e+00> : vector<2x384xf32>
    %591 = tpu.matmul %589, %590, %cst_191 {dimension_numbers = #tpu.dot_dimension_numbers<[1], [0], [0], [1], [0, 0, 1, 1], [], []>} : vector<2x32xf32>, vector<32x384xf32>, vector<2x384xf32> -> vector<2x384xf32>
    %c0_192 = arith.constant 0 : index
    %c0_193 = arith.constant 0 : index
    %592 = vector.load %arg10[%c0_192, %c0_193] : memref<1x384xf32, #tpu.memory_space<vmem>>, vector<1x384xf32>
    %593 = vector.broadcast %592 : vector<1x384xf32> to vector<2x384xf32>
    %594 = arith.addf %591, %593 : vector<2x384xf32>
    %cst_194 = arith.constant dense<0xFF800000> : vector<2xf32>
    %595 = vector.multi_reduction <maximumf>, %594, %cst_194 [1] : vector<2x384xf32> to vector<2xf32>
    %596 = vector.shape_cast %595 : vector<2xf32> to vector<2x1xf32>
    %597 = vector.broadcast %596 : vector<2x1xf32> to vector<2x384xf32>
    %598 = arith.subf %594, %597 : vector<2x384xf32>
    %599 = math.exp %598 : vector<2x384xf32>
    %cst_195 = arith.constant dense<0.000000e+00> : vector<2xf32>
    %600 = vector.multi_reduction <add>, %599, %cst_195 [1] : vector<2x384xf32> to vector<2xf32>
    %601 = vector.shape_cast %600 : vector<2xf32> to vector<2x1xf32>
    %602 = math.log %601 : vector<2x1xf32>
    %603 = arith.addf %602, %596 : vector<2x1xf32>
    %c1_196 = arith.constant 1 : index
    %c0_197 = arith.constant 0 : index
    %604 = memref.load %arg2[%c1_196, %c0_197] : memref<8x2xi32, #tpu.memory_space<smem>>
    %605 = vector.broadcast %604 : i32 to vector<1x1xi32>
    %c1_198 = arith.constant 1 : index
    %c1_199 = arith.constant 1 : index
    %606 = memref.load %arg2[%c1_198, %c1_199] : memref<8x2xi32, #tpu.memory_space<smem>>
    %607 = vector.broadcast %606 : i32 to vector<1x1xi32>
    %608 = tpu.concatenate %605, %607 in 0 : vector<1x1xi32>, vector<1x1xi32> -> vector<2x1xi32>
    %609 = vector.broadcast %608 : vector<2x1xi32> to vector<2x384xi32>
    %610 = arith.cmpi eq, %483, %609 : vector<2x384xi32>
    %611 = arith.extui %610 : vector<2x384xi1> to vector<2x384xi32>
    %612 = arith.sitofp %611 : vector<2x384xi32> to vector<2x384xf32>
    %613 = arith.mulf %594, %612 : vector<2x384xf32>
    %cst_200 = arith.constant dense<0.000000e+00> : vector<2xf32>
    %614 = vector.multi_reduction <add>, %613, %cst_200 [1] : vector<2x384xf32> to vector<2xf32>
    %615 = vector.shape_cast %614 : vector<2xf32> to vector<2x1xf32>
    %c258_i32_201 = arith.constant 258 : i32
    %616 = vector.broadcast %c258_i32_201 : i32 to vector<2x1xi32>
    %617 = arith.cmpi ne, %608, %616 : vector<2x1xi32>
    %618 = arith.extui %617 : vector<2x1xi1> to vector<2x1xi32>
    %619 = arith.sitofp %618 : vector<2x1xi32> to vector<2x1xf32>
    %620 = arith.subf %615, %603 : vector<2x1xf32>
    %621 = arith.mulf %620, %619 : vector<2x1xf32>
    %622 = arith.addf %551, %621 : vector<2x1xf32>
    %623 = arith.addf %552, %619 : vector<2x1xf32>
    %c1_202 = arith.constant 1 : index
    %c0_203 = arith.constant 0 : index
    %624 = memref.load %arg2[%c1_202, %c0_203] : memref<8x2xi32, #tpu.memory_space<smem>>
    %c1_204 = arith.constant 1 : index
    %c1_205 = arith.constant 1 : index
    %625 = memref.load %arg2[%c1_204, %c1_205] : memref<8x2xi32, #tpu.memory_space<smem>>
    %626 = arith.index_cast %624 : i32 to index
    %c0_206 = arith.constant 0 : index
    %c0_207 = arith.constant 0 : index
    %627 = vector.load %arg6[%626, %c0_206, %c0_207] : memref<260x1x32xf32, #tpu.memory_space<vmem>>, vector<1x1x32xf32>
    %628 = vector.shape_cast %627 : vector<1x1x32xf32> to vector<1x32xf32>
    %629 = arith.index_cast %625 : i32 to index
    %c0_208 = arith.constant 0 : index
    %c0_209 = arith.constant 0 : index
    %630 = vector.load %arg6[%629, %c0_208, %c0_209] : memref<260x1x32xf32, #tpu.memory_space<vmem>>, vector<1x1x32xf32>
    %631 = vector.shape_cast %630 : vector<1x1x32xf32> to vector<1x32xf32>
    %632 = tpu.concatenate %628, %631 in 0 : vector<1x32xf32>, vector<1x32xf32> -> vector<2x32xf32>
    %633 = tpu.concatenate %632, %589 in 1 : vector<2x32xf32>, vector<2x32xf32> -> vector<2x64xf32>
    %c0_210 = arith.constant 0 : index
    %c0_211 = arith.constant 0 : index
    %634 = vector.load %arg7[%c0_210, %c0_211] : memref<64x128xf32, #tpu.memory_space<vmem>>, vector<64x128xf32>
    %cst_212 = arith.constant dense<0.000000e+00> : vector<2x128xf32>
    %635 = tpu.matmul %633, %634, %cst_212 {dimension_numbers = #tpu.dot_dimension_numbers<[1], [0], [0], [1], [0, 0, 1, 1], [], []>} : vector<2x64xf32>, vector<64x128xf32>, vector<2x128xf32> -> vector<2x128xf32>
    %c0_213 = arith.constant 0 : index
    %c0_214 = arith.constant 0 : index
    %636 = vector.load %arg8[%c0_213, %c0_214] : memref<1x128xf32, #tpu.memory_space<vmem>>, vector<1x128xf32>
    %637 = vector.broadcast %636 : vector<1x128xf32> to vector<2x128xf32>
    %638 = arith.addf %635, %637 : vector<2x128xf32>
    %639 = vector.extract_strided_slice %638 {offsets = [0, 0], sizes = [2, 32], strides = [1, 1]} : vector<2x128xf32> to vector<2x32xf32>
    %640 = arith.negf %639 : vector<2x32xf32>
    %641 = math.exp %640 : vector<2x32xf32>
    %cst_215 = arith.constant 1.000000e+00 : f32
    %642 = vector.broadcast %cst_215 : f32 to vector<2x32xf32>
    %643 = arith.addf %642, %641 : vector<2x32xf32>
    %644 = arith.divf %642, %643 : vector<2x32xf32>
    %645 = vector.extract_strided_slice %638 {offsets = [0, 32], sizes = [2, 32], strides = [1, 1]} : vector<2x128xf32> to vector<2x32xf32>
    %646 = arith.negf %645 : vector<2x32xf32>
    %647 = math.exp %646 : vector<2x32xf32>
    %cst_216 = arith.constant 1.000000e+00 : f32
    %648 = vector.broadcast %cst_216 : f32 to vector<2x32xf32>
    %649 = arith.addf %648, %647 : vector<2x32xf32>
    %650 = arith.divf %648, %649 : vector<2x32xf32>
    %651 = vector.extract_strided_slice %638 {offsets = [0, 64], sizes = [2, 32], strides = [1, 1]} : vector<2x128xf32> to vector<2x32xf32>
    %652 = vector.extract_strided_slice %638 {offsets = [0, 96], sizes = [2, 32], strides = [1, 1]} : vector<2x128xf32> to vector<2x32xf32>
    %653 = arith.mulf %644, %652 : vector<2x32xf32>
    %654 = arith.addf %651, %653 : vector<2x32xf32>
    %655 = math.tanh %654 : vector<2x32xf32>
    %cst_217 = arith.constant 1.000000e+00 : f32
    %656 = vector.broadcast %cst_217 : f32 to vector<2x32xf32>
    %657 = arith.subf %656, %650 : vector<2x32xf32>
    %658 = arith.mulf %657, %655 : vector<2x32xf32>
    %659 = arith.mulf %650, %589 : vector<2x32xf32>
    %660 = arith.addf %658, %659 : vector<2x32xf32>
    %c0_218 = arith.constant 0 : index
    %c0_219 = arith.constant 0 : index
    %661 = vector.load %arg9[%c0_218, %c0_219] : memref<32x384xf32, #tpu.memory_space<vmem>>, vector<32x384xf32>
    %cst_220 = arith.constant dense<0.000000e+00> : vector<2x384xf32>
    %662 = tpu.matmul %660, %661, %cst_220 {dimension_numbers = #tpu.dot_dimension_numbers<[1], [0], [0], [1], [0, 0, 1, 1], [], []>} : vector<2x32xf32>, vector<32x384xf32>, vector<2x384xf32> -> vector<2x384xf32>
    %c0_221 = arith.constant 0 : index
    %c0_222 = arith.constant 0 : index
    %663 = vector.load %arg10[%c0_221, %c0_222] : memref<1x384xf32, #tpu.memory_space<vmem>>, vector<1x384xf32>
    %664 = vector.broadcast %663 : vector<1x384xf32> to vector<2x384xf32>
    %665 = arith.addf %662, %664 : vector<2x384xf32>
    %cst_223 = arith.constant dense<0xFF800000> : vector<2xf32>
    %666 = vector.multi_reduction <maximumf>, %665, %cst_223 [1] : vector<2x384xf32> to vector<2xf32>
    %667 = vector.shape_cast %666 : vector<2xf32> to vector<2x1xf32>
    %668 = vector.broadcast %667 : vector<2x1xf32> to vector<2x384xf32>
    %669 = arith.subf %665, %668 : vector<2x384xf32>
    %670 = math.exp %669 : vector<2x384xf32>
    %cst_224 = arith.constant dense<0.000000e+00> : vector<2xf32>
    %671 = vector.multi_reduction <add>, %670, %cst_224 [1] : vector<2x384xf32> to vector<2xf32>
    %672 = vector.shape_cast %671 : vector<2xf32> to vector<2x1xf32>
    %673 = math.log %672 : vector<2x1xf32>
    %674 = arith.addf %673, %667 : vector<2x1xf32>
    %c2_225 = arith.constant 2 : index
    %c0_226 = arith.constant 0 : index
    %675 = memref.load %arg2[%c2_225, %c0_226] : memref<8x2xi32, #tpu.memory_space<smem>>
    %676 = vector.broadcast %675 : i32 to vector<1x1xi32>
    %c2_227 = arith.constant 2 : index
    %c1_228 = arith.constant 1 : index
    %677 = memref.load %arg2[%c2_227, %c1_228] : memref<8x2xi32, #tpu.memory_space<smem>>
    %678 = vector.broadcast %677 : i32 to vector<1x1xi32>
    %679 = tpu.concatenate %676, %678 in 0 : vector<1x1xi32>, vector<1x1xi32> -> vector<2x1xi32>
    %680 = vector.broadcast %679 : vector<2x1xi32> to vector<2x384xi32>
    %681 = arith.cmpi eq, %483, %680 : vector<2x384xi32>
    %682 = arith.extui %681 : vector<2x384xi1> to vector<2x384xi32>
    %683 = arith.sitofp %682 : vector<2x384xi32> to vector<2x384xf32>
    %684 = arith.mulf %665, %683 : vector<2x384xf32>
    %cst_229 = arith.constant dense<0.000000e+00> : vector<2xf32>
    %685 = vector.multi_reduction <add>, %684, %cst_229 [1] : vector<2x384xf32> to vector<2xf32>
    %686 = vector.shape_cast %685 : vector<2xf32> to vector<2x1xf32>
    %c258_i32_230 = arith.constant 258 : i32
    %687 = vector.broadcast %c258_i32_230 : i32 to vector<2x1xi32>
    %688 = arith.cmpi ne, %679, %687 : vector<2x1xi32>
    %689 = arith.extui %688 : vector<2x1xi1> to vector<2x1xi32>
    %690 = arith.sitofp %689 : vector<2x1xi32> to vector<2x1xf32>
    %691 = arith.subf %686, %674 : vector<2x1xf32>
    %692 = arith.mulf %691, %690 : vector<2x1xf32>
    %693 = arith.addf %622, %692 : vector<2x1xf32>
    %694 = arith.addf %623, %690 : vector<2x1xf32>
    %c2_231 = arith.constant 2 : index
    %c0_232 = arith.constant 0 : index
    %695 = memref.load %arg2[%c2_231, %c0_232] : memref<8x2xi32, #tpu.memory_space<smem>>
    %c2_233 = arith.constant 2 : index
    %c1_234 = arith.constant 1 : index
    %696 = memref.load %arg2[%c2_233, %c1_234] : memref<8x2xi32, #tpu.memory_space<smem>>
    %697 = arith.index_cast %695 : i32 to index
    %c0_235 = arith.constant 0 : index
    %c0_236 = arith.constant 0 : index
    %698 = vector.load %arg6[%697, %c0_235, %c0_236] : memref<260x1x32xf32, #tpu.memory_space<vmem>>, vector<1x1x32xf32>
    %699 = vector.shape_cast %698 : vector<1x1x32xf32> to vector<1x32xf32>
    %700 = arith.index_cast %696 : i32 to index
    %c0_237 = arith.constant 0 : index
    %c0_238 = arith.constant 0 : index
    %701 = vector.load %arg6[%700, %c0_237, %c0_238] : memref<260x1x32xf32, #tpu.memory_space<vmem>>, vector<1x1x32xf32>
    %702 = vector.shape_cast %701 : vector<1x1x32xf32> to vector<1x32xf32>
    %703 = tpu.concatenate %699, %702 in 0 : vector<1x32xf32>, vector<1x32xf32> -> vector<2x32xf32>
    %704 = tpu.concatenate %703, %660 in 1 : vector<2x32xf32>, vector<2x32xf32> -> vector<2x64xf32>
    %c0_239 = arith.constant 0 : index
    %c0_240 = arith.constant 0 : index
    %705 = vector.load %arg7[%c0_239, %c0_240] : memref<64x128xf32, #tpu.memory_space<vmem>>, vector<64x128xf32>
    %cst_241 = arith.constant dense<0.000000e+00> : vector<2x128xf32>
    %706 = tpu.matmul %704, %705, %cst_241 {dimension_numbers = #tpu.dot_dimension_numbers<[1], [0], [0], [1], [0, 0, 1, 1], [], []>} : vector<2x64xf32>, vector<64x128xf32>, vector<2x128xf32> -> vector<2x128xf32>
    %c0_242 = arith.constant 0 : index
    %c0_243 = arith.constant 0 : index
    %707 = vector.load %arg8[%c0_242, %c0_243] : memref<1x128xf32, #tpu.memory_space<vmem>>, vector<1x128xf32>
    %708 = vector.broadcast %707 : vector<1x128xf32> to vector<2x128xf32>
    %709 = arith.addf %706, %708 : vector<2x128xf32>
    %710 = vector.extract_strided_slice %709 {offsets = [0, 0], sizes = [2, 32], strides = [1, 1]} : vector<2x128xf32> to vector<2x32xf32>
    %711 = arith.negf %710 : vector<2x32xf32>
    %712 = math.exp %711 : vector<2x32xf32>
    %cst_244 = arith.constant 1.000000e+00 : f32
    %713 = vector.broadcast %cst_244 : f32 to vector<2x32xf32>
    %714 = arith.addf %713, %712 : vector<2x32xf32>
    %715 = arith.divf %713, %714 : vector<2x32xf32>
    %716 = vector.extract_strided_slice %709 {offsets = [0, 32], sizes = [2, 32], strides = [1, 1]} : vector<2x128xf32> to vector<2x32xf32>
    %717 = arith.negf %716 : vector<2x32xf32>
    %718 = math.exp %717 : vector<2x32xf32>
    %cst_245 = arith.constant 1.000000e+00 : f32
    %719 = vector.broadcast %cst_245 : f32 to vector<2x32xf32>
    %720 = arith.addf %719, %718 : vector<2x32xf32>
    %721 = arith.divf %719, %720 : vector<2x32xf32>
    %722 = vector.extract_strided_slice %709 {offsets = [0, 64], sizes = [2, 32], strides = [1, 1]} : vector<2x128xf32> to vector<2x32xf32>
    %723 = vector.extract_strided_slice %709 {offsets = [0, 96], sizes = [2, 32], strides = [1, 1]} : vector<2x128xf32> to vector<2x32xf32>
    %724 = arith.mulf %715, %723 : vector<2x32xf32>
    %725 = arith.addf %722, %724 : vector<2x32xf32>
    %726 = math.tanh %725 : vector<2x32xf32>
    %cst_246 = arith.constant 1.000000e+00 : f32
    %727 = vector.broadcast %cst_246 : f32 to vector<2x32xf32>
    %728 = arith.subf %727, %721 : vector<2x32xf32>
    %729 = arith.mulf %728, %726 : vector<2x32xf32>
    %730 = arith.mulf %721, %660 : vector<2x32xf32>
    %731 = arith.addf %729, %730 : vector<2x32xf32>
    %c0_247 = arith.constant 0 : index
    %c0_248 = arith.constant 0 : index
    %732 = vector.load %arg9[%c0_247, %c0_248] : memref<32x384xf32, #tpu.memory_space<vmem>>, vector<32x384xf32>
    %cst_249 = arith.constant dense<0.000000e+00> : vector<2x384xf32>
    %733 = tpu.matmul %731, %732, %cst_249 {dimension_numbers = #tpu.dot_dimension_numbers<[1], [0], [0], [1], [0, 0, 1, 1], [], []>} : vector<2x32xf32>, vector<32x384xf32>, vector<2x384xf32> -> vector<2x384xf32>
    %c0_250 = arith.constant 0 : index
    %c0_251 = arith.constant 0 : index
    %734 = vector.load %arg10[%c0_250, %c0_251] : memref<1x384xf32, #tpu.memory_space<vmem>>, vector<1x384xf32>
    %735 = vector.broadcast %734 : vector<1x384xf32> to vector<2x384xf32>
    %736 = arith.addf %733, %735 : vector<2x384xf32>
    %cst_252 = arith.constant dense<0xFF800000> : vector<2xf32>
    %737 = vector.multi_reduction <maximumf>, %736, %cst_252 [1] : vector<2x384xf32> to vector<2xf32>
    %738 = vector.shape_cast %737 : vector<2xf32> to vector<2x1xf32>
    %739 = vector.broadcast %738 : vector<2x1xf32> to vector<2x384xf32>
    %740 = arith.subf %736, %739 : vector<2x384xf32>
    %741 = math.exp %740 : vector<2x384xf32>
    %cst_253 = arith.constant dense<0.000000e+00> : vector<2xf32>
    %742 = vector.multi_reduction <add>, %741, %cst_253 [1] : vector<2x384xf32> to vector<2xf32>
    %743 = vector.shape_cast %742 : vector<2xf32> to vector<2x1xf32>
    %744 = math.log %743 : vector<2x1xf32>
    %745 = arith.addf %744, %738 : vector<2x1xf32>
    %c3_254 = arith.constant 3 : index
    %c0_255 = arith.constant 0 : index
    %746 = memref.load %arg2[%c3_254, %c0_255] : memref<8x2xi32, #tpu.memory_space<smem>>
    %747 = vector.broadcast %746 : i32 to vector<1x1xi32>
    %c3_256 = arith.constant 3 : index
    %c1_257 = arith.constant 1 : index
    %748 = memref.load %arg2[%c3_256, %c1_257] : memref<8x2xi32, #tpu.memory_space<smem>>
    %749 = vector.broadcast %748 : i32 to vector<1x1xi32>
    %750 = tpu.concatenate %747, %749 in 0 : vector<1x1xi32>, vector<1x1xi32> -> vector<2x1xi32>
    %751 = vector.broadcast %750 : vector<2x1xi32> to vector<2x384xi32>
    %752 = arith.cmpi eq, %483, %751 : vector<2x384xi32>
    %753 = arith.extui %752 : vector<2x384xi1> to vector<2x384xi32>
    %754 = arith.sitofp %753 : vector<2x384xi32> to vector<2x384xf32>
    %755 = arith.mulf %736, %754 : vector<2x384xf32>
    %cst_258 = arith.constant dense<0.000000e+00> : vector<2xf32>
    %756 = vector.multi_reduction <add>, %755, %cst_258 [1] : vector<2x384xf32> to vector<2xf32>
    %757 = vector.shape_cast %756 : vector<2xf32> to vector<2x1xf32>
    %c258_i32_259 = arith.constant 258 : i32
    %758 = vector.broadcast %c258_i32_259 : i32 to vector<2x1xi32>
    %759 = arith.cmpi ne, %750, %758 : vector<2x1xi32>
    %760 = arith.extui %759 : vector<2x1xi1> to vector<2x1xi32>
    %761 = arith.sitofp %760 : vector<2x1xi32> to vector<2x1xf32>
    %762 = arith.subf %757, %745 : vector<2x1xf32>
    %763 = arith.mulf %762, %761 : vector<2x1xf32>
    %764 = arith.addf %693, %763 : vector<2x1xf32>
    %765 = arith.addf %694, %761 : vector<2x1xf32>
    %c3_260 = arith.constant 3 : index
    %c0_261 = arith.constant 0 : index
    %766 = memref.load %arg2[%c3_260, %c0_261] : memref<8x2xi32, #tpu.memory_space<smem>>
    %c3_262 = arith.constant 3 : index
    %c1_263 = arith.constant 1 : index
    %767 = memref.load %arg2[%c3_262, %c1_263] : memref<8x2xi32, #tpu.memory_space<smem>>
    %768 = arith.index_cast %766 : i32 to index
    %c0_264 = arith.constant 0 : index
    %c0_265 = arith.constant 0 : index
    %769 = vector.load %arg6[%768, %c0_264, %c0_265] : memref<260x1x32xf32, #tpu.memory_space<vmem>>, vector<1x1x32xf32>
    %770 = vector.shape_cast %769 : vector<1x1x32xf32> to vector<1x32xf32>
    %771 = arith.index_cast %767 : i32 to index
    %c0_266 = arith.constant 0 : index
    %c0_267 = arith.constant 0 : index
    %772 = vector.load %arg6[%771, %c0_266, %c0_267] : memref<260x1x32xf32, #tpu.memory_space<vmem>>, vector<1x1x32xf32>
    %773 = vector.shape_cast %772 : vector<1x1x32xf32> to vector<1x32xf32>
    %774 = tpu.concatenate %770, %773 in 0 : vector<1x32xf32>, vector<1x32xf32> -> vector<2x32xf32>
    %775 = tpu.concatenate %774, %731 in 1 : vector<2x32xf32>, vector<2x32xf32> -> vector<2x64xf32>
    %c0_268 = arith.constant 0 : index
    %c0_269 = arith.constant 0 : index
    %776 = vector.load %arg7[%c0_268, %c0_269] : memref<64x128xf32, #tpu.memory_space<vmem>>, vector<64x128xf32>
    %cst_270 = arith.constant dense<0.000000e+00> : vector<2x128xf32>
    %777 = tpu.matmul %775, %776, %cst_270 {dimension_numbers = #tpu.dot_dimension_numbers<[1], [0], [0], [1], [0, 0, 1, 1], [], []>} : vector<2x64xf32>, vector<64x128xf32>, vector<2x128xf32> -> vector<2x128xf32>
    %c0_271 = arith.constant 0 : index
    %c0_272 = arith.constant 0 : index
    %778 = vector.load %arg8[%c0_271, %c0_272] : memref<1x128xf32, #tpu.memory_space<vmem>>, vector<1x128xf32>
    %779 = vector.broadcast %778 : vector<1x128xf32> to vector<2x128xf32>
    %780 = arith.addf %777, %779 : vector<2x128xf32>
    %781 = vector.extract_strided_slice %780 {offsets = [0, 0], sizes = [2, 32], strides = [1, 1]} : vector<2x128xf32> to vector<2x32xf32>
    %782 = arith.negf %781 : vector<2x32xf32>
    %783 = math.exp %782 : vector<2x32xf32>
    %cst_273 = arith.constant 1.000000e+00 : f32
    %784 = vector.broadcast %cst_273 : f32 to vector<2x32xf32>
    %785 = arith.addf %784, %783 : vector<2x32xf32>
    %786 = arith.divf %784, %785 : vector<2x32xf32>
    %787 = vector.extract_strided_slice %780 {offsets = [0, 32], sizes = [2, 32], strides = [1, 1]} : vector<2x128xf32> to vector<2x32xf32>
    %788 = arith.negf %787 : vector<2x32xf32>
    %789 = math.exp %788 : vector<2x32xf32>
    %cst_274 = arith.constant 1.000000e+00 : f32
    %790 = vector.broadcast %cst_274 : f32 to vector<2x32xf32>
    %791 = arith.addf %790, %789 : vector<2x32xf32>
    %792 = arith.divf %790, %791 : vector<2x32xf32>
    %793 = vector.extract_strided_slice %780 {offsets = [0, 64], sizes = [2, 32], strides = [1, 1]} : vector<2x128xf32> to vector<2x32xf32>
    %794 = vector.extract_strided_slice %780 {offsets = [0, 96], sizes = [2, 32], strides = [1, 1]} : vector<2x128xf32> to vector<2x32xf32>
    %795 = arith.mulf %786, %794 : vector<2x32xf32>
    %796 = arith.addf %793, %795 : vector<2x32xf32>
    %797 = math.tanh %796 : vector<2x32xf32>
    %cst_275 = arith.constant 1.000000e+00 : f32
    %798 = vector.broadcast %cst_275 : f32 to vector<2x32xf32>
    %799 = arith.subf %798, %792 : vector<2x32xf32>
    %800 = arith.mulf %799, %797 : vector<2x32xf32>
    %801 = arith.mulf %792, %731 : vector<2x32xf32>
    %802 = arith.addf %800, %801 : vector<2x32xf32>
    %c0_276 = arith.constant 0 : index
    %c0_277 = arith.constant 0 : index
    %803 = vector.load %arg9[%c0_276, %c0_277] : memref<32x384xf32, #tpu.memory_space<vmem>>, vector<32x384xf32>
    %cst_278 = arith.constant dense<0.000000e+00> : vector<2x384xf32>
    %804 = tpu.matmul %802, %803, %cst_278 {dimension_numbers = #tpu.dot_dimension_numbers<[1], [0], [0], [1], [0, 0, 1, 1], [], []>} : vector<2x32xf32>, vector<32x384xf32>, vector<2x384xf32> -> vector<2x384xf32>
    %c0_279 = arith.constant 0 : index
    %c0_280 = arith.constant 0 : index
    %805 = vector.load %arg10[%c0_279, %c0_280] : memref<1x384xf32, #tpu.memory_space<vmem>>, vector<1x384xf32>
    %806 = vector.broadcast %805 : vector<1x384xf32> to vector<2x384xf32>
    %807 = arith.addf %804, %806 : vector<2x384xf32>
    %cst_281 = arith.constant dense<0xFF800000> : vector<2xf32>
    %808 = vector.multi_reduction <maximumf>, %807, %cst_281 [1] : vector<2x384xf32> to vector<2xf32>
    %809 = vector.shape_cast %808 : vector<2xf32> to vector<2x1xf32>
    %810 = vector.broadcast %809 : vector<2x1xf32> to vector<2x384xf32>
    %811 = arith.subf %807, %810 : vector<2x384xf32>
    %812 = math.exp %811 : vector<2x384xf32>
    %cst_282 = arith.constant dense<0.000000e+00> : vector<2xf32>
    %813 = vector.multi_reduction <add>, %812, %cst_282 [1] : vector<2x384xf32> to vector<2xf32>
    %814 = vector.shape_cast %813 : vector<2xf32> to vector<2x1xf32>
    %815 = math.log %814 : vector<2x1xf32>
    %816 = arith.addf %815, %809 : vector<2x1xf32>
    %c4_283 = arith.constant 4 : index
    %c0_284 = arith.constant 0 : index
    %817 = memref.load %arg2[%c4_283, %c0_284] : memref<8x2xi32, #tpu.memory_space<smem>>
    %818 = vector.broadcast %817 : i32 to vector<1x1xi32>
    %c4_285 = arith.constant 4 : index
    %c1_286 = arith.constant 1 : index
    %819 = memref.load %arg2[%c4_285, %c1_286] : memref<8x2xi32, #tpu.memory_space<smem>>
    %820 = vector.broadcast %819 : i32 to vector<1x1xi32>
    %821 = tpu.concatenate %818, %820 in 0 : vector<1x1xi32>, vector<1x1xi32> -> vector<2x1xi32>
    %822 = vector.broadcast %821 : vector<2x1xi32> to vector<2x384xi32>
    %823 = arith.cmpi eq, %483, %822 : vector<2x384xi32>
    %824 = arith.extui %823 : vector<2x384xi1> to vector<2x384xi32>
    %825 = arith.sitofp %824 : vector<2x384xi32> to vector<2x384xf32>
    %826 = arith.mulf %807, %825 : vector<2x384xf32>
    %cst_287 = arith.constant dense<0.000000e+00> : vector<2xf32>
    %827 = vector.multi_reduction <add>, %826, %cst_287 [1] : vector<2x384xf32> to vector<2xf32>
    %828 = vector.shape_cast %827 : vector<2xf32> to vector<2x1xf32>
    %c258_i32_288 = arith.constant 258 : i32
    %829 = vector.broadcast %c258_i32_288 : i32 to vector<2x1xi32>
    %830 = arith.cmpi ne, %821, %829 : vector<2x1xi32>
    %831 = arith.extui %830 : vector<2x1xi1> to vector<2x1xi32>
    %832 = arith.sitofp %831 : vector<2x1xi32> to vector<2x1xf32>
    %833 = arith.subf %828, %816 : vector<2x1xf32>
    %834 = arith.mulf %833, %832 : vector<2x1xf32>
    %835 = arith.addf %764, %834 : vector<2x1xf32>
    %836 = arith.addf %765, %832 : vector<2x1xf32>
    %c4_289 = arith.constant 4 : index
    %c0_290 = arith.constant 0 : index
    %837 = memref.load %arg2[%c4_289, %c0_290] : memref<8x2xi32, #tpu.memory_space<smem>>
    %c4_291 = arith.constant 4 : index
    %c1_292 = arith.constant 1 : index
    %838 = memref.load %arg2[%c4_291, %c1_292] : memref<8x2xi32, #tpu.memory_space<smem>>
    %839 = arith.index_cast %837 : i32 to index
    %c0_293 = arith.constant 0 : index
    %c0_294 = arith.constant 0 : index
    %840 = vector.load %arg6[%839, %c0_293, %c0_294] : memref<260x1x32xf32, #tpu.memory_space<vmem>>, vector<1x1x32xf32>
    %841 = vector.shape_cast %840 : vector<1x1x32xf32> to vector<1x32xf32>
    %842 = arith.index_cast %838 : i32 to index
    %c0_295 = arith.constant 0 : index
    %c0_296 = arith.constant 0 : index
    %843 = vector.load %arg6[%842, %c0_295, %c0_296] : memref<260x1x32xf32, #tpu.memory_space<vmem>>, vector<1x1x32xf32>
    %844 = vector.shape_cast %843 : vector<1x1x32xf32> to vector<1x32xf32>
    %845 = tpu.concatenate %841, %844 in 0 : vector<1x32xf32>, vector<1x32xf32> -> vector<2x32xf32>
    %846 = tpu.concatenate %845, %802 in 1 : vector<2x32xf32>, vector<2x32xf32> -> vector<2x64xf32>
    %c0_297 = arith.constant 0 : index
    %c0_298 = arith.constant 0 : index
    %847 = vector.load %arg7[%c0_297, %c0_298] : memref<64x128xf32, #tpu.memory_space<vmem>>, vector<64x128xf32>
    %cst_299 = arith.constant dense<0.000000e+00> : vector<2x128xf32>
    %848 = tpu.matmul %846, %847, %cst_299 {dimension_numbers = #tpu.dot_dimension_numbers<[1], [0], [0], [1], [0, 0, 1, 1], [], []>} : vector<2x64xf32>, vector<64x128xf32>, vector<2x128xf32> -> vector<2x128xf32>
    %c0_300 = arith.constant 0 : index
    %c0_301 = arith.constant 0 : index
    %849 = vector.load %arg8[%c0_300, %c0_301] : memref<1x128xf32, #tpu.memory_space<vmem>>, vector<1x128xf32>
    %850 = vector.broadcast %849 : vector<1x128xf32> to vector<2x128xf32>
    %851 = arith.addf %848, %850 : vector<2x128xf32>
    %852 = vector.extract_strided_slice %851 {offsets = [0, 0], sizes = [2, 32], strides = [1, 1]} : vector<2x128xf32> to vector<2x32xf32>
    %853 = arith.negf %852 : vector<2x32xf32>
    %854 = math.exp %853 : vector<2x32xf32>
    %cst_302 = arith.constant 1.000000e+00 : f32
    %855 = vector.broadcast %cst_302 : f32 to vector<2x32xf32>
    %856 = arith.addf %855, %854 : vector<2x32xf32>
    %857 = arith.divf %855, %856 : vector<2x32xf32>
    %858 = vector.extract_strided_slice %851 {offsets = [0, 32], sizes = [2, 32], strides = [1, 1]} : vector<2x128xf32> to vector<2x32xf32>
    %859 = arith.negf %858 : vector<2x32xf32>
    %860 = math.exp %859 : vector<2x32xf32>
    %cst_303 = arith.constant 1.000000e+00 : f32
    %861 = vector.broadcast %cst_303 : f32 to vector<2x32xf32>
    %862 = arith.addf %861, %860 : vector<2x32xf32>
    %863 = arith.divf %861, %862 : vector<2x32xf32>
    %864 = vector.extract_strided_slice %851 {offsets = [0, 64], sizes = [2, 32], strides = [1, 1]} : vector<2x128xf32> to vector<2x32xf32>
    %865 = vector.extract_strided_slice %851 {offsets = [0, 96], sizes = [2, 32], strides = [1, 1]} : vector<2x128xf32> to vector<2x32xf32>
    %866 = arith.mulf %857, %865 : vector<2x32xf32>
    %867 = arith.addf %864, %866 : vector<2x32xf32>
    %868 = math.tanh %867 : vector<2x32xf32>
    %cst_304 = arith.constant 1.000000e+00 : f32
    %869 = vector.broadcast %cst_304 : f32 to vector<2x32xf32>
    %870 = arith.subf %869, %863 : vector<2x32xf32>
    %871 = arith.mulf %870, %868 : vector<2x32xf32>
    %872 = arith.mulf %863, %802 : vector<2x32xf32>
    %873 = arith.addf %871, %872 : vector<2x32xf32>
    %c0_305 = arith.constant 0 : index
    %c0_306 = arith.constant 0 : index
    %874 = vector.load %arg9[%c0_305, %c0_306] : memref<32x384xf32, #tpu.memory_space<vmem>>, vector<32x384xf32>
    %cst_307 = arith.constant dense<0.000000e+00> : vector<2x384xf32>
    %875 = tpu.matmul %873, %874, %cst_307 {dimension_numbers = #tpu.dot_dimension_numbers<[1], [0], [0], [1], [0, 0, 1, 1], [], []>} : vector<2x32xf32>, vector<32x384xf32>, vector<2x384xf32> -> vector<2x384xf32>
    %c0_308 = arith.constant 0 : index
    %c0_309 = arith.constant 0 : index
    %876 = vector.load %arg10[%c0_308, %c0_309] : memref<1x384xf32, #tpu.memory_space<vmem>>, vector<1x384xf32>
    %877 = vector.broadcast %876 : vector<1x384xf32> to vector<2x384xf32>
    %878 = arith.addf %875, %877 : vector<2x384xf32>
    %cst_310 = arith.constant dense<0xFF800000> : vector<2xf32>
    %879 = vector.multi_reduction <maximumf>, %878, %cst_310 [1] : vector<2x384xf32> to vector<2xf32>
    %880 = vector.shape_cast %879 : vector<2xf32> to vector<2x1xf32>
    %881 = vector.broadcast %880 : vector<2x1xf32> to vector<2x384xf32>
    %882 = arith.subf %878, %881 : vector<2x384xf32>
    %883 = math.exp %882 : vector<2x384xf32>
    %cst_311 = arith.constant dense<0.000000e+00> : vector<2xf32>
    %884 = vector.multi_reduction <add>, %883, %cst_311 [1] : vector<2x384xf32> to vector<2xf32>
    %885 = vector.shape_cast %884 : vector<2xf32> to vector<2x1xf32>
    %886 = math.log %885 : vector<2x1xf32>
    %887 = arith.addf %886, %880 : vector<2x1xf32>
    %c5_312 = arith.constant 5 : index
    %c0_313 = arith.constant 0 : index
    %888 = memref.load %arg2[%c5_312, %c0_313] : memref<8x2xi32, #tpu.memory_space<smem>>
    %889 = vector.broadcast %888 : i32 to vector<1x1xi32>
    %c5_314 = arith.constant 5 : index
    %c1_315 = arith.constant 1 : index
    %890 = memref.load %arg2[%c5_314, %c1_315] : memref<8x2xi32, #tpu.memory_space<smem>>
    %891 = vector.broadcast %890 : i32 to vector<1x1xi32>
    %892 = tpu.concatenate %889, %891 in 0 : vector<1x1xi32>, vector<1x1xi32> -> vector<2x1xi32>
    %893 = vector.broadcast %892 : vector<2x1xi32> to vector<2x384xi32>
    %894 = arith.cmpi eq, %483, %893 : vector<2x384xi32>
    %895 = arith.extui %894 : vector<2x384xi1> to vector<2x384xi32>
    %896 = arith.sitofp %895 : vector<2x384xi32> to vector<2x384xf32>
    %897 = arith.mulf %878, %896 : vector<2x384xf32>
    %cst_316 = arith.constant dense<0.000000e+00> : vector<2xf32>
    %898 = vector.multi_reduction <add>, %897, %cst_316 [1] : vector<2x384xf32> to vector<2xf32>
    %899 = vector.shape_cast %898 : vector<2xf32> to vector<2x1xf32>
    %c258_i32_317 = arith.constant 258 : i32
    %900 = vector.broadcast %c258_i32_317 : i32 to vector<2x1xi32>
    %901 = arith.cmpi ne, %892, %900 : vector<2x1xi32>
    %902 = arith.extui %901 : vector<2x1xi1> to vector<2x1xi32>
    %903 = arith.sitofp %902 : vector<2x1xi32> to vector<2x1xf32>
    %904 = arith.subf %899, %887 : vector<2x1xf32>
    %905 = arith.mulf %904, %903 : vector<2x1xf32>
    %906 = arith.addf %835, %905 : vector<2x1xf32>
    %907 = arith.addf %836, %903 : vector<2x1xf32>
    %c5_318 = arith.constant 5 : index
    %c0_319 = arith.constant 0 : index
    %908 = memref.load %arg2[%c5_318, %c0_319] : memref<8x2xi32, #tpu.memory_space<smem>>
    %c5_320 = arith.constant 5 : index
    %c1_321 = arith.constant 1 : index
    %909 = memref.load %arg2[%c5_320, %c1_321] : memref<8x2xi32, #tpu.memory_space<smem>>
    %910 = arith.index_cast %908 : i32 to index
    %c0_322 = arith.constant 0 : index
    %c0_323 = arith.constant 0 : index
    %911 = vector.load %arg6[%910, %c0_322, %c0_323] : memref<260x1x32xf32, #tpu.memory_space<vmem>>, vector<1x1x32xf32>
    %912 = vector.shape_cast %911 : vector<1x1x32xf32> to vector<1x32xf32>
    %913 = arith.index_cast %909 : i32 to index
    %c0_324 = arith.constant 0 : index
    %c0_325 = arith.constant 0 : index
    %914 = vector.load %arg6[%913, %c0_324, %c0_325] : memref<260x1x32xf32, #tpu.memory_space<vmem>>, vector<1x1x32xf32>
    %915 = vector.shape_cast %914 : vector<1x1x32xf32> to vector<1x32xf32>
    %916 = tpu.concatenate %912, %915 in 0 : vector<1x32xf32>, vector<1x32xf32> -> vector<2x32xf32>
    %917 = tpu.concatenate %916, %873 in 1 : vector<2x32xf32>, vector<2x32xf32> -> vector<2x64xf32>
    %c0_326 = arith.constant 0 : index
    %c0_327 = arith.constant 0 : index
    %918 = vector.load %arg7[%c0_326, %c0_327] : memref<64x128xf32, #tpu.memory_space<vmem>>, vector<64x128xf32>
    %cst_328 = arith.constant dense<0.000000e+00> : vector<2x128xf32>
    %919 = tpu.matmul %917, %918, %cst_328 {dimension_numbers = #tpu.dot_dimension_numbers<[1], [0], [0], [1], [0, 0, 1, 1], [], []>} : vector<2x64xf32>, vector<64x128xf32>, vector<2x128xf32> -> vector<2x128xf32>
    %c0_329 = arith.constant 0 : index
    %c0_330 = arith.constant 0 : index
    %920 = vector.load %arg8[%c0_329, %c0_330] : memref<1x128xf32, #tpu.memory_space<vmem>>, vector<1x128xf32>
    %921 = vector.broadcast %920 : vector<1x128xf32> to vector<2x128xf32>
    %922 = arith.addf %919, %921 : vector<2x128xf32>
    %923 = vector.extract_strided_slice %922 {offsets = [0, 0], sizes = [2, 32], strides = [1, 1]} : vector<2x128xf32> to vector<2x32xf32>
    %924 = arith.negf %923 : vector<2x32xf32>
    %925 = math.exp %924 : vector<2x32xf32>
    %cst_331 = arith.constant 1.000000e+00 : f32
    %926 = vector.broadcast %cst_331 : f32 to vector<2x32xf32>
    %927 = arith.addf %926, %925 : vector<2x32xf32>
    %928 = arith.divf %926, %927 : vector<2x32xf32>
    %929 = vector.extract_strided_slice %922 {offsets = [0, 32], sizes = [2, 32], strides = [1, 1]} : vector<2x128xf32> to vector<2x32xf32>
    %930 = arith.negf %929 : vector<2x32xf32>
    %931 = math.exp %930 : vector<2x32xf32>
    %cst_332 = arith.constant 1.000000e+00 : f32
    %932 = vector.broadcast %cst_332 : f32 to vector<2x32xf32>
    %933 = arith.addf %932, %931 : vector<2x32xf32>
    %934 = arith.divf %932, %933 : vector<2x32xf32>
    %935 = vector.extract_strided_slice %922 {offsets = [0, 64], sizes = [2, 32], strides = [1, 1]} : vector<2x128xf32> to vector<2x32xf32>
    %936 = vector.extract_strided_slice %922 {offsets = [0, 96], sizes = [2, 32], strides = [1, 1]} : vector<2x128xf32> to vector<2x32xf32>
    %937 = arith.mulf %928, %936 : vector<2x32xf32>
    %938 = arith.addf %935, %937 : vector<2x32xf32>
    %939 = math.tanh %938 : vector<2x32xf32>
    %cst_333 = arith.constant 1.000000e+00 : f32
    %940 = vector.broadcast %cst_333 : f32 to vector<2x32xf32>
    %941 = arith.subf %940, %934 : vector<2x32xf32>
    %942 = arith.mulf %941, %939 : vector<2x32xf32>
    %943 = arith.mulf %934, %873 : vector<2x32xf32>
    %944 = arith.addf %942, %943 : vector<2x32xf32>
    %c0_334 = arith.constant 0 : index
    %c0_335 = arith.constant 0 : index
    %945 = vector.load %arg9[%c0_334, %c0_335] : memref<32x384xf32, #tpu.memory_space<vmem>>, vector<32x384xf32>
    %cst_336 = arith.constant dense<0.000000e+00> : vector<2x384xf32>
    %946 = tpu.matmul %944, %945, %cst_336 {dimension_numbers = #tpu.dot_dimension_numbers<[1], [0], [0], [1], [0, 0, 1, 1], [], []>} : vector<2x32xf32>, vector<32x384xf32>, vector<2x384xf32> -> vector<2x384xf32>
    %c0_337 = arith.constant 0 : index
    %c0_338 = arith.constant 0 : index
    %947 = vector.load %arg10[%c0_337, %c0_338] : memref<1x384xf32, #tpu.memory_space<vmem>>, vector<1x384xf32>
    %948 = vector.broadcast %947 : vector<1x384xf32> to vector<2x384xf32>
    %949 = arith.addf %946, %948 : vector<2x384xf32>
    %cst_339 = arith.constant dense<0xFF800000> : vector<2xf32>
    %950 = vector.multi_reduction <maximumf>, %949, %cst_339 [1] : vector<2x384xf32> to vector<2xf32>
    %951 = vector.shape_cast %950 : vector<2xf32> to vector<2x1xf32>
    %952 = vector.broadcast %951 : vector<2x1xf32> to vector<2x384xf32>
    %953 = arith.subf %949, %952 : vector<2x384xf32>
    %954 = math.exp %953 : vector<2x384xf32>
    %cst_340 = arith.constant dense<0.000000e+00> : vector<2xf32>
    %955 = vector.multi_reduction <add>, %954, %cst_340 [1] : vector<2x384xf32> to vector<2xf32>
    %956 = vector.shape_cast %955 : vector<2xf32> to vector<2x1xf32>
    %957 = math.log %956 : vector<2x1xf32>
    %958 = arith.addf %957, %951 : vector<2x1xf32>
    %c6_341 = arith.constant 6 : index
    %c0_342 = arith.constant 0 : index
    %959 = memref.load %arg2[%c6_341, %c0_342] : memref<8x2xi32, #tpu.memory_space<smem>>
    %960 = vector.broadcast %959 : i32 to vector<1x1xi32>
    %c6_343 = arith.constant 6 : index
    %c1_344 = arith.constant 1 : index
    %961 = memref.load %arg2[%c6_343, %c1_344] : memref<8x2xi32, #tpu.memory_space<smem>>
    %962 = vector.broadcast %961 : i32 to vector<1x1xi32>
    %963 = tpu.concatenate %960, %962 in 0 : vector<1x1xi32>, vector<1x1xi32> -> vector<2x1xi32>
    %964 = vector.broadcast %963 : vector<2x1xi32> to vector<2x384xi32>
    %965 = arith.cmpi eq, %483, %964 : vector<2x384xi32>
    %966 = arith.extui %965 : vector<2x384xi1> to vector<2x384xi32>
    %967 = arith.sitofp %966 : vector<2x384xi32> to vector<2x384xf32>
    %968 = arith.mulf %949, %967 : vector<2x384xf32>
    %cst_345 = arith.constant dense<0.000000e+00> : vector<2xf32>
    %969 = vector.multi_reduction <add>, %968, %cst_345 [1] : vector<2x384xf32> to vector<2xf32>
    %970 = vector.shape_cast %969 : vector<2xf32> to vector<2x1xf32>
    %c258_i32_346 = arith.constant 258 : i32
    %971 = vector.broadcast %c258_i32_346 : i32 to vector<2x1xi32>
    %972 = arith.cmpi ne, %963, %971 : vector<2x1xi32>
    %973 = arith.extui %972 : vector<2x1xi1> to vector<2x1xi32>
    %974 = arith.sitofp %973 : vector<2x1xi32> to vector<2x1xf32>
    %975 = arith.subf %970, %958 : vector<2x1xf32>
    %976 = arith.mulf %975, %974 : vector<2x1xf32>
    %977 = arith.addf %906, %976 : vector<2x1xf32>
    %978 = arith.addf %907, %974 : vector<2x1xf32>
    %c6_347 = arith.constant 6 : index
    %c0_348 = arith.constant 0 : index
    %979 = memref.load %arg2[%c6_347, %c0_348] : memref<8x2xi32, #tpu.memory_space<smem>>
    %c6_349 = arith.constant 6 : index
    %c1_350 = arith.constant 1 : index
    %980 = memref.load %arg2[%c6_349, %c1_350] : memref<8x2xi32, #tpu.memory_space<smem>>
    %981 = arith.index_cast %979 : i32 to index
    %c0_351 = arith.constant 0 : index
    %c0_352 = arith.constant 0 : index
    %982 = vector.load %arg6[%981, %c0_351, %c0_352] : memref<260x1x32xf32, #tpu.memory_space<vmem>>, vector<1x1x32xf32>
    %983 = vector.shape_cast %982 : vector<1x1x32xf32> to vector<1x32xf32>
    %984 = arith.index_cast %980 : i32 to index
    %c0_353 = arith.constant 0 : index
    %c0_354 = arith.constant 0 : index
    %985 = vector.load %arg6[%984, %c0_353, %c0_354] : memref<260x1x32xf32, #tpu.memory_space<vmem>>, vector<1x1x32xf32>
    %986 = vector.shape_cast %985 : vector<1x1x32xf32> to vector<1x32xf32>
    %987 = tpu.concatenate %983, %986 in 0 : vector<1x32xf32>, vector<1x32xf32> -> vector<2x32xf32>
    %988 = tpu.concatenate %987, %944 in 1 : vector<2x32xf32>, vector<2x32xf32> -> vector<2x64xf32>
    %c0_355 = arith.constant 0 : index
    %c0_356 = arith.constant 0 : index
    %989 = vector.load %arg7[%c0_355, %c0_356] : memref<64x128xf32, #tpu.memory_space<vmem>>, vector<64x128xf32>
    %cst_357 = arith.constant dense<0.000000e+00> : vector<2x128xf32>
    %990 = tpu.matmul %988, %989, %cst_357 {dimension_numbers = #tpu.dot_dimension_numbers<[1], [0], [0], [1], [0, 0, 1, 1], [], []>} : vector<2x64xf32>, vector<64x128xf32>, vector<2x128xf32> -> vector<2x128xf32>
    %c0_358 = arith.constant 0 : index
    %c0_359 = arith.constant 0 : index
    %991 = vector.load %arg8[%c0_358, %c0_359] : memref<1x128xf32, #tpu.memory_space<vmem>>, vector<1x128xf32>
    %992 = vector.broadcast %991 : vector<1x128xf32> to vector<2x128xf32>
    %993 = arith.addf %990, %992 : vector<2x128xf32>
    %994 = vector.extract_strided_slice %993 {offsets = [0, 0], sizes = [2, 32], strides = [1, 1]} : vector<2x128xf32> to vector<2x32xf32>
    %995 = arith.negf %994 : vector<2x32xf32>
    %996 = math.exp %995 : vector<2x32xf32>
    %cst_360 = arith.constant 1.000000e+00 : f32
    %997 = vector.broadcast %cst_360 : f32 to vector<2x32xf32>
    %998 = arith.addf %997, %996 : vector<2x32xf32>
    %999 = arith.divf %997, %998 : vector<2x32xf32>
    %1000 = vector.extract_strided_slice %993 {offsets = [0, 32], sizes = [2, 32], strides = [1, 1]} : vector<2x128xf32> to vector<2x32xf32>
    %1001 = arith.negf %1000 : vector<2x32xf32>
    %1002 = math.exp %1001 : vector<2x32xf32>
    %cst_361 = arith.constant 1.000000e+00 : f32
    %1003 = vector.broadcast %cst_361 : f32 to vector<2x32xf32>
    %1004 = arith.addf %1003, %1002 : vector<2x32xf32>
    %1005 = arith.divf %1003, %1004 : vector<2x32xf32>
    %1006 = vector.extract_strided_slice %993 {offsets = [0, 64], sizes = [2, 32], strides = [1, 1]} : vector<2x128xf32> to vector<2x32xf32>
    %1007 = vector.extract_strided_slice %993 {offsets = [0, 96], sizes = [2, 32], strides = [1, 1]} : vector<2x128xf32> to vector<2x32xf32>
    %1008 = arith.mulf %999, %1007 : vector<2x32xf32>
    %1009 = arith.addf %1006, %1008 : vector<2x32xf32>
    %1010 = math.tanh %1009 : vector<2x32xf32>
    %cst_362 = arith.constant 1.000000e+00 : f32
    %1011 = vector.broadcast %cst_362 : f32 to vector<2x32xf32>
    %1012 = arith.subf %1011, %1005 : vector<2x32xf32>
    %1013 = arith.mulf %1012, %1010 : vector<2x32xf32>
    %1014 = arith.mulf %1005, %944 : vector<2x32xf32>
    %1015 = arith.addf %1013, %1014 : vector<2x32xf32>
    %c0_363 = arith.constant 0 : index
    %c0_364 = arith.constant 0 : index
    %1016 = vector.load %arg9[%c0_363, %c0_364] : memref<32x384xf32, #tpu.memory_space<vmem>>, vector<32x384xf32>
    %cst_365 = arith.constant dense<0.000000e+00> : vector<2x384xf32>
    %1017 = tpu.matmul %1015, %1016, %cst_365 {dimension_numbers = #tpu.dot_dimension_numbers<[1], [0], [0], [1], [0, 0, 1, 1], [], []>} : vector<2x32xf32>, vector<32x384xf32>, vector<2x384xf32> -> vector<2x384xf32>
    %c0_366 = arith.constant 0 : index
    %c0_367 = arith.constant 0 : index
    %1018 = vector.load %arg10[%c0_366, %c0_367] : memref<1x384xf32, #tpu.memory_space<vmem>>, vector<1x384xf32>
    %1019 = vector.broadcast %1018 : vector<1x384xf32> to vector<2x384xf32>
    %1020 = arith.addf %1017, %1019 : vector<2x384xf32>
    %cst_368 = arith.constant dense<0xFF800000> : vector<2xf32>
    %1021 = vector.multi_reduction <maximumf>, %1020, %cst_368 [1] : vector<2x384xf32> to vector<2xf32>
    %1022 = vector.shape_cast %1021 : vector<2xf32> to vector<2x1xf32>
    %1023 = vector.broadcast %1022 : vector<2x1xf32> to vector<2x384xf32>
    %1024 = arith.subf %1020, %1023 : vector<2x384xf32>
    %1025 = math.exp %1024 : vector<2x384xf32>
    %cst_369 = arith.constant dense<0.000000e+00> : vector<2xf32>
    %1026 = vector.multi_reduction <add>, %1025, %cst_369 [1] : vector<2x384xf32> to vector<2xf32>
    %1027 = vector.shape_cast %1026 : vector<2xf32> to vector<2x1xf32>
    %1028 = math.log %1027 : vector<2x1xf32>
    %1029 = arith.addf %1028, %1022 : vector<2x1xf32>
    %c7_370 = arith.constant 7 : index
    %c0_371 = arith.constant 0 : index
    %1030 = memref.load %arg2[%c7_370, %c0_371] : memref<8x2xi32, #tpu.memory_space<smem>>
    %1031 = vector.broadcast %1030 : i32 to vector<1x1xi32>
    %c7_372 = arith.constant 7 : index
    %c1_373 = arith.constant 1 : index
    %1032 = memref.load %arg2[%c7_372, %c1_373] : memref<8x2xi32, #tpu.memory_space<smem>>
    %1033 = vector.broadcast %1032 : i32 to vector<1x1xi32>
    %1034 = tpu.concatenate %1031, %1033 in 0 : vector<1x1xi32>, vector<1x1xi32> -> vector<2x1xi32>
    %1035 = vector.broadcast %1034 : vector<2x1xi32> to vector<2x384xi32>
    %1036 = arith.cmpi eq, %483, %1035 : vector<2x384xi32>
    %1037 = arith.extui %1036 : vector<2x384xi1> to vector<2x384xi32>
    %1038 = arith.sitofp %1037 : vector<2x384xi32> to vector<2x384xf32>
    %1039 = arith.mulf %1020, %1038 : vector<2x384xf32>
    %cst_374 = arith.constant dense<0.000000e+00> : vector<2xf32>
    %1040 = vector.multi_reduction <add>, %1039, %cst_374 [1] : vector<2x384xf32> to vector<2xf32>
    %1041 = vector.shape_cast %1040 : vector<2xf32> to vector<2x1xf32>
    %c258_i32_375 = arith.constant 258 : i32
    %1042 = vector.broadcast %c258_i32_375 : i32 to vector<2x1xi32>
    %1043 = arith.cmpi ne, %1034, %1042 : vector<2x1xi32>
    %1044 = arith.extui %1043 : vector<2x1xi1> to vector<2x1xi32>
    %1045 = arith.sitofp %1044 : vector<2x1xi32> to vector<2x1xf32>
    %1046 = arith.subf %1041, %1029 : vector<2x1xf32>
    %1047 = arith.mulf %1046, %1045 : vector<2x1xf32>
    %1048 = arith.addf %977, %1047 : vector<2x1xf32>
    %1049 = arith.addf %978, %1045 : vector<2x1xf32>
    %1050 = vector.shape_cast %1048 : vector<2x1xf32> to vector<1x2x1xf32>
    %cst_376 = arith.constant dense<0.000000e+00> : vector<1xf32>
    %1051 = vector.multi_reduction <add>, %1050, %cst_376 [1, 2] : vector<1x2x1xf32> to vector<1xf32>
    %1052 = vector.shape_cast %1051 : vector<1xf32> to vector<1x1x1xf32>
    %1053 = vector.extract %1052[0, 0, 0] : f32 from vector<1x1x1xf32>
    %1054 = vector.broadcast %1053 : f32 to vector<1x1xf32>
    %1055 = vector.shape_cast %1049 : vector<2x1xf32> to vector<1x2x1xf32>
    %cst_377 = arith.constant dense<0.000000e+00> : vector<1xf32>
    %1056 = vector.multi_reduction <add>, %1055, %cst_377 [1, 2] : vector<1x2x1xf32> to vector<1xf32>
    %1057 = vector.shape_cast %1056 : vector<1xf32> to vector<1x1x1xf32>
    %1058 = vector.extract %1057[0, 0, 0] : f32 from vector<1x1x1xf32>
    %1059 = vector.broadcast %1058 : f32 to vector<1x1xf32>
    %cst_378 = arith.constant 0.000000e+00 : f32
    %1060 = vector.broadcast %cst_378 : f32 to vector<1x1xf32>
    %1061 = arith.subf %1060, %1054 : vector<1x1xf32>
    %cst_379 = arith.constant 1.000000e+00 : f32
    %1062 = vector.broadcast %cst_379 : f32 to vector<1x1xf32>
    %1063 = arith.maximumf %1059, %1062 : vector<1x1xf32>
    %1064 = arith.divf %1061, %1063 : vector<1x1xf32>
    %c0_380 = arith.constant 0 : index
    %c0_381 = arith.constant 0 : index
    %1065 = vector.load %arg11[%c0_380, %c0_381] : memref<1x1xf32, #tpu.memory_space<vmem>>, vector<1x1xf32>
    tpu.vector_store %arg11[%c0_380, %c0_381], %1064 {strides = array<i32>} : memref<1x1xf32, #tpu.memory_space<vmem>>, vector<1x1xf32>,
    return
  }
}

</mosaic_0001>

<bundles_post_ra>
// kernel: tpu_custom_call.1
= control target key start
LH: loop header
LB: loop body
LE: loop exit
PB: predicated region body
PF: predicated region fallthrough
CT: control target
= control target key end

     0   :  { %16 = vsyncpa [#allocation4], 0  ;;  %s6329_s0 = inlined_call_operand.vmem [shape: s32[8,2], index: 0, kind: input, shape index: {}]   ;;  %s6330_s1 = inlined_call_operand.vmem [shape: s32[2], index: 1, kind: input, shape index: {}]   ;;  %s6331_s2 = inlined_call_operand.vmem [shape: s32[8,2], index: 2, kind: input, shape index: {}]   ;;  %s6332_s3 = inlined_call_operand.vmem [shape: f32[260,1,32], index: 3, kind: input, shape index: {}]   ;;  %s6333_s4 = inlined_call_operand.vmem [shape: f32[64,128], index: 4, kind: input, shape index: {}]   ;;  %s6334_s5 = inlined_call_operand.vmem [shape: f32[1,128], index: 5, kind: input, shape index: {}]   ;;  %s6335_s6 = inlined_call_operand.vmem [shape: f32[260,1,32], index: 6, kind: input, shape index: {}]   ;;  %s6336_s7 = inlined_call_operand.vmem [shape: f32[64,128], index: 7, kind: input, shape index: {}]   ;;  %s6337_s8 = inlined_call_operand.vmem [shape: f32[1,128], index: 8, kind: input, shape index: {}]   ;;  %s6338_s9 = inlined_call_operand.vmem [shape: f32[32,384], index: 9, kind: input, shape index: {}]   ;;  %s6339_s10 = inlined_call_operand.vmem [shape: f32[1,384], index: 10, kind: input, shape index: {}]   ;;  %s6340_s11 = inlined_call_operand.hbm [shape: f32[1,1], index: 11, kind: output, shape index: {}]  }
   0x1   :  { %17 = vsyncpa [#allocation6], 0  ;;  %s35_s19 = sshll.u32 %s6330_s1, 4  ;;  %s36_s19 = int_to_ptr.vmem [resolvable:$true] %s35_s19 }
   0x2   :  { %18 = vsyncpa [#allocation3], 0  ;;  %s25_s22 = sshll.u32 %s6329_s0, 4  ;;  %s4981_s23 = scalar_lea.vmem %s36_s19, 16  ;;  %s26_s22 = int_to_ptr.vmem [resolvable:$true] %s25_s22 }
   0x3   :  { %p4982_p0 = scmp.ne.s32.totalorder %s36_s19, %s4981_s23  ;;  %p4986_p1 = scmp.lt.s32.totalorder %s36_s19, %s36_s19 }
   0x4   :  { %p4987_p2 = scmp.lt.s32.totalorder %s4981_s23, %s4981_s23 }
   0x6   :  { %p4988_p3 = por %p4987_p2, %p4986_p1 }
   0x8   :  { %p4989_p4 = pnand %p4988_p3, %p4982_p0 }
   0xa   :  { %4992 = shalt.err (!%p4989_p4)
}
   0xb   :  { %s5045_s24 = smov [#allocation5]   ;;  %s4993_s25 = scalar_lea.vmem %s26_s22, 128 }
   0xc   :  { %38 = dma.vmem_to_smem %s36_s19, 16, %s5045_s24, [#allocation6]  }
   0xd   :  { %p4994_p5 = scmp.ne.s32.totalorder %s26_s22, %s4993_s25  ;;  %p4998_p6 = scmp.lt.s32.totalorder %s26_s22, %s26_s22 }
   0xe   :  { %p4999_p7 = scmp.lt.s32.totalorder %s4993_s25, %s4993_s25 }
  0x10   :  { %p5000_p8 = por %p4999_p7, %p4998_p6 }
  0x12   :  { %p5001_p9 = pnand %p5000_p8, %p4994_p5 }
  0x14   :  { %5004 = shalt.err (!%p5001_p9)
}
  0x15   :  { %s5046_s1 = smov [#allocation2]   ;;  %s45_s27 = sshll.u32 %s6331_s2, 4  ;;  %s46_s27 = int_to_ptr.vmem [resolvable:$true] %s45_s27 }
  0x16   :  { %28 = dma.vmem_to_smem %s26_s22, 128, %s5046_s1, [#allocation4]  }
  0x17   :  { %s5005_s28 = scalar_lea.vmem %s46_s27, 128  ;;  %p5010_p11 = scmp.lt.s32.totalorder %s46_s27, %s46_s27 }
  0x18   :  { %p5006_p10 = scmp.ne.s32.totalorder %s46_s27, %s5005_s28  ;;  %p5011_p12 = scmp.lt.s32.totalorder %s5005_s28, %s5005_s28 }
  0x1a   :  { %p5012_p13 = por %p5011_p12, %p5010_p11 }
  0x1c   :  { %p5013_p0 = pnand %p5012_p13, %p5006_p10 }
  0x1e   :  { %5016 = shalt.err (!%p5013_p0)
}
  0x1f   :  { %s5047_s29 = smov [#allocation7]  }
  0x20   :  { %48 = dma.vmem_to_smem %s46_s27, 128, %s5047_s29, [#allocation6]  }
  0x21   :  { %5039 = dma.done.wait [#allocation4], 128  }
  0x22   :  { %5040 = vsyncadd [#allocation4], 4294967168 }
  0x23   :  { %5041 = dma.done.wait [#allocation6], 144  }
  0x24   :  { %5042 = vsyncadd [#allocation6], 4294967152 }
  0x25   :  { %74 = sfence }
  0x26   :  { %v93_v0 = vld [vmem:[%s6333_s4] sm:$0xff]  ;;  %v94_v1 = vld [vmem:[%s6333_s4 + $0x8] sm:$0xff]  ;;  %v95_v2 = vld [vmem:[%s6333_s4 + $0x10] sm:$0xff]  ;;  %v5048_v3 = vmov 0.0|0.0   ;;  %vm5049_vm0 = vmmov 0   ;;  %v5050_v6 = vmov 0.0  }
  0x27   :  { %4498 = vmatprep.subr.bf16.mxu0 %v5048_v3  ;;  %v5135_v4 = vpack.c.bf16 %v94_v1, %v93_v0  ;;  %v96_v5 = vld [vmem:[%s6333_s4 + $0x18] sm:$0xff]  ;;  %4122 = vmatprep.mubr.msk.f32.mxu0 %vm5049_vm0, %v5050_v6  ;;  %s77_s18 = sld [smem:[#allocation2]]  ;;  %s3794_s19 = sld [smem:[#allocation2 + $0x1]]  ;;  %v97_v8 = vld [vmem:[%s6333_s4 + $0x20] sm:$0xff]  ;;  %v98_v9 = vld [vmem:[%s6333_s4 + $0x28] sm:$0xff]  ;;  %vm89_vm1 = vcmask 1040384  }
  0x28   :  { %4510 = vmatprep.subr.bf16.mxu1 %v5048_v3  ;;  %4141 = vmatprep.mubr.msk.f32.mxu1 %vm5049_vm0, %v5050_v6  ;;  %v5146_v7 = vpack.c.bf16 %v96_v5, %v95_v2  ;;  %v5158_v10 = vpack.c.bf16 %v98_v9, %v97_v8  ;;  %v99_v11 = vld [vmem:[%s6333_s4 + $0x30] sm:$0xff]  ;;  %v100_v12 = vld [vmem:[%s6333_s4 + $0x38] sm:$0xff]  ;;  %vm91_vm2 = vcmask 261120   ;;  %vm108_vm3 = vcmask 523264   ;;  %v5201_v18 = vld [vmem:[%s6334_s5] ss:$0 sm:$0xff] }
  0x29   :  { %4500 = vmatpush3.bf16.msra.mxu0 %v5135_v4  ;;  %4512 = vmatpush3.bf16.msra.mxu1 %v5135_v4  ;;  %v5176_v15 = vpack.c.bf16 %v100_v12, %v99_v11  ;;  %s5051_s13 = smov 32   ;;  %s5052_s14 = smov 64   ;;  %vm1445_vm4 = vcmask 1041408  }
  0x2a   :  { %4501 = vmatprep.subr.bf16.mxu0 %v5048_v3  ;;  %4513 = vmatprep.subr.bf16.mxu1 %v5048_v3  ;;  %s5053_s5 = smov 96   ;;  %s5207_s15 = sld [smem:[#allocation5]] }
  0x2b   :  { %s5209_s16 = sld [smem:[#allocation5 + $0x1]]  ;;  %s3799_s21 = sld [smem:[#allocation2 + $0x80]] }
  0x2c   :  { %s3800_s22 = sld [smem:[#allocation2 + $0x81]]  ;;  %s3804_s4 = sld [smem:[#allocation2 + $0x100]] }
  0x2d   :  { %4503 = vmatpush3.bf16.msra.mxu0 %v5146_v7  ;;  %s79_s1 = scalar_lea.vmem %s6332_s3, %s77_s18  ;;  %4515 = vmatpush3.bf16.msra.mxu1 %v5146_v7  ;;  %s81_s12 = scalar_lea.vmem %s6332_s3, %s3794_s19 }
  0x2e   :  { %4504 = vmatprep.subr.bf16.mxu0 %v5048_v3  ;;  %4516 = vmatprep.subr.bf16.mxu1 %v5048_v3  ;;  %v80_v13 = vld [vmem:[%s79_s1] sm:$0x1]  ;;  %s3805_s2 = sld [smem:[#allocation2 + $0x101]]  ;;  %s3809_s27 = sld [smem:[#allocation2 + $0x180]] }
  0x2f   :  { %v3795_v14 = vld [vmem:[%s81_s12] ss:$0 sm:$0xff] }
  0x30   :  { %v90_v16 = vsel %vm89_vm1, %v80_v13, %v3795_v14  ;;  %p207_p1 = scmp.gt.s32.totalorder %s5207_s15, 0  ;;  %p338_p3 = scmp.gt.s32.totalorder %s5207_s15, 1 }
  0x31   :  { %4506 = vmatpush3.bf16.msra.mxu0 %v5158_v10  ;;  %4518 = vmatpush3.bf16.msra.mxu1 %v5158_v10  ;;  %v92_v17 = vsel %vm91_vm2, %v90_v16, 0.0  ;;  %p216_p2 = scmp.gt.s32.totalorder %s5209_s16, 0  ;;  %s228_s0 = scalar_lea.vmem %s6332_s3, %s3799_s21 }
  0x32   :  { %4507 = vmatprep.subr.bf16.mxu0 %v5048_v3  ;;  %4519 = vmatprep.subr.bf16.mxu1 %v5048_v3  ;;  %s208_s17 = scalar_select %p207_p1, 1, 0  ;;  %v229_v42 = vld [vmem:[%s228_s0] sm:$0x1] }
  0x33   :  { %s217_s18 = scalar_select %p216_p2, 1, 0 }
  0x34   :  { %s209_s19 = scvt.s32.f32 %s208_s17  ;;  %s230_s28 = scalar_lea.vmem %s6332_s3, %s3800_s22 }
  0x35   :  { %4509 = vmatpush3.bf16.msra.mxu0 %v5176_v15  ;;  %4521 = vmatpush3.bf16.msra.mxu1 %v5176_v15  ;;  %s218_s20 = scvt.s32.f32 %s217_s18  ;;  %v3801_v43 = vld [vmem:[%s230_s28] ss:$0 sm:$0xff]  ;;  %p347_p4 = scmp.gt.s32.totalorder %s5209_s16, 1 }
  0x36   :  { %4522 = vmatprep.subr.bf16.mxu0 %v5048_v3  ;;  %4534 = vmatprep.subr.bf16.mxu1 %v5048_v3  ;;  %s212_s23 = ssub.f32 1.0, %s209_s19  ;;  %v210_v37 = vstv %s209_s19  ;;  %v238_v48 = vsel %vm89_vm1, %v229_v42, %v3801_v43  ;;  %s359_s22 = scalar_lea.vmem %s6332_s3, %s3804_s4 }
  0x37   :  { %s221_s24 = ssub.f32 1.0, %s218_s20  ;;  %v219_v38 = vstv %s218_s20  ;;  %s361_s25 = scalar_lea.vmem %s6332_s3, %s3805_s2  ;;  %v360_v13 = vld [vmem:[%s359_s22] sm:$0x1] }
  0x38   :  { %4123 = vmatmul.mubr.msk.f32.vlgmr.msra.gmra.mrb[0].mxu0 %vm108_vm3, %v92_v17  ;;  %v213_v33 = vstv %s212_s23  ;;  %s339_s29 = scalar_select %p338_p3, 1, 0  ;;  %v3806_v14 = vld [vmem:[%s361_s25] ss:$0 sm:$0xff] }
  0x39   :  { %4524 = vmatpush3.bf16.msra.mxu0 %v5135_v4  ;;  %4160 = vmatprep.mubr.msk.f32.mxu0 %vm5049_vm0, %v5050_v6  ;;  %v222_v34 = vstv %s221_s24  ;;  %v214_v40 = vmul.f32 0.0, %v213_v33  ;;  %s348_s30 = scalar_select %p347_p4, 1, 0 }
  0x3a   :  { %4525 = vmatprep.subr.bf16.mxu0 %v5048_v3  ;;  %v223_v41 = vmul.f32 0.0, %v222_v34  ;;  %s340_s12 = scvt.s32.f32 %s339_s29  ;;  %p469_p5 = scmp.gt.s32.totalorder %s5207_s15, 2 }
  0x3b   :  { %s349_s17 = scvt.s32.f32 %s348_s30  ;;  %p478_p6 = scmp.gt.s32.totalorder %s5209_s16, 2 }
  0x3c   :  { %s343_s18 = ssub.f32 1.0, %s340_s12  ;;  %v341_v5 = vstv %s340_s12  ;;  %s3810_s28 = sld [smem:[#allocation2 + $0x181]] }
  0x3d   :  { %4527 = vmatpush3.bf16.msra.mxu0 %v5146_v7  ;;  %s352_s19 = ssub.f32 1.0, %s349_s17  ;;  %v350_v9 = vstv %s349_s17  ;;  %s490_s17 = scalar_lea.vmem %s6332_s3, %s3809_s27 }
  0x3e   :  { %4528 = vmatprep.subr.bf16.mxu0 %v5048_v3  ;;  %v344_v8 = vstv %s343_s18  ;;  %s470_s1 = scalar_select %p469_p5, 1, 0 }
  0x3f   :  { %v353_v11 = vstv %s352_s19  ;;  %s479_s0 = scalar_select %p478_p6, 1, 0 }
  0x40   :  { %s471_s26 = scvt.s32.f32 %s470_s1  ;;  %p600_p7 = scmp.gt.s32.totalorder %s5207_s15, 3 }
  0x41   :  { %4530 = vmatpush3.bf16.msra.mxu0 %v5158_v10  ;;  %s480_s29 = scvt.s32.f32 %s479_s0  ;;  %p609_p8 = scmp.gt.s32.totalorder %s5209_s16, 3 }
  0x42   :  { %4531 = vmatprep.subr.bf16.mxu0 %v5048_v3  ;;  %s474_s30 = ssub.f32 1.0, %s471_s26  ;;  %s492_s20 = scalar_lea.vmem %s6332_s3, %s3810_s28  ;;  %v472_v42 = vstv %s471_s26 }
  0x43   :  { %s483_s12 = ssub.f32 1.0, %s480_s29  ;;  %s3814_s24 = sld [smem:[#allocation2 + $0x200]] }
  0x44   :  { %v475_v43 = vstv %s474_s30  ;;  %s601_s21 = scalar_select %p600_p7, 1, 0 }
  0x45   :  { %4533 = vmatpush3.bf16.msra.mxu0 %v5176_v15  ;;  %s610_s22 = scalar_select %p609_p8, 1, 0 }
  0x46   :  { %4546 = vmatprep.subr.bf16.mxu0 %v5048_v3  ;;  %s602_s23 = scvt.s32.f32 %s601_s21  ;;  %s3815_s25 = sld [smem:[#allocation2 + $0x201]] }
  0x47   :  { %s611_s1 = scvt.s32.f32 %s610_s22  ;;  %p731_p9 = scmp.gt.s32.totalorder %s5207_s15, 4 }
  0x48   :  { %s605_s0 = ssub.f32 1.0, %s602_s23  ;;  %p740_p10 = scmp.gt.s32.totalorder %s5209_s16, 4 }
  0x49   :  { %s614_s26 = ssub.f32 1.0, %s611_s1  ;;  %s3819_s19 = sld [smem:[#allocation2 + $0x280]] }
  0x4a   :  { %s732_s2 = scalar_select %p731_p9, 1, 0 }
  0x4b   :  { %p862_p11 = scmp.gt.s32.totalorder %s5207_s15, 5  ;;  %p871_p12 = scmp.gt.s32.totalorder %s5209_s16, 5 }
  0x4c   :  { %s623_s4 = scalar_lea.vmem %s6332_s3, %s3815_s25  ;;  %s733_s18 = scvt.s32.f32 %s732_s2 }
  0x4d   :  { %s863_s28 = scalar_select %p862_p11, 1, 0 }
  0x4e   :  { %s736_s22 = ssub.f32 1.0, %s733_s18  ;;  %p993_p13 = scmp.gt.s32.totalorder %s5207_s15, 6 }
  0x4f   :  { %s864_s30 = scvt.s32.f32 %s863_s28  ;;  %p1002_p0 = scmp.gt.s32.totalorder %s5209_s16, 6 }
  0x50   :  { %s994_s25 = scalar_select %p993_p13, 1, 0 }
  0x51   :  { %p1124_p1 = scmp.gt.s32.totalorder %s5207_s15, 7  ;;  %p1133_p2 = scmp.gt.s32.totalorder %s5209_s16, 7 }
  0x52   :  { %s5619_s15 = sld [smem:[#allocation7 + $0x280]] }
 0x10b   :  { %v178_v19 = vpop.f32.mrb[0].mxu0 }
 0x10c   :  { %v179_v20 = vadd.f32 %v5201_v18, %v178_v19  ;;  %v4124_v21 = vpop.f32.mrb[1].mxu0 }
 0x10e   :  { %189 = vrot.lane.b32.xlu0 %v179_v20, %s5051_s13  ;;  %v3798_v22 = vmul.f32 -1.442695, %v179_v20 }
 0x110   :  { %4819 = vpow2.f32 %v3798_v22 }
 0x11a   :  { %v4820_v23 = vpop.eup %4819 }
 0x11b   :  { %v185_v24 = vadd.f32 1.0, %v4820_v23  ;;  %v369_v23 = vsel %vm89_vm1, %v360_v13, %v3806_v14 }
 0x11d   :  { %4821 = vrcp.f32 %v185_v24 }
 0x127   :  { %v4822_v25 = vpop.eup %4821 }
 0x128   :  { %v199_v31 = vsub.f32 1.0, %v4822_v25  ;;  %v205_v35 = vmul.f32 0.0, %v4822_v25 }
 0x180   :  { %v190_v26 = vpop.permute.xlu0 %189 }
 0x181   :  { %v192_v27 = vmul.f32 %v4822_v25, %v190_v26 }
 0x183   :  { %194 = vrot.lane.b32.xlu0 %v192_v27, %s5052_s14 }
 0x1f5   :  { %v195_v28 = vpop.permute.xlu0 %194 }
 0x1f6   :  { %v197_v29 = vadd.f32 %v195_v28, %v179_v20 }
 0x1f8   :  { %4823 = vtanh.f32 %v197_v29 }
 0x202   :  { %v4824_v30 = vpop.eup %4823 }
 0x203   :  { %201 = vrot.lane.b32.xlu1 %v4824_v30, %s5053_s5 }
 0x275   :  { %v202_v32 = vpop.permute.xlu1 %201 }
 0x276   :  { %v204_v36 = vmul.f32 %v202_v32, %v199_v31 }
 0x278   :  { %v206_v39 = vadd.f32 %v205_v35, %v204_v36 }
 0x27a   :  { %v211_v44 = vmul.f32 %v210_v37, %v206_v39  ;;  %v220_v45 = vmul.f32 %v219_v38, %v206_v39 }
 0x27c   :  { %v215_v46 = vadd.f32 %v214_v40, %v211_v44  ;;  %v224_v47 = vadd.f32 %v223_v41, %v220_v45  ;;  %v481_v44 = vstv %s480_s29  ;;  %v484_v45 = vstv %s483_s12  ;;  %s621_s29 = scalar_lea.vmem %s6332_s3, %s3814_s24  ;;  %s3824_s12 = sld [smem:[#allocation2 + $0x300]] }
 0x27e   :  { %v225_v49 = vsel %vm89_vm1, %v215_v46, %v224_v47  ;;  %v491_v47 = vld [vmem:[%s490_s17] sm:$0x1]  ;;  %s741_s17 = scalar_select %p740_p10, 1, 0 }
 0x27f   :  { %v239_v50 = vsel %vm91_vm2, %v238_v48, %v225_v49  ;;  %v345_v16 = vmul.f32 %v344_v8, %v225_v49  ;;  %v354_v17 = vmul.f32 %v353_v11, %v225_v49  ;;  %v3811_v48 = vld [vmem:[%s492_s20] ss:$0 sm:$0xff]  ;;  %s3820_s20 = sld [smem:[#allocation2 + $0x281]] }
 0x280   :  { %4142 = vmatmul.mubr.msk.f32.vlgmr.msra.gmra.mrb[0].mxu1 %vm108_vm3, %v239_v50  ;;  %s742_s21 = scvt.s32.f32 %s741_s17  ;;  %s867_s17 = ssub.f32 1.0, %s864_s30 }
 0x281   :  { %4536 = vmatpush3.bf16.msra.mxu1 %v5135_v4  ;;  %4179 = vmatprep.mubr.msk.f32.mxu1 %vm5049_vm0, %v5050_v6 }
 0x282   :  { %4537 = vmatprep.subr.bf16.mxu1 %v5048_v3 }
 0x285   :  { %4539 = vmatpush3.bf16.msra.mxu1 %v5146_v7  ;;  %s754_s27 = scalar_lea.vmem %s6332_s3, %s3820_s20 }
 0x286   :  { %4540 = vmatprep.subr.bf16.mxu1 %v5048_v3 }
 0x289   :  { %4542 = vmatpush3.bf16.msra.mxu1 %v5158_v10 }
 0x28a   :  { %4543 = vmatprep.subr.bf16.mxu1 %v5048_v3 }
 0x28d   :  { %4545 = vmatpush3.bf16.msra.mxu1 %v5176_v15 }
 0x28e   :  { %4558 = vmatprep.subr.bf16.mxu1 %v5048_v3 }
 0x353   :  { %v309_v51 = vpop.f32.mrb[0].mxu1 }
 0x354   :  { %v310_v52 = vadd.f32 %v5201_v18, %v309_v51  ;;  %v4143_v53 = vpop.f32.mrb[1].mxu1 }
 0x356   :  { %320 = vrot.lane.b32.xlu1 %v310_v52, %s5051_s13  ;;  %v3803_v54 = vmul.f32 -1.442695, %v310_v52 }
 0x358   :  { %4825 = vpow2.f32 %v3803_v54 }
 0x362   :  { %v4826_v55 = vpop.eup %4825 }
 0x363   :  { %v316_v56 = vadd.f32 1.0, %v4826_v55  ;;  %v500_v55 = vsel %vm89_vm1, %v491_v47, %v3811_v48 }
 0x365   :  { %4827 = vrcp.f32 %v316_v56 }
 0x36f   :  { %v4828_v57 = vpop.eup %4827 }
 0x370   :  { %v330_v63 = vsub.f32 1.0, %v4828_v57  ;;  %v336_v1 = vmul.f32 %v4828_v57, %v225_v49 }
 0x3c8   :  { %v321_v58 = vpop.permute.xlu1 %320 }
 0x3c9   :  { %v323_v59 = vmul.f32 %v4828_v57, %v321_v58 }
 0x3cb   :  { %325 = vrot.lane.b32.xlu0 %v323_v59, %s5052_s14 }
 0x43d   :  { %v326_v60 = vpop.permute.xlu0 %325 }
 0x43e   :  { %v328_v61 = vadd.f32 %v326_v60, %v310_v52 }
 0x440   :  { %4829 = vtanh.f32 %v328_v61 }
 0x44a   :  { %v4830_v62 = vpop.eup %4829 }
 0x44b   :  { %332 = vrot.lane.b32.xlu1 %v4830_v62, %s5053_s5 }
 0x4bd   :  { %v333_v0 = vpop.permute.xlu1 %332 }
 0x4be   :  { %v335_v2 = vmul.f32 %v333_v0, %v330_v63 }
 0x4c0   :  { %v337_v12 = vadd.f32 %v336_v1, %v335_v2 }
 0x4c2   :  { %v342_v19 = vmul.f32 %v341_v5, %v337_v12  ;;  %v351_v20 = vmul.f32 %v350_v9, %v337_v12 }
 0x4c4   :  { %v346_v21 = vadd.f32 %v345_v16, %v342_v19  ;;  %v355_v22 = vadd.f32 %v354_v17, %v351_v20  ;;  %v603_v16 = vstv %s602_s23  ;;  %v606_v17 = vstv %s605_s0  ;;  %s745_s23 = ssub.f32 1.0, %s742_s21  ;;  %s995_s0 = scvt.s32.f32 %s994_s25 }
 0x4c5   :  { %v612_v19 = vstv %s611_s1  ;;  %v615_v20 = vstv %s614_s26  ;;  %s752_s1 = scalar_lea.vmem %s6332_s3, %s3819_s19  ;;  %s3829_s26 = sld [smem:[#allocation2 + $0x380]] }
 0x4c6   :  { %v356_v24 = vsel %vm89_vm1, %v346_v21, %v355_v22  ;;  %v622_v22 = vld [vmem:[%s621_s29] sm:$0x1]  ;;  %s872_s29 = scalar_select %p871_p12, 1, 0 }
 0x4c7   :  { %v370_v25 = vsel %vm91_vm2, %v369_v23, %v356_v24  ;;  %v476_v49 = vmul.f32 %v475_v43, %v356_v24  ;;  %v485_v50 = vmul.f32 %v484_v45, %v356_v24  ;;  %v3816_v23 = vld [vmem:[%s623_s4] ss:$0 sm:$0xff]  ;;  %s3825_s4 = sld [smem:[#allocation2 + $0x301]] }
 0x4c8   :  { %4161 = vmatmul.mubr.msk.f32.vlgmr.msra.gmra.mrb[2].mxu0 %vm108_vm3, %v370_v25  ;;  %s873_s2 = scvt.s32.f32 %s872_s29  ;;  %s998_s29 = ssub.f32 1.0, %s995_s0 }
 0x4c9   :  { %4548 = vmatpush3.bf16.msra.mxu0 %v5135_v4  ;;  %4198 = vmatprep.mubr.msk.f32.mxu0 %vm5049_vm0, %v5050_v6 }
 0x4ca   :  { %4549 = vmatprep.subr.bf16.mxu0 %v5048_v3 }
 0x4cd   :  { %4551 = vmatpush3.bf16.msra.mxu0 %v5146_v7  ;;  %s885_s24 = scalar_lea.vmem %s6332_s3, %s3825_s4  ;;  %s5588_s4 = sld [smem:[#allocation7 + $0x201]] }
 0x4ce   :  { %4552 = vmatprep.subr.bf16.mxu0 %v5048_v3 }
 0x4d1   :  { %4554 = vmatpush3.bf16.msra.mxu0 %v5158_v10 }
 0x4d2   :  { %4555 = vmatprep.subr.bf16.mxu0 %v5048_v3 }
 0x4d5   :  { %4557 = vmatpush3.bf16.msra.mxu0 %v5176_v15 }
 0x4d6   :  { %4570 = vmatprep.subr.bf16.mxu0 %v5048_v3 }
 0x59b   :  { %v440_v26 = vpop.f32.mrb[2].mxu0 }
 0x59c   :  { %v441_v27 = vadd.f32 %v5201_v18, %v440_v26  ;;  %v4162_v28 = vpop.f32.mrb[3].mxu0 }
 0x59e   :  { %451 = vrot.lane.b32.xlu0 %v441_v27, %s5051_s13  ;;  %v3808_v29 = vmul.f32 -1.442695, %v441_v27 }
 0x5a0   :  { %4831 = vpow2.f32 %v3808_v29 }
 0x5aa   :  { %v4832_v30 = vpop.eup %4831 }
 0x5ab   :  { %v447_v31 = vadd.f32 1.0, %v4832_v30  ;;  %v631_v30 = vsel %vm89_vm1, %v622_v22, %v3816_v23  ;;  %v874_v22 = vstv %s873_s2 }
 0x5ad   :  { %4833 = vrcp.f32 %v447_v31 }
 0x5b7   :  { %v4834_v32 = vpop.eup %4833 }
 0x5b8   :  { %v461_v38 = vsub.f32 1.0, %v4834_v32  ;;  %v467_v40 = vmul.f32 %v4834_v32, %v356_v24 }
 0x610   :  { %v452_v33 = vpop.permute.xlu0 %451 }
 0x611   :  { %v454_v34 = vmul.f32 %v4834_v32, %v452_v33 }
 0x613   :  { %456 = vrot.lane.b32.xlu1 %v454_v34, %s5052_s14 }
 0x685   :  { %v457_v35 = vpop.permute.xlu1 %456 }
 0x686   :  { %v459_v36 = vadd.f32 %v457_v35, %v441_v27 }
 0x688   :  { %4835 = vtanh.f32 %v459_v36 }
 0x692   :  { %v4836_v37 = vpop.eup %4835 }
 0x693   :  { %463 = vrot.lane.b32.xlu0 %v4836_v37, %s5053_s5 }
 0x705   :  { %v464_v39 = vpop.permute.xlu0 %463 }
 0x706   :  { %v466_v41 = vmul.f32 %v464_v39, %v461_v38 }
 0x708   :  { %v468_v46 = vadd.f32 %v467_v40, %v466_v41 }
 0x70a   :  { %v473_v51 = vmul.f32 %v472_v42, %v468_v46  ;;  %v482_v52 = vmul.f32 %v481_v44, %v468_v46 }
 0x70c   :  { %v477_v53 = vadd.f32 %v476_v49, %v473_v51  ;;  %v486_v54 = vadd.f32 %v485_v50, %v482_v52  ;;  %v734_v49 = vstv %s733_s18  ;;  %v737_v50 = vstv %s736_s22  ;;  %s876_s18 = ssub.f32 1.0, %s873_s2  ;;  %s1014_s2 = scalar_lea.vmem %s6332_s3, %s3829_s26 }
 0x70d   :  { %v743_v51 = vstv %s742_s21  ;;  %v746_v52 = vstv %s745_s23  ;;  %s883_s21 = scalar_lea.vmem %s6332_s3, %s3824_s12  ;;  %s5457_s22 = sld [smem:[#allocation7 + $0x1]] }
 0x70e   :  { %v487_v56 = vsel %vm89_vm1, %v477_v53, %v486_v54  ;;  %v753_v54 = vld [vmem:[%s752_s1] sm:$0x1]  ;;  %v877_v23 = vstv %s876_s18  ;;  %s1003_s1 = scalar_select %p1002_p0, 1, 0 }
 0x70f   :  { %v501_v57 = vsel %vm91_vm2, %v500_v55, %v487_v56  ;;  %v607_v24 = vmul.f32 %v606_v17, %v487_v56  ;;  %v616_v25 = vmul.f32 %v615_v20, %v487_v56  ;;  %v3821_v55 = vld [vmem:[%s754_s27] ss:$0 sm:$0xff]  ;;  %v865_v20 = vstv %s864_s30  ;;  %s3830_s27 = sld [smem:[#allocation2 + $0x381]]  ;;  %s5553_s23 = sld [smem:[#allocation7 + $0x180]] }
 0x710   :  { %4180 = vmatmul.mubr.msk.f32.vlgmr.msra.gmra.mrb[2].mxu1 %vm108_vm3, %v501_v57  ;;  %s1004_s28 = scvt.s32.f32 %s1003_s1 }
 0x711   :  { %4560 = vmatpush3.bf16.msra.mxu1 %v5135_v4  ;;  %4217 = vmatprep.mubr.msk.f32.mxu1 %vm5049_vm0, %v5050_v6 }
 0x712   :  { %4561 = vmatprep.subr.bf16.mxu1 %v5048_v3  ;;  %s1007_s30 = ssub.f32 1.0, %s1004_s28 }
 0x713   :  { %s1508_s26 = scalar_lea.vmem %s6335_s6, %s5457_s22 }
 0x715   :  { %4563 = vmatpush3.bf16.msra.mxu1 %v5146_v7  ;;  %s1016_s19 = scalar_lea.vmem %s6332_s3, %s3830_s27  ;;  %s5487_s27 = sld [smem:[#allocation7 + $0x80]] }
 0x716   :  { %4564 = vmatprep.subr.bf16.mxu1 %v5048_v3 }
 0x719   :  { %4566 = vmatpush3.bf16.msra.mxu1 %v5158_v10 }
 0x71a   :  { %4567 = vmatprep.subr.bf16.mxu1 %v5048_v3 }
 0x71b   :  { %s1822_s12 = scalar_lea.vmem %s6335_s6, %s5487_s27 }
 0x71d   :  { %4569 = vmatpush3.bf16.msra.mxu1 %v5176_v15 }
 0x71e   :  { %4582 = vmatprep.subr.bf16.mxu1 %v5048_v3 }
 0x7e3   :  { %v571_v58 = vpop.f32.mrb[2].mxu1 }
 0x7e4   :  { %v572_v59 = vadd.f32 %v5201_v18, %v571_v58  ;;  %v4181_v60 = vpop.f32.mrb[3].mxu1 }
 0x7e6   :  { %582 = vrot.lane.b32.xlu1 %v572_v59, %s5051_s13  ;;  %v3813_v61 = vmul.f32 -1.442695, %v572_v59 }
 0x7e8   :  { %4837 = vpow2.f32 %v3813_v61 }
 0x7f2   :  { %v4838_v62 = vpop.eup %4837 }
 0x7f3   :  { %v578_v63 = vadd.f32 1.0, %v4838_v62  ;;  %v762_v62 = vsel %vm89_vm1, %v753_v54, %v3821_v55  ;;  %v1005_v54 = vstv %s1004_s28  ;;  %v1008_v55 = vstv %s1007_s30  ;;  %s5489_s28 = sld [smem:[#allocation7 + $0x81]] }
 0x7f5   :  { %4839 = vrcp.f32 %v578_v63 }
 0x7ff   :  { %v4840_v0 = vpop.eup %4839 }
 0x800   :  { %v592_v11 = vsub.f32 1.0, %v4840_v0  ;;  %v598_v13 = vmul.f32 %v4840_v0, %v487_v56 }
 0x858   :  { %v583_v1 = vpop.permute.xlu1 %582 }
 0x859   :  { %v585_v2 = vmul.f32 %v4840_v0, %v583_v1 }
 0x85b   :  { %587 = vrot.lane.b32.xlu0 %v585_v2, %s5052_s14 }
 0x8cd   :  { %v588_v5 = vpop.permute.xlu0 %587 }
 0x8ce   :  { %v590_v8 = vadd.f32 %v588_v5, %v572_v59 }
 0x8d0   :  { %4841 = vtanh.f32 %v590_v8 }
 0x8da   :  { %v4842_v9 = vpop.eup %4841 }
 0x8db   :  { %594 = vrot.lane.b32.xlu1 %v4842_v9, %s5053_s5 }
 0x94d   :  { %v595_v12 = vpop.permute.xlu1 %594 }
 0x94e   :  { %v597_v14 = vmul.f32 %v595_v12, %v592_v11 }
 0x950   :  { %v599_v21 = vadd.f32 %v598_v13, %v597_v14 }
 0x952   :  { %v604_v26 = vmul.f32 %v603_v16, %v599_v21  ;;  %v613_v27 = vmul.f32 %v612_v19, %v599_v21  ;;  %v868_v21 = vstv %s867_s17  ;;  %s1134_s17 = scalar_select %p1133_p2, 1, 0 }
 0x954   :  { %v608_v28 = vadd.f32 %v607_v24, %v604_v26  ;;  %v617_v29 = vadd.f32 %v616_v25, %v613_v27  ;;  %v884_v25 = vld [vmem:[%s883_s21] sm:$0x1]  ;;  %s2772_s21 = scalar_lea.vmem %s6335_s6, %s5588_s4 }
 0x955   :  { %v3826_v26 = vld [vmem:[%s885_s24] ss:$0 sm:$0xff]  ;;  %s5555_s24 = sld [smem:[#allocation7 + $0x181]] }
 0x956   :  { %v618_v31 = vsel %vm89_vm1, %v608_v28, %v617_v29 }
 0x957   :  { %v632_v32 = vsel %vm91_vm2, %v631_v30, %v618_v31  ;;  %v738_v56 = vmul.f32 %v737_v50, %v618_v31  ;;  %v747_v57 = vmul.f32 %v746_v52, %v618_v31  ;;  %v996_v52 = vstv %s995_s0  ;;  %s2454_s0 = scalar_lea.vmem %s6335_s6, %s5553_s23 }
 0x958   :  { %4199 = vmatmul.mubr.msk.f32.vlgmr.msra.gmra.mrb[4].mxu0 %vm108_vm3, %v632_v32 }
 0x959   :  { %4572 = vmatpush3.bf16.msra.mxu0 %v5135_v4  ;;  %4236 = vmatprep.mubr.msk.f32.mxu0 %vm5049_vm0, %v5050_v6 }
 0x95a   :  { %4573 = vmatprep.subr.bf16.mxu0 %v5048_v3 }
 0x95b   :  { %s2456_s30 = scalar_lea.vmem %s6335_s6, %s5555_s24 }
 0x95d   :  { %4575 = vmatpush3.bf16.msra.mxu0 %v5146_v7 }
 0x95e   :  { %4576 = vmatprep.subr.bf16.mxu0 %v5048_v3 }
 0x961   :  { %4578 = vmatpush3.bf16.msra.mxu0 %v5158_v10 }
 0x962   :  { %4579 = vmatprep.subr.bf16.mxu0 %v5048_v3 }
 0x965   :  { %4581 = vmatpush3.bf16.msra.mxu0 %v5176_v15 }
 0x966   :  { %4594 = vmatprep.subr.bf16.mxu0 %v5048_v3 }
 0xa2b   :  { %v702_v33 = vpop.f32.mrb[4].mxu0 }
 0xa2c   :  { %v703_v34 = vadd.f32 %v5201_v18, %v702_v33  ;;  %v4200_v35 = vpop.f32.mrb[5].mxu0  ;;  %v893_v33 = vsel %vm89_vm1, %v884_v25, %v3826_v26  ;;  %v1163_v26 = vld [vmem:[%s6336_s7 + $0x30] sm:$0xff] }
 0xa2e   :  { %713 = vrot.lane.b32.xlu0 %v703_v34, %s5051_s13  ;;  %v3818_v36 = vmul.f32 -1.442695, %v703_v34 }
 0xa30   :  { %4843 = vpow2.f32 %v3818_v36 }
 0xa3a   :  { %v4844_v37 = vpop.eup %4843 }
 0xa3b   :  { %v709_v38 = vadd.f32 1.0, %v4844_v37 }
 0xa3d   :  { %4845 = vrcp.f32 %v709_v38 }
 0xa47   :  { %v4846_v39 = vpop.eup %4845 }
 0xa48   :  { %v723_v45 = vsub.f32 1.0, %v4846_v39  ;;  %v729_v47 = vmul.f32 %v4846_v39, %v618_v31 }
 0xaa0   :  { %v714_v40 = vpop.permute.xlu0 %713 }
 0xaa1   :  { %v716_v41 = vmul.f32 %v4846_v39, %v714_v40 }
 0xaa3   :  { %718 = vrot.lane.b32.xlu1 %v716_v41, %s5052_s14 }
 0xb15   :  { %v719_v42 = vpop.permute.xlu1 %718 }
 0xb16   :  { %v721_v43 = vadd.f32 %v719_v42, %v703_v34 }
 0xb18   :  { %4847 = vtanh.f32 %v721_v43 }
 0xb22   :  { %v4848_v44 = vpop.eup %4847 }
 0xb23   :  { %725 = vrot.lane.b32.xlu0 %v4848_v44, %s5053_s5 }
 0xb95   :  { %v726_v46 = vpop.permute.xlu0 %725 }
 0xb96   :  { %v728_v48 = vmul.f32 %v726_v46, %v723_v45 }
 0xb98   :  { %v730_v53 = vadd.f32 %v729_v47, %v728_v48 }
 0xb9a   :  { %v735_v58 = vmul.f32 %v734_v49, %v730_v53  ;;  %v744_v59 = vmul.f32 %v743_v51, %v730_v53  ;;  %v999_v53 = vstv %s998_s29 }
 0xb9c   :  { %v739_v60 = vadd.f32 %v738_v56, %v735_v58  ;;  %v748_v61 = vadd.f32 %v747_v57, %v744_v59  ;;  %v1015_v57 = vld [vmem:[%s1014_s2] sm:$0x1]  ;;  %s1125_s2 = scalar_select %p1124_p1, 1, 0 }
 0xb9d   :  { %v3831_v58 = vld [vmem:[%s1016_s19] ss:$0 sm:$0xff]  ;;  %s1135_s19 = scvt.s32.f32 %s1134_s17  ;;  %s1824_s17 = scalar_lea.vmem %s6335_s6, %s5489_s28 }
 0xb9e   :  { %v749_v63 = vsel %vm89_vm1, %v739_v60, %v748_v61  ;;  %s1126_s18 = scvt.s32.f32 %s1125_s2  ;;  %s5651_s2 = sld [smem:[#allocation7 + $0x300]] }
 0xb9f   :  { %v763_v0 = vsel %vm91_vm2, %v762_v62, %v749_v63  ;;  %v869_v27 = vmul.f32 %v868_v21, %v749_v63  ;;  %v878_v28 = vmul.f32 %v877_v23, %v749_v63  ;;  %v1161_v23 = vld [vmem:[%s6336_s7 + $0x20] sm:$0xff]  ;;  %s1138_s3 = ssub.f32 1.0, %s1135_s19 }
 0xba0   :  { %4218 = vmatmul.mubr.msk.f32.vlgmr.msra.gmra.mrb[4].mxu1 %vm108_vm3, %v763_v0 }
 0xba1   :  { %4584 = vmatpush3.bf16.msra.mxu1 %v5135_v4  ;;  %4255 = vmatprep.mubr.msk.f32.mxu1 %vm5049_vm0, %v5050_v6 }
 0xba2   :  { %4585 = vmatprep.subr.bf16.mxu1 %v5048_v3 }
 0xba5   :  { %4587 = vmatpush3.bf16.msra.mxu1 %v5146_v7 }
 0xba6   :  { %4588 = vmatprep.subr.bf16.mxu1 %v5048_v3 }
 0xba9   :  { %4590 = vmatpush3.bf16.msra.mxu1 %v5158_v10 }
 0xbaa   :  { %4591 = vmatprep.subr.bf16.mxu1 %v5048_v3 }
 0xbad   :  { %4593 = vmatpush3.bf16.msra.mxu1 %v5176_v15 }
 0xc73   :  { %v833_v1 = vpop.f32.mrb[4].mxu1 }
 0xc74   :  { %v834_v2 = vadd.f32 %v5201_v18, %v833_v1  ;;  %v4219_v5 = vpop.f32.mrb[5].mxu1  ;;  %v1024_v1 = vsel %vm89_vm1, %v1015_v57, %v3831_v58 }
 0xc76   :  { %844 = vrot.lane.b32.xlu1 %v834_v2, %s5051_s13  ;;  %v3823_v4 = vmul.f32 -1.442695, %v834_v2 }
 0xc78   :  { %4849 = vpow2.f32 %v3823_v4 }
 0xc82   :  { %v4850_v8 = vpop.eup %4849 }
 0xc83   :  { %v840_v7 = vadd.f32 1.0, %v4850_v8 }
 0xc85   :  { %4851 = vrcp.f32 %v840_v7 }
 0xc8f   :  { %v4852_v9 = vpop.eup %4851 }
 0xc90   :  { %v854_v14 = vsub.f32 1.0, %v4852_v9  ;;  %v860_v17 = vmul.f32 %v4852_v9, %v749_v63 }
 0xce8   :  { %v845_v11 = vpop.permute.xlu1 %844 }
 0xce9   :  { %v847_v10 = vmul.f32 %v4852_v9, %v845_v11 }
 0xceb   :  { %849 = vrot.lane.b32.xlu0 %v847_v10, %s5052_s14 }
 0xd5d   :  { %v850_v12 = vpop.permute.xlu0 %849 }
 0xd5e   :  { %v852_v15 = vadd.f32 %v850_v12, %v834_v2 }
 0xd60   :  { %4853 = vtanh.f32 %v852_v15 }
 0xd6a   :  { %v4854_v13 = vpop.eup %4853 }
 0xd6b   :  { %856 = vrot.lane.b32.xlu1 %v4854_v13, %s5053_s5 }
 0xddd   :  { %v857_v16 = vpop.permute.xlu1 %856 }
 0xdde   :  { %v859_v19 = vmul.f32 %v857_v16, %v854_v14  ;;  %v1157_v14 = vld [vmem:[%s6336_s7] sm:$0xff]  ;;  %v1159_v16 = vld [vmem:[%s6336_s7 + $0x10] sm:$0xff] }
 0xde0   :  { %v861_v24 = vadd.f32 %v860_v17, %v859_v19  ;;  %v1160_v19 = vld [vmem:[%s6336_s7 + $0x18] sm:$0xff] }
 0xde2   :  { %v866_v29 = vmul.f32 %v865_v20, %v861_v24  ;;  %v875_v30 = vmul.f32 %v874_v22, %v861_v24  ;;  %v5392_v20 = vpack.c.bf16 %v1160_v19, %v1159_v16  ;;  %v1162_v24 = vld [vmem:[%s6336_s7 + $0x28] sm:$0xff] }
 0xde3   :  { %v5403_v25 = vpack.c.bf16 %v1162_v24, %v1161_v23 }
 0xde4   :  { %v870_v31 = vadd.f32 %v869_v27, %v866_v29  ;;  %v879_v32 = vadd.f32 %v878_v28, %v875_v30  ;;  %v1164_v27 = vld [vmem:[%s6336_s7 + $0x38] sm:$0xff]  ;;  %v1143_v30 = vlaneseq }
 0xde5   :  { %v5413_v28 = vpack.c.bf16 %v1164_v27, %v1163_v26 }
 0xde6   :  { %v880_v34 = vsel %vm89_vm1, %v870_v31, %v879_v32  ;;  %v5421_v31 = vshrl.u32 %v1143_v30, 7 }
 0xde7   :  { %v894_v35 = vsel %vm91_vm2, %v893_v33, %v880_v34  ;;  %v1000_v59 = vmul.f32 %v999_v53, %v880_v34  ;;  %v1009_v60 = vmul.f32 %v1008_v55, %v880_v34  ;;  %v5449_v53 = vld [vmem:[%s6337_s8] ss:$0 sm:$0xff]  ;;  %s5455_s8 = sld [smem:[#allocation7]] }
 0xde8   :  { %4237 = vmatmul.mubr.msk.f32.vlgmr.msra.gmra.mrb[6].mxu0 %vm108_vm3, %v894_v35  ;;  %v1152_v33 = vsub.s32 0, %v5421_v31  ;;  %v3834_v35 = vld [vmem:[%s6335_s6 + $0x100] sm:$0x1] }
 0xde9   :  { %4274 = vmatprep.mubr.msk.f32.mxu0 %vm5049_vm0, %v5050_v6 }
 0xded   :  { %s1506_s25 = scalar_lea.vmem %s6335_s6, %s5455_s8 }
 0xebb   :  { %v964_v36 = vpop.f32.mrb[6].mxu0 }
 0xebc   :  { %v965_v37 = vadd.f32 %v5201_v18, %v964_v36  ;;  %v4238_v38 = vpop.f32.mrb[7].mxu0 }
 0xebd   :  { %v1127_v38 = vstv %s1126_s18 }
 0xebe   :  { %975 = vrot.lane.b32.xlu0 %v965_v37, %s5051_s13  ;;  %v3828_v39 = vmul.f32 -1.442695, %v965_v37 }
 0xec0   :  { %4855 = vpow2.f32 %v3828_v39 }
 0xeca   :  { %v4856_v40 = vpop.eup %4855 }
 0xecb   :  { %v971_v41 = vadd.f32 1.0, %v4856_v40  ;;  %v1136_v40 = vstv %s1135_s19  ;;  %s5522_s19 = sld [smem:[#allocation7 + $0x101]] }
 0xecd   :  { %4857 = vrcp.f32 %v971_v41  ;;  %v1139_v41 = vstv %s1138_s3 }
 0xed1   :  { %s2140_s16 = scalar_lea.vmem %s6335_s6, %s5522_s19 }
 0xed7   :  { %v4858_v42 = vpop.eup %4857 }
 0xed8   :  { %v985_v48 = vsub.f32 1.0, %v4858_v42  ;;  %v991_v50 = vmul.f32 %v4858_v42, %v880_v34 }
 0xf30   :  { %v976_v43 = vpop.permute.xlu0 %975 }
 0xf31   :  { %v978_v44 = vmul.f32 %v4858_v42, %v976_v43  ;;  %v1153_v43 = vrot.slane %v3834_v35, %v1152_v33 }
 0xf33   :  { %980 = vrot.lane.b32.xlu1 %v978_v44, %s5052_s14 }
 0xfa5   :  { %v981_v45 = vpop.permute.xlu1 %980 }
 0xfa6   :  { %v983_v46 = vadd.f32 %v981_v45, %v965_v37 }
 0xfa8   :  { %4859 = vtanh.f32 %v983_v46 }
 0xfb2   :  { %v4860_v47 = vpop.eup %4859 }
 0xfb3   :  { %987 = vrot.lane.b32.xlu0 %v4860_v47, %s5053_s5 }
0x1025   :  { %v988_v49 = vpop.permute.xlu0 %987 }
0x1026   :  { %v990_v51 = vmul.f32 %v988_v49, %v985_v48 }
0x1028   :  { %v992_v56 = vadd.f32 %v991_v50, %v990_v51  ;;  %v1155_v50 = vsel %vm89_vm1, %v3834_v35, %v1153_v43 }
0x102a   :  { %v997_v61 = vmul.f32 %v996_v52, %v992_v56  ;;  %v1006_v62 = vmul.f32 %v1005_v54, %v992_v56 }
0x102c   :  { %v1001_v63 = vadd.f32 %v1000_v59, %v997_v61  ;;  %v1010_v0 = vadd.f32 %v1009_v60, %v1006_v62 }
0x102e   :  { %v5368_v2 = vsel %vm89_vm1, %v1001_v63, %v1010_v0 }
0x102f   :  { %v1025_v5 = vsel %vm91_vm2, %v1024_v1, %v5368_v2  ;;  %v1140_v45 = vmul.f32 %v1139_v41, %v5368_v2 }
0x1030   :  { %4256 = vmatmul.mubr.msk.f32.vlgmr.msra.gmra.mrb[6].mxu1 %vm108_vm3, %v1025_v5  ;;  %v1507_v5 = vld [vmem:[%s1506_s25] sm:$0x1] }
0x1031   :  { %1368 = vmatprep.mubr.f32.mxu1 %v5050_v6 }
0x1103   :  { %v1095_v4 = vpop.f32.mrb[6].mxu1 }
0x1104   :  { %v1096_v8 = vadd.f32 %v5201_v18, %v1095_v4  ;;  %v4257_v7 = vpop.f32.mrb[7].mxu1  ;;  %v1158_v18 = vld [vmem:[%s6336_s7 + $0x8] sm:$0xff]  ;;  %s1129_s7 = ssub.f32 1.0, %s1126_s18  ;;  %v3845_v4 = vld [vmem:[%s1508_s26] ss:$0 sm:$0xff]  ;;  %s5520_s18 = sld [smem:[#allocation7 + $0x100]] }
0x1105   :  { %v5386_v17 = vpack.c.bf16 %v1158_v18, %v1157_v14 }
0x1106   :  { %1106 = vrot.lane.b32.xlu1 %v1096_v8, %s5051_s13  ;;  %v3833_v9 = vmul.f32 -1.442695, %v1096_v8  ;;  %v1130_v39 = vstv %s1129_s7 }
0x1107   :  { %4596 = vmatpush3.bf16.msra.mxu0 %v5386_v17  ;;  %v1131_v44 = vmul.f32 %v1130_v39, %v5368_v2 }
0x1108   :  { %4861 = vpow2.f32 %v3833_v9  ;;  %4597 = vmatprep.subr.bf16.mxu0 %v5048_v3 }
0x110a   :  { %s2138_s20 = scalar_lea.vmem %s6335_s6, %s5520_s18 }
0x110b   :  { %4599 = vmatpush3.bf16.msra.mxu0 %v5392_v20 }
0x110c   :  { %4600 = vmatprep.subr.bf16.mxu0 %v5048_v3 }
0x110f   :  { %4602 = vmatpush3.bf16.msra.mxu0 %v5403_v25 }
0x1110   :  { %4603 = vmatprep.subr.bf16.mxu0 %v5048_v3 }
0x1112   :  { %v4862_v11 = vpop.eup %4861 }
0x1113   :  { %v1102_v10 = vadd.f32 1.0, %v4862_v11  ;;  %4605 = vmatpush3.bf16.msra.mxu0 %v5413_v28  ;;  %v1516_v11 = vsel %vm89_vm1, %v1507_v5, %v3845_v4 }
0x1114   :  { %4620 = vmatprep.subr.bf16.mxu0 %v5048_v3 }
0x1115   :  { %4863 = vrcp.f32 %v1102_v10 }
0x111f   :  { %v4864_v12 = vpop.eup %4863 }
0x1120   :  { %v1116_v32 = vsub.f32 1.0, %v4864_v12  ;;  %v1122_v36 = vmul.f32 %v4864_v12, %v5368_v2 }
0x1178   :  { %v1107_v15 = vpop.permute.xlu1 %1106 }
0x1179   :  { %v1109_v13 = vmul.f32 %v4864_v12, %v1107_v15 }
0x117b   :  { %1111 = vrot.lane.b32.xlu0 %v1109_v13, %s5052_s14 }
0x11ed   :  { %v1112_v21 = vpop.permute.xlu0 %1111 }
0x11ee   :  { %v1114_v22 = vadd.f32 %v1112_v21, %v1096_v8 }
0x11f0   :  { %4865 = vtanh.f32 %v1114_v22 }
0x11fa   :  { %v4866_v29 = vpop.eup %4865 }
0x11fb   :  { %1118 = vrot.lane.b32.xlu1 %v4866_v29, %s5053_s5 }
0x126d   :  { %v1119_v34 = vpop.permute.xlu1 %1118 }
0x126e   :  { %v1121_v37 = vmul.f32 %v1119_v34, %v1116_v32  ;;  %v1823_v32 = vld [vmem:[%s1822_s12] sm:$0x1]  ;;  %s5586_s12 = sld [smem:[#allocation7 + $0x200]] }
0x126f   :  { %v3856_v34 = vld [vmem:[%s1824_s17] ss:$0 sm:$0xff]  ;;  %s5653_s17 = sld [smem:[#allocation7 + $0x301]] }
0x1270   :  { %v1123_v42 = vadd.f32 %v1122_v36, %v1121_v37 }
0x1272   :  { %v1128_v46 = vmul.f32 %v1127_v38, %v1123_v42  ;;  %v1137_v47 = vmul.f32 %v1136_v40, %v1123_v42  ;;  %v1832_v38 = vsel %vm89_vm1, %v1823_v32, %v3856_v34 }
0x1274   :  { %v1132_v48 = vadd.f32 %v1131_v44, %v1128_v46  ;;  %v1141_v49 = vadd.f32 %v1140_v45, %v1137_v47  ;;  %s2770_s7 = scalar_lea.vmem %s6335_s6, %s5586_s12 }
0x1275   :  { %s3404_s1 = scalar_lea.vmem %s6335_s6, %s5653_s17 }
0x1276   :  { %v1142_v51 = vsel %vm89_vm1, %v1132_v48, %v1141_v49 }
0x1277   :  { %v1156_v52 = vsel %vm91_vm2, %v1155_v50, %v1142_v51 }
0x1278   :  { %4275 = vmatmul.mubr.msk.f32.vlgmr.msra.gmra.mrb[8].mxu0 %vm108_vm3, %v1156_v52 }
0x1279   :  { %4622 = vmatpush3.bf16.msra.mxu0 %v5386_v17  ;;  %4304 = vmatprep.mubr.msk.f32.mxu0 %vm5049_vm0, %v5050_v6 }
0x127a   :  { %4623 = vmatprep.subr.bf16.mxu0 %v5048_v3 }
0x127d   :  { %4625 = vmatpush3.bf16.msra.mxu0 %v5392_v20 }
0x127e   :  { %4626 = vmatprep.subr.bf16.mxu0 %v5048_v3 }
0x1281   :  { %4628 = vmatpush3.bf16.msra.mxu0 %v5403_v25 }
0x1282   :  { %4629 = vmatprep.subr.bf16.mxu0 %v5048_v3 }
0x1285   :  { %4631 = vmatpush3.bf16.msra.mxu0 %v5413_v28 }
0x1286   :  { %4646 = vmatprep.subr.bf16.mxu0 %v5048_v3 }
0x134b   :  { %v1241_v54 = vpop.f32.mrb[8].mxu0 }
0x134c   :  { %v1242_v55 = vadd.f32 %v5449_v53, %v1241_v54  ;;  %v4276_v56 = vpop.f32.mrb[9].mxu0 }
0x134d   :  { %v3867_v56 = vld [vmem:[%s2140_s16] ss:$0 sm:$0xff]  ;;  %s5621_s16 = sld [smem:[#allocation7 + $0x281]] }
0x134e   :  { %1252 = vrot.lane.b32.xlu0 %v1242_v55, %s5051_s13  ;;  %v3837_v57 = vmul.f32 -1.442695, %v1242_v55 }
0x1350   :  { %4867 = vpow2.f32 %v3837_v57 }
0x135a   :  { %v4868_v58 = vpop.eup %4867 }
0x135b   :  { %v1248_v59 = vadd.f32 1.0, %v4868_v58 }
0x135d   :  { %4869 = vrcp.f32 %v1248_v59 }
0x1367   :  { %v4870_v60 = vpop.eup %4869 }
0x1368   :  { %v1262_v2 = vsub.f32 1.0, %v4870_v60  ;;  %v1268_v7 = vmul.f32 %v4870_v60, %v1142_v51 }
0x13c0   :  { %v1253_v61 = vpop.permute.xlu0 %1252 }
0x13c1   :  { %v1255_v62 = vmul.f32 %v4870_v60, %v1253_v61 }
0x13c3   :  { %1257 = vrot.lane.b32.xlu1 %v1255_v62, %s5052_s14 }
0x1435   :  { %v1258_v63 = vpop.permute.xlu1 %1257 }
0x1436   :  { %v1260_v0 = vadd.f32 %v1258_v63, %v1242_v55  ;;  %v2139_v55 = vld [vmem:[%s2138_s20] sm:$0x1]  ;;  %s3402_s20 = scalar_lea.vmem %s6335_s6, %s5651_s2 }
0x1437   :  { %v2148_v60 = vsel %vm89_vm1, %v2139_v55, %v3867_v56 }
0x1438   :  { %4871 = vtanh.f32 %v1260_v0 }
0x1442   :  { %v4872_v1 = vpop.eup %4871 }
0x1443   :  { %1264 = vrot.lane.b32.xlu0 %v4872_v1, %s5053_s5 }
0x14b5   :  { %v1265_v8 = vpop.permute.xlu0 %1264 }
0x14b6   :  { %v1267_v9 = vmul.f32 %v1265_v8, %v1262_v2 }
0x14b8   :  { %v5468_v10 = vadd.f32 %v1268_v7, %v1267_v9 }
0x14ba   :  { %v1517_v12 = vsel %vm91_vm2, %v1516_v11, %v5468_v10 }
0x14bb   :  { %4305 = vmatmul.mubr.msk.f32.vlgmr.msra.gmra.mrb[10].mxu0 %vm108_vm3, %v1517_v12 }
0x14bc   :  { %4648 = vmatpush3.bf16.msra.mxu0 %v5386_v17  ;;  %4334 = vmatprep.mubr.msk.f32.mxu0 %vm5049_vm0, %v5050_v6 }
0x14bd   :  { %4649 = vmatprep.subr.bf16.mxu0 %v5048_v3 }
0x14c0   :  { %4651 = vmatpush3.bf16.msra.mxu0 %v5392_v20 }
0x14c1   :  { %4652 = vmatprep.subr.bf16.mxu0 %v5048_v3 }
0x14c4   :  { %4654 = vmatpush3.bf16.msra.mxu0 %v5403_v25 }
0x14c5   :  { %4655 = vmatprep.subr.bf16.mxu0 %v5048_v3 }
0x14c8   :  { %4657 = vmatpush3.bf16.msra.mxu0 %v5413_v28 }
0x14c9   :  { %4672 = vmatprep.subr.bf16.mxu0 %v5048_v3 }
0x158e   :  { %v1587_v15 = vpop.f32.mrb[10].mxu0 }
0x158f   :  { %v1588_v13 = vadd.f32 %v5449_v53, %v1587_v15  ;;  %v4306_v14 = vpop.f32.mrb[11].mxu0 }
0x1590   :  { %v2455_v14 = vld [vmem:[%s2454_s0] sm:$0x1]  ;;  %s3086_s0 = scalar_lea.vmem %s6335_s6, %s5619_s15 }
0x1591   :  { %1598 = vrot.lane.b32.xlu1 %v1588_v13, %s5051_s13  ;;  %v3847_v18 = vmul.f32 -1.442695, %v1588_v13 }
0x1593   :  { %4873 = vpow2.f32 %v3847_v18  ;;  %v3878_v18 = vld [vmem:[%s2456_s30] ss:$0 sm:$0xff]  ;;  %s3088_s30 = scalar_lea.vmem %s6335_s6, %s5621_s16 }
0x159d   :  { %v4874_v16 = vpop.eup %4873 }
0x159e   :  { %v1594_v19 = vadd.f32 1.0, %v4874_v16 }
0x15a0   :  { %4875 = vrcp.f32 %v1594_v19 }
0x15aa   :  { %v4876_v21 = vpop.eup %4875 }
0x15ab   :  { %v1608_v29 = vsub.f32 1.0, %v4876_v21  ;;  %v1614_v36 = vmul.f32 %v4876_v21, %v5468_v10 }
0x1603   :  { %v1599_v22 = vpop.permute.xlu1 %1598 }
0x1604   :  { %v1601_v23 = vmul.f32 %v4876_v21, %v1599_v22  ;;  %v2464_v22 = vsel %vm89_vm1, %v2455_v14, %v3878_v18 }
0x1606   :  { %1603 = vrot.lane.b32.xlu0 %v1601_v23, %s5052_s14 }
0x1678   :  { %v1604_v24 = vpop.permute.xlu0 %1603 }
0x1679   :  { %v1606_v26 = vadd.f32 %v1604_v24, %v1588_v13 }
0x167b   :  { %4877 = vtanh.f32 %v1606_v26 }
0x1685   :  { %v4878_v27 = vpop.eup %4877 }
0x1686   :  { %1610 = vrot.lane.b32.xlu1 %v4878_v27, %s5053_s5 }
0x16f8   :  { %v1611_v35 = vpop.permute.xlu1 %1610 }
0x16f9   :  { %v1613_v37 = vmul.f32 %v1611_v35, %v1608_v29 }
0x16fb   :  { %v5501_v39 = vadd.f32 %v1614_v36, %v1613_v37 }
0x16fd   :  { %v1833_v40 = vsel %vm91_vm2, %v1832_v38, %v5501_v39 }
0x16fe   :  { %4335 = vmatmul.mubr.msk.f32.vlgmr.msra.gmra.mrb[12].mxu0 %vm108_vm3, %v1833_v40 }
0x16ff   :  { %4674 = vmatpush3.bf16.msra.mxu0 %v5386_v17  ;;  %4364 = vmatprep.mubr.msk.f32.mxu0 %vm5049_vm0, %v5050_v6 }
0x1700   :  { %4675 = vmatprep.subr.bf16.mxu0 %v5048_v3 }
0x1703   :  { %4677 = vmatpush3.bf16.msra.mxu0 %v5392_v20 }
0x1704   :  { %4678 = vmatprep.subr.bf16.mxu0 %v5048_v3 }
0x1707   :  { %4680 = vmatpush3.bf16.msra.mxu0 %v5403_v25 }
0x1708   :  { %4681 = vmatprep.subr.bf16.mxu0 %v5048_v3 }
0x170b   :  { %4683 = vmatpush3.bf16.msra.mxu0 %v5413_v28 }
0x170c   :  { %4698 = vmatprep.subr.bf16.mxu0 %v5048_v3 }
0x17d1   :  { %v1903_v41 = vpop.f32.mrb[12].mxu0 }
0x17d2   :  { %v1904_v42 = vadd.f32 %v5449_v53, %v1903_v41  ;;  %v4336_v43 = vpop.f32.mrb[13].mxu0 }
0x17d4   :  { %1914 = vrot.lane.b32.xlu0 %v1904_v42, %s5051_s13  ;;  %v3858_v44 = vmul.f32 -1.442695, %v1904_v42 }
0x17d6   :  { %4879 = vpow2.f32 %v3858_v44  ;;  %v2771_v44 = vld [vmem:[%s2770_s7] sm:$0x1] }
0x17e0   :  { %v4880_v45 = vpop.eup %4879 }
0x17e1   :  { %v1910_v46 = vadd.f32 1.0, %v4880_v45  ;;  %v3889_v45 = vld [vmem:[%s2772_s21] ss:$0 sm:$0xff] }
0x17e3   :  { %4881 = vrcp.f32 %v1910_v46 }
0x17ed   :  { %v4882_v47 = vpop.eup %4881 }
0x17ee   :  { %v1924_v54 = vsub.f32 1.0, %v4882_v47  ;;  %v1930_v58 = vmul.f32 %v4882_v47, %v5501_v39 }
0x1846   :  { %v1915_v48 = vpop.permute.xlu0 %1914 }
0x1847   :  { %v1917_v49 = vmul.f32 %v4882_v47, %v1915_v48 }
0x1849   :  { %1919 = vrot.lane.b32.xlu1 %v1917_v49, %s5052_s14  ;;  %v2780_v49 = vsel %vm89_vm1, %v2771_v44, %v3889_v45  ;;  %v1273_v44 = vld [vmem:[%s6338_s9 + $0x18] sm:$0xff] }
0x184a   :  { %v1277_v45 = vld [vmem:[%s6338_s9 + $0x38] sm:$0xff] }
0x18bb   :  { %v1920_v50 = vpop.permute.xlu1 %1919 }
0x18bc   :  { %v1922_v51 = vadd.f32 %v1920_v50, %v1904_v42 }
0x18be   :  { %4883 = vtanh.f32 %v1922_v51 }
0x18c8   :  { %v4884_v52 = vpop.eup %4883 }
0x18c9   :  { %1926 = vrot.lane.b32.xlu0 %v4884_v52, %s5053_s5 }
0x193b   :  { %v1927_v57 = vpop.permute.xlu0 %1926 }
0x193c   :  { %v1929_v59 = vmul.f32 %v1927_v57, %v1924_v54 }
0x193e   :  { %v5534_v61 = vadd.f32 %v1930_v58, %v1929_v59 }
0x1940   :  { %v2149_v62 = vsel %vm91_vm2, %v2148_v60, %v5534_v61 }
0x1941   :  { %4365 = vmatmul.mubr.msk.f32.vlgmr.msra.gmra.mrb[14].mxu0 %vm108_vm3, %v2149_v62 }
0x1942   :  { %4700 = vmatpush3.bf16.msra.mxu0 %v5386_v17  ;;  %4394 = vmatprep.mubr.msk.f32.mxu0 %vm5049_vm0, %v5050_v6 }
0x1943   :  { %4701 = vmatprep.subr.bf16.mxu0 %v5048_v3 }
0x1946   :  { %4703 = vmatpush3.bf16.msra.mxu0 %v5392_v20 }
0x1947   :  { %4704 = vmatprep.subr.bf16.mxu0 %v5048_v3 }
0x194a   :  { %4706 = vmatpush3.bf16.msra.mxu0 %v5403_v25 }
0x194b   :  { %4707 = vmatprep.subr.bf16.mxu0 %v5048_v3 }
0x194e   :  { %4709 = vmatpush3.bf16.msra.mxu0 %v5413_v28 }
0x194f   :  { %4724 = vmatprep.subr.bf16.mxu0 %v5048_v3 }
0x1a14   :  { %v2219_v63 = vpop.f32.mrb[14].mxu0 }
0x1a15   :  { %v2220_v0 = vadd.f32 %v5449_v53, %v2219_v63  ;;  %v4366_v1 = vpop.f32.mrb[15].mxu0 }
0x1a17   :  { %2230 = vrot.lane.b32.xlu1 %v2220_v0, %s5051_s13  ;;  %v3869_v2 = vmul.f32 -1.442695, %v2220_v0 }
0x1a19   :  { %4885 = vpow2.f32 %v3869_v2 }
0x1a23   :  { %v4886_v5 = vpop.eup %4885 }
0x1a24   :  { %v2226_v4 = vadd.f32 1.0, %v4886_v5  ;;  %v3087_v5 = vld [vmem:[%s3086_s0] sm:$0x1] }
0x1a26   :  { %4887 = vrcp.f32 %v2226_v4  ;;  %v3900_v4 = vld [vmem:[%s3088_s30] ss:$0 sm:$0xff] }
0x1a30   :  { %v4888_v8 = vpop.eup %4887 }
0x1a31   :  { %v2240_v13 = vsub.f32 1.0, %v4888_v8  ;;  %v2246_v19 = vmul.f32 %v4888_v8, %v5534_v61 }
0x1a89   :  { %v2231_v7 = vpop.permute.xlu1 %2230 }
0x1a8a   :  { %v2233_v9 = vmul.f32 %v4888_v8, %v2231_v7 }
0x1a8c   :  { %2235 = vrot.lane.b32.xlu0 %v2233_v9, %s5052_s14 }
0x1afe   :  { %v2236_v11 = vpop.permute.xlu0 %2235 }
0x1aff   :  { %v2238_v12 = vadd.f32 %v2236_v11, %v2220_v0  ;;  %v3096_v11 = vsel %vm89_vm1, %v3087_v5, %v3900_v4 }
0x1b01   :  { %4889 = vtanh.f32 %v2238_v12 }
0x1b0b   :  { %v4890_v15 = vpop.eup %4889 }
0x1b0c   :  { %2242 = vrot.lane.b32.xlu1 %v4890_v15, %s5053_s5 }
0x1b7e   :  { %v2243_v16 = vpop.permute.xlu1 %2242 }
0x1b7f   :  { %v2245_v21 = vmul.f32 %v2243_v16, %v2240_v13 }
0x1b81   :  { %v5567_v23 = vadd.f32 %v2246_v19, %v2245_v21 }
0x1b83   :  { %v2465_v24 = vsel %vm91_vm2, %v2464_v22, %v5567_v23 }
0x1b84   :  { %4395 = vmatmul.mubr.msk.f32.vlgmr.msra.gmra.mrb[16].mxu0 %vm108_vm3, %v2465_v24 }
0x1b85   :  { %4726 = vmatpush3.bf16.msra.mxu0 %v5386_v17  ;;  %4424 = vmatprep.mubr.msk.f32.mxu0 %vm5049_vm0, %v5050_v6 }
0x1b86   :  { %4727 = vmatprep.subr.bf16.mxu0 %v5048_v3 }
0x1b89   :  { %4729 = vmatpush3.bf16.msra.mxu0 %v5392_v20 }
0x1b8a   :  { %4730 = vmatprep.subr.bf16.mxu0 %v5048_v3 }
0x1b8d   :  { %4732 = vmatpush3.bf16.msra.mxu0 %v5403_v25 }
0x1b8e   :  { %4733 = vmatprep.subr.bf16.mxu0 %v5048_v3 }
0x1b91   :  { %4735 = vmatpush3.bf16.msra.mxu0 %v5413_v28 }
0x1b92   :  { %4750 = vmatprep.subr.bf16.mxu0 %v5048_v3 }
0x1c57   :  { %v2535_v26 = vpop.f32.mrb[16].mxu0 }
0x1c58   :  { %v2536_v27 = vadd.f32 %v5449_v53, %v2535_v26  ;;  %v4396_v29 = vpop.f32.mrb[17].mxu0 }
0x1c59   :  { %v3911_v29 = vld [vmem:[%s3404_s1] ss:$0 sm:$0xff] }
0x1c5a   :  { %2546 = vrot.lane.b32.xlu0 %v2536_v27, %s5051_s13  ;;  %v3880_v32 = vmul.f32 -1.442695, %v2536_v27 }
0x1c5c   :  { %4891 = vpow2.f32 %v3880_v32 }
0x1c66   :  { %v4892_v34 = vpop.eup %4891 }
0x1c67   :  { %v2542_v35 = vadd.f32 1.0, %v4892_v34 }
0x1c69   :  { %4893 = vrcp.f32 %v2542_v35 }
0x1c73   :  { %v4894_v36 = vpop.eup %4893 }
0x1c74   :  { %v2556_v43 = vsub.f32 1.0, %v4894_v36  ;;  %v2562_v47 = vmul.f32 %v4894_v36, %v5567_v23 }
0x1ccc   :  { %v2547_v37 = vpop.permute.xlu0 %2546 }
0x1ccd   :  { %v2549_v38 = vmul.f32 %v4894_v36, %v2547_v37 }
0x1ccf   :  { %2551 = vrot.lane.b32.xlu1 %v2549_v38, %s5052_s14 }
0x1d41   :  { %v2552_v40 = vpop.permute.xlu1 %2551 }
0x1d42   :  { %v2554_v41 = vadd.f32 %v2552_v40, %v2536_v27  ;;  %v3403_v27 = vld [vmem:[%s3402_s20] sm:$0x1]  ;;  %v1271_v40 = vld [vmem:[%s6338_s9 + $0x8] sm:$0xff] }
0x1d43   :  { %v3412_v36 = vsel %vm89_vm1, %v3403_v27, %v3911_v29 }
0x1d44   :  { %4895 = vtanh.f32 %v2554_v41  ;;  %v1274_v41 = vld [vmem:[%s6338_s9 + $0x20] sm:$0xff] }
0x1d4e   :  { %v4896_v42 = vpop.eup %4895 }
0x1d4f   :  { %2558 = vrot.lane.b32.xlu0 %v4896_v42, %s5053_s5  ;;  %v1270_v42 = vld [vmem:[%s6338_s9] sm:$0xff] }
0x1dc1   :  { %v2559_v46 = vpop.permute.xlu0 %2558 }
0x1dc2   :  { %v2561_v48 = vmul.f32 %v2559_v46, %v2556_v43  ;;  %v5679_v43 = vpack.c.bf16 %v1274_v41, %v1271_v40  ;;  %v1280_v46 = vld [vmem:[%s6338_s9 + $0x50] sm:$0xff] }
0x1dc4   :  { %v5600_v50 = vadd.f32 %v2562_v47, %v2561_v48  ;;  %v5690_v47 = vpack.c.bf16 %v1273_v44, %v1270_v42  ;;  %v5692_v48 = vpack.c.bf16 %v1280_v46, %v1277_v45  ;;  %4607 = vmatprep.subr.bf16.mxu1 %v5679_v43 }
0x1dc6   :  { %v2781_v51 = vsel %vm91_vm2, %v2780_v49, %v5600_v50  ;;  %4609 = vmatpush1.bf16.msra.mxu1 %v5690_v47  ;;  %v1276_v49 = vld [vmem:[%s6338_s9 + $0x30] sm:$0xff] }
0x1dc7   :  { %4425 = vmatmul.mubr.msk.f32.vlgmr.msra.gmra.mrb[18].mxu0 %vm108_vm3, %v2781_v51  ;;  %4611 = vmatprep.subr.bf16.mxu1 %v5692_v48  ;;  %v1279_v51 = vld [vmem:[%s6338_s9 + $0x48] sm:$0xff] }
0x1dc8   :  { %4752 = vmatpush3.bf16.msra.mxu0 %v5386_v17  ;;  %4454 = vmatprep.mubr.msk.f32.mxu0 %vm5049_vm0, %v5050_v6 }
0x1dc9   :  { %4753 = vmatprep.subr.bf16.mxu0 %v5048_v3 }
0x1dcc   :  { %4755 = vmatpush3.bf16.msra.mxu0 %v5392_v20 }
0x1dcd   :  { %4756 = vmatprep.subr.bf16.mxu0 %v5048_v3 }
0x1dd0   :  { %4758 = vmatpush3.bf16.msra.mxu0 %v5403_v25 }
0x1dd1   :  { %4759 = vmatprep.subr.bf16.mxu0 %v5048_v3 }
0x1dd4   :  { %4761 = vmatpush3.bf16.msra.mxu0 %v5413_v28 }
0x1dd5   :  { %4776 = vmatprep.subr.bf16.mxu0 %v5048_v3 }
0x1e9a   :  { %v2851_v52 = vpop.f32.mrb[18].mxu0 }
0x1e9b   :  { %v2852_v54 = vadd.f32 %v5449_v53, %v2851_v52  ;;  %v4426_v55 = vpop.f32.mrb[19].mxu0  ;;  %v5703_v52 = vpack.c.bf16 %v1279_v51, %v1276_v49 }
0x1e9d   :  { %2862 = vrot.lane.b32.xlu1 %v2852_v54, %s5051_s13  ;;  %v3891_v56 = vmul.f32 -1.442695, %v2852_v54  ;;  %4613 = vmatpush1.bf16.msra.mxu1 %v5703_v52 }
0x1e9e   :  { %4614 = vmatprep.subr.bf16.mxu1 %v5048_v3 }
0x1e9f   :  { %4897 = vpow2.f32 %v3891_v56 }
0x1ea9   :  { %v4898_v57 = vpop.eup %4897 }
0x1eaa   :  { %v2858_v58 = vadd.f32 1.0, %v4898_v57 }
0x1eac   :  { %4899 = vrcp.f32 %v2858_v58 }
0x1eb6   :  { %v4900_v59 = vpop.eup %4899 }
0x1eb7   :  { %v2872_v2 = vsub.f32 1.0, %v4900_v59  ;;  %v2878_v7 = vmul.f32 %v4900_v59, %v5600_v50 }
0x1f0f   :  { %v2863_v60 = vpop.permute.xlu1 %2862 }
0x1f10   :  { %v2865_v62 = vmul.f32 %v4900_v59, %v2863_v60  ;;  %v1272_v60 = vld [vmem:[%s6338_s9 + $0x10] sm:$0xff] }
0x1f12   :  { %2867 = vrot.lane.b32.xlu0 %v2865_v62, %s5052_s14 }
0x1f84   :  { %v2868_v63 = vpop.permute.xlu0 %2867 }
0x1f85   :  { %v2870_v0 = vadd.f32 %v2868_v63, %v2852_v54 }
0x1f87   :  { %4901 = vtanh.f32 %v2870_v0 }
0x1f91   :  { %v4902_v1 = vpop.eup %4901 }
0x1f92   :  { %2874 = vrot.lane.b32.xlu1 %v4902_v1, %s5053_s5  ;;  %v1281_v1 = vld [vmem:[%s6338_s9 + $0x58] sm:$0xff] }
0x2004   :  { %v2875_v8 = vpop.permute.xlu1 %2874 }
0x2005   :  { %v2877_v9 = vmul.f32 %v2875_v8, %v2872_v2  ;;  %v5054_v8 = vmov 0  }
0x2006   :  { %4817 = vset.pattern.permute.xlu0 %v5054_v8  ;;  %4818 = vset.pattern.permute.xlu1 %v5054_v8 }
0x2007   :  { %v5633_v12 = vadd.f32 %v2878_v7, %v2877_v9 }
0x2009   :  { %v3097_v15 = vsel %vm91_vm2, %v3096_v11, %v5633_v12 }
0x200a   :  { %4455 = vmatmul.mubr.msk.f32.vlgmr.msra.gmra.mrb[20].mxu0 %vm108_vm3, %v3097_v15  ;;  %v1282_v15 = vld [vmem:[%s6339_s10] sm:$0x7]  ;;  %s3916_s10 = sld [smem:[#allocation7 + $0x380]] }
0x200b   :  { %4778 = vmatpush3.bf16.msra.mxu0 %v5386_v17  ;;  %4484 = vmatprep.mubr.msk.f32.mxu0 %vm5049_vm0, %v5050_v6 }
0x200c   :  { %4779 = vmatprep.subr.bf16.mxu0 %v5048_v3 }
0x200f   :  { %4781 = vmatpush3.bf16.msra.mxu0 %v5392_v20 }
0x2010   :  { %4782 = vmatprep.subr.bf16.mxu0 %v5048_v3 }
0x2013   :  { %4784 = vmatpush3.bf16.msra.mxu0 %v5403_v25 }
0x2014   :  { %4785 = vmatprep.subr.bf16.mxu0 %v5048_v3 }
0x2017   :  { %4787 = vmatpush3.bf16.msra.mxu0 %v5413_v28 }
0x20dd   :  { %v3167_v13 = vpop.f32.mrb[20].mxu0 }
0x20de   :  { %v3168_v14 = vadd.f32 %v5449_v53, %v3167_v13  ;;  %v4456_v18 = vpop.f32.mrb[21].mxu0  ;;  %v5815_v13 = vrot.slane %v1282_v15, %v1152_v33 }
0x20e0   :  { %3178 = vrot.lane.b32.xlu0 %v3168_v14, %s5051_s13  ;;  %v3902_v17 = vmul.f32 -1.442695, %v3168_v14 }
0x20e2   :  { %4903 = vpow2.f32 %v3902_v17  ;;  %v1294_v17 = vsub.s32 2, %v5421_v31 }
0x20ec   :  { %v4904_v16 = vpop.eup %4903 }
0x20ed   :  { %v3174_v19 = vadd.f32 1.0, %v4904_v16 }
0x20ef   :  { %4905 = vrcp.f32 %v3174_v19 }
0x20f9   :  { %v4906_v20 = vpop.eup %4905 }
0x20fa   :  { %v3188_v26 = vsub.f32 1.0, %v4906_v20  ;;  %v3194_v34 = vmul.f32 %v4906_v20, %v5633_v12 }
0x2152   :  { %v3179_v21 = vpop.permute.xlu0 %3178 }
0x2153   :  { %v3181_v22 = vmul.f32 %v4906_v20, %v3179_v21  ;;  %v5826_v21 = vrot.slane %v1282_v15, %v1294_v17 }
0x2155   :  { %3183 = vrot.lane.b32.xlu1 %v3181_v22, %s5052_s14 }
0x21c7   :  { %v3184_v25 = vpop.permute.xlu1 %3183 }
0x21c8   :  { %v3186_v24 = vadd.f32 %v3184_v25, %v3168_v14 }
0x21ca   :  { %4907 = vtanh.f32 %v3186_v24 }
0x21d4   :  { %v4908_v28 = vpop.eup %4907 }
0x21d5   :  { %3190 = vrot.lane.b32.xlu0 %v4908_v28, %s5053_s5 }
0x2247   :  { %v3191_v32 = vpop.permute.xlu0 %3190 }
0x2248   :  { %v3193_v35 = vmul.f32 %v3191_v32, %v3188_v26 }
0x224a   :  { %v5665_v37 = vadd.f32 %v3194_v34, %v3193_v35 }
0x224c   :  { %v3413_v38 = vsel %vm91_vm2, %v3412_v36, %v5665_v37  ;;  %v1473_v36 = vstv %s5455_s8 }
0x224d   :  { %4485 = vmatmul.mubr.msk.f32.vlgmr.msra.gmra.mrb[22].mxu0 %vm108_vm3, %v3413_v38  ;;  %v1475_v38 = vstv %s5457_s22 }
0x224e   :  { %v5843_v42 = vsel %vm89_vm1, %v1473_v36, %v1475_v38 }
0x224f   :  { %vm1499_vm8 = vcmp.ne.s32.totalorder %v5843_v42, 258 }
0x2320   :  { %v3483_v54 = vpop.f32.mrb[22].mxu0 }
0x2321   :  { %v3484_v55 = vadd.f32 %v5449_v53, %v3483_v54  ;;  %v4486_v56 = vpop.f32.mrb[23].mxu0  ;;  %v1275_v53 = vld [vmem:[%s6338_s9 + $0x28] sm:$0xff] }
0x2322   :  { %v5722_v0 = vpack.c.bf16 %v1275_v53, %v1272_v60 }
0x2323   :  { %3494 = vrot.lane.b32.xlu1 %v3484_v55, %s5051_s13  ;;  %v3913_v57 = vmul.f32 -1.442695, %v3484_v55 }
0x2325   :  { %4909 = vpow2.f32 %v3913_v57 }
0x2327   :  { %1300 = vrot.lane.b32.xlu1 %v5468_v10, %s5053_s5 }
0x232b   :  { %1933 = vrot.lane.b32.xlu1 %v5534_v61, %s5053_s5  ;;  %v1278_v61 = vld [vmem:[%s6338_s9 + $0x40] sm:$0xff] }
0x232c   :  { %v5733_v5 = vpack.c.bf16 %v1281_v1, %v1278_v61  ;;  %v5903_v61 = vand.u32 127, %v1143_v30 }
0x232e   :  { %v5915_v30 = vadd.s32 128, %v5903_v61 }
0x232f   :  { %v4910_v58 = vpop.eup %4909 }
0x2330   :  { %v3490_v59 = vadd.f32 1.0, %v4910_v58 }
0x2332   :  { %4911 = vrcp.f32 %v3490_v59 }
0x233c   :  { %v5719_v62 = vpop.eup %4911 }
0x233d   :  { %v3504_v29 = vsub.f32 1.0, %v5719_v62  ;;  %v3510_v34 = vmul.f32 %v5719_v62, %v5665_v37 }
0x2395   :  { %v3495_v63 = vpop.permute.xlu1 %3494 }
0x2396   :  { %v3497_v10 = vmul.f32 %v5719_v62, %v3495_v63 }
0x2398   :  { %3499 = vrot.lane.b32.xlu0 %v3497_v10, %s5052_s14 }
0x2399   :  { %v1301_v2 = vpop.permute.xlu1 %1300 }
0x239a   :  { %3838 = vmatmul.mubr.msk.f32.vlgmr.msra.gmra.mrb[8].mxu1 %vm91_vm2, %v1301_v2 }
0x239b   :  { %4616 = vmatpush3.bf16.msra.mxu1 %v5722_v0  ;;  %4285 = vmatprep.mubr.msk.f32.mxu1 %vm5049_vm0, %v5050_v6 }
0x239c   :  { %1617 = vrot.lane.b32.xlu0 %v5501_v39, %s5053_s5  ;;  %4617 = vmatprep.subr.bf16.mxu1 %v5048_v3 }
0x239d   :  { %v1934_v7 = vpop.permute.xlu1 %1933 }
0x239f   :  { %4619 = vmatpush3.bf16.msra.mxu1 %v5733_v5 }
0x23a0   :  { %2249 = vrot.lane.b32.xlu0 %v5567_v23, %s5053_s5  ;;  %4633 = vmatprep.subr.bf16.mxu1 %v5679_v43 }
0x23a2   :  { %4286 = vmatmul.mubr.msk.f32.vlgmr.msra.gmra.mrb[10].mxu1 %vm91_vm2, %v1301_v2 }
0x23a3   :  { %4635 = vmatpush1.bf16.msra.mxu1 %v5690_v47  ;;  %1685 = vmatprep.mubr.f32.mxu1 %v5050_v6 }
0x23a4   :  { %2565 = vrot.lane.b32.xlu0 %v5600_v50, %s5053_s5  ;;  %4637 = vmatprep.subr.bf16.mxu1 %v5692_v48 }
0x23a7   :  { %4639 = vmatpush1.bf16.msra.mxu1 %v5703_v52 }
0x23a8   :  { %3197 = vrot.lane.b32.xlu0 %v5665_v37, %s5053_s5  ;;  %4640 = vmatprep.subr.bf16.mxu1 %v5048_v3 }
0x240a   :  { %v3500_v39 = vpop.permute.xlu0 %3499 }
0x240b   :  { %v3502_v23 = vadd.f32 %v3500_v39, %v3484_v55 }
0x240d   :  { %4913 = vtanh.f32 %v3502_v23 }
0x240e   :  { %v1618_v4 = vpop.permute.xlu0 %1617 }
0x240f   :  { %3848 = vmatmul.mubr.msk.f32.vlgmr.msra.gmra.mrb[12].mxu1 %vm91_vm2, %v1618_v4 }
0x2410   :  { %4642 = vmatpush3.bf16.msra.mxu1 %v5722_v0  ;;  %4315 = vmatprep.mubr.msk.f32.mxu1 %vm5049_vm0, %v5050_v6 }
0x2411   :  { %4643 = vmatprep.subr.bf16.mxu1 %v5048_v3 }
0x2412   :  { %v2250_v9 = vpop.permute.xlu0 %2249 }
0x2414   :  { %4645 = vmatpush3.bf16.msra.mxu1 %v5733_v5 }
0x2415   :  { %4659 = vmatprep.subr.bf16.mxu1 %v5679_v43 }
0x2416   :  { %v2566_v11 = vpop.permute.xlu0 %2565 }
0x2417   :  { %v4914_v50 = vpop.eup %4913  ;;  %4316 = vmatmul.mubr.msk.f32.vlgmr.msra.gmra.mrb[14].mxu1 %vm91_vm2, %v1618_v4 }
0x2418   :  { %4661 = vmatpush1.bf16.msra.mxu1 %v5690_v47  ;;  %3506 = vrot.lane.b32.xlu1 %v4914_v50, %s5053_s5  ;;  %v5918_v50 = vadd.s32 256, %v5903_v61 }
0x2419   :  { %4663 = vmatprep.subr.bf16.mxu1 %v5692_v48  ;;  %2001 = vmatprep.mubr.f32.mxu1 %v5050_v6 }
0x241a   :  { %v3198_v37 = vpop.permute.xlu0 %3197 }
0x241c   :  { %4665 = vmatpush1.bf16.msra.mxu1 %v5703_v52  ;;  %2881 = vrot.lane.b32.xlu1 %v5633_v12, %s5053_s5  ;;  %v1290_v12 = vsub.s32 1, %v5421_v31 }
0x241d   :  { %4666 = vmatprep.subr.bf16.mxu1 %v5048_v3 }
0x241e   :  { %v5817_v14 = vrot.slane %v1282_v15, %v1290_v12 }
0x241f   :  { %3859 = vmatmul.mubr.msk.f32.vlgmr.msra.gmra.mrb[16].mxu1 %vm91_vm2, %v1934_v7 }
0x2420   :  { %4668 = vmatpush3.bf16.msra.mxu1 %v5722_v0  ;;  %4345 = vmatprep.mubr.msk.f32.mxu1 %vm5049_vm0, %v5050_v6 }
0x2421   :  { %4669 = vmatprep.subr.bf16.mxu1 %v5048_v3 }
0x2424   :  { %4671 = vmatpush3.bf16.msra.mxu1 %v5733_v5 }
0x2425   :  { %4685 = vmatprep.subr.bf16.mxu1 %v5679_v43 }
0x2427   :  { %4346 = vmatmul.mubr.msk.f32.vlgmr.msra.gmra.mrb[18].mxu1 %vm91_vm2, %v1934_v7 }
0x2428   :  { %4687 = vmatpush1.bf16.msra.mxu1 %v5690_v47  ;;  %2317 = vmatprep.mubr.f32.mxu1 %v5050_v6 }
0x2429   :  { %4689 = vmatprep.subr.bf16.mxu1 %v5692_v48 }
0x242c   :  { %4691 = vmatpush1.bf16.msra.mxu1 %v5703_v52 }
0x242d   :  { %4692 = vmatprep.subr.bf16.mxu1 %v5048_v3 }
0x242f   :  { %3870 = vmatmul.mubr.msk.f32.vlgmr.msra.gmra.mrb[20].mxu1 %vm91_vm2, %v2250_v9 }
0x2430   :  { %4694 = vmatpush3.bf16.msra.mxu1 %v5722_v0  ;;  %4375 = vmatprep.mubr.msk.f32.mxu1 %vm5049_vm0, %v5050_v6 }
0x2431   :  { %4695 = vmatprep.subr.bf16.mxu1 %v5048_v3 }
0x2434   :  { %4697 = vmatpush3.bf16.msra.mxu1 %v5733_v5 }
0x2435   :  { %4711 = vmatprep.subr.bf16.mxu1 %v5679_v43 }
0x2437   :  { %4376 = vmatmul.mubr.msk.f32.vlgmr.msra.gmra.mrb[22].mxu1 %vm91_vm2, %v2250_v9 }
0x2438   :  { %4713 = vmatpush1.bf16.msra.mxu1 %v5690_v47  ;;  %2633 = vmatprep.mubr.f32.mxu1 %v5050_v6 }
0x2439   :  { %4715 = vmatprep.subr.bf16.mxu1 %v5692_v48 }
0x243c   :  { %4717 = vmatpush1.bf16.msra.mxu1 %v5703_v52 }
0x243d   :  { %4718 = vmatprep.subr.bf16.mxu1 %v5048_v3 }
0x243f   :  { %3881 = vmatmul.mubr.msk.f32.vlgmr.msra.gmra.mrb[24].mxu1 %vm91_vm2, %v2566_v11 }
0x2440   :  { %4720 = vmatpush3.bf16.msra.mxu1 %v5722_v0  ;;  %4405 = vmatprep.mubr.msk.f32.mxu1 %vm5049_vm0, %v5050_v6 }
0x2441   :  { %4721 = vmatprep.subr.bf16.mxu1 %v5048_v3 }
0x2444   :  { %4723 = vmatpush3.bf16.msra.mxu1 %v5733_v5 }
0x2445   :  { %4737 = vmatprep.subr.bf16.mxu1 %v5679_v43 }
0x2447   :  { %4406 = vmatmul.mubr.msk.f32.vlgmr.msra.gmra.mrb[26].mxu1 %vm91_vm2, %v2566_v11 }
0x2448   :  { %4739 = vmatpush1.bf16.msra.mxu1 %v5690_v47  ;;  %2949 = vmatprep.mubr.f32.mxu1 %v5050_v6 }
0x2449   :  { %4741 = vmatprep.subr.bf16.mxu1 %v5692_v48 }
0x244c   :  { %4743 = vmatpush1.bf16.msra.mxu1 %v5703_v52 }
0x244d   :  { %4744 = vmatprep.subr.bf16.mxu1 %v5048_v3 }
0x246d   :  { %v1370_v18 = vpop.f32.mrb[8].mxu1 }
0x246e   :  { %v1372_v16 = vpop.f32.mrb[9].mxu1  ;;  %v5821_v19 = vadd.f32 %v1370_v18, %v5815_v13 }
0x246f   :  { %v5824_v20 = vadd.f32 %v1372_v16, %v5817_v14 }
0x2470   :  { %v1446_v33 = vsel %vm1445_vm4, %v5821_v19, -inf }
0x2471   :  { %v1447_v22 = vsel %vm1445_vm4, %v5824_v20, -inf }
0x2472   :  { %v1449_v28 = vmax.f32 %v1446_v33, %v1447_v22 }
0x2475   :  { %v1441_v25 = vpop.f32.mrb[10].mxu1 }
0x2476   :  { %v5833_v31 = vadd.f32 %v1441_v25, %v5826_v21  ;;  %v4287_v24 = vpop.f32.mrb[11].mxu1 }
0x2478   :  { %v1448_v26 = vsel %vm1445_vm4, %v5833_v31, -inf }
0x2479   :  { %v1450_v27 = vmax.f32 %v1449_v28, %v1448_v26 }
0x247b   :  { %1451 = vmax.xlane.f32.xlu0 %v1450_v27 }
0x248a   :  { %v3507_v32 = vpop.permute.xlu1 %3506 }
0x248b   :  { %v3509_v35 = vmul.f32 %v3507_v32, %v3504_v29 }
0x248d   :  { %v3511_v40 = vadd.f32 %v3510_v34, %v3509_v35 }
0x248e   :  { %v2882_v41 = vpop.permute.xlu1 %2881 }
0x248f   :  { %3513 = vrot.lane.b32.xlu1 %v3511_v40, %s5053_s5  ;;  %3892 = vmatmul.mubr.msk.f32.vlgmr.msra.gmra.mrb[28].mxu1 %vm91_vm2, %v2882_v41  ;;  %s3917_s5 = sld [smem:[#allocation7 + $0x381]] }
0x2490   :  { %4746 = vmatpush3.bf16.msra.mxu1 %v5722_v0  ;;  %4435 = vmatprep.mubr.msk.f32.mxu1 %vm5049_vm0, %v5050_v6 }
0x2491   :  { %1478 = vperm.xlu0 %4817, %v5843_v42   ;;  %4747 = vmatprep.subr.bf16.mxu1 %v5048_v3 }
0x2494   :  { %4749 = vmatpush3.bf16.msra.mxu1 %v5733_v5 }
0x2495   :  { %4763 = vmatprep.subr.bf16.mxu1 %v5679_v43 }
0x2497   :  { %4436 = vmatmul.mubr.msk.f32.vlgmr.msra.gmra.mrb[30].mxu1 %vm91_vm2, %v2882_v41 }
0x2498   :  { %4765 = vmatpush1.bf16.msra.mxu1 %v5690_v47  ;;  %3265 = vmatprep.mubr.f32.mxu1 %v5050_v6 }
0x2499   :  { %4767 = vmatprep.subr.bf16.mxu1 %v5692_v48 }
0x249c   :  { %4769 = vmatpush1.bf16.msra.mxu1 %v5703_v52 }
0x249d   :  { %4770 = vmatprep.subr.bf16.mxu1 %v5048_v3 }
0x249f   :  { %3903 = vmatmul.mubr.msk.f32.vlgmr.msra.gmra.mrb[32].mxu1 %vm91_vm2, %v3198_v37 }
0x24a0   :  { %4772 = vmatpush3.bf16.msra.mxu1 %v5722_v0  ;;  %4465 = vmatprep.mubr.msk.f32.mxu1 %vm5049_vm0, %v5050_v6 }
0x24a1   :  { %4773 = vmatprep.subr.bf16.mxu1 %v5048_v3 }
0x24a4   :  { %4775 = vmatpush3.bf16.msra.mxu1 %v5733_v5 }
0x24a5   :  { %4789 = vmatprep.subr.bf16.mxu1 %v5679_v43 }
0x24a7   :  { %4466 = vmatmul.mubr.msk.f32.vlgmr.msra.gmra.mrb[34].mxu1 %vm91_vm2, %v3198_v37 }
0x24a8   :  { %4791 = vmatpush1.bf16.msra.mxu1 %v5690_v47  ;;  %3581 = vmatprep.mubr.f32.mxu1 %v5050_v6 }
0x24a9   :  { %4793 = vmatprep.subr.bf16.mxu1 %v5692_v48 }
0x24ac   :  { %4795 = vmatpush1.bf16.msra.mxu1 %v5703_v52 }
0x24ad   :  { %4796 = vmatprep.subr.bf16.mxu1 %v5048_v3 }
0x24e2   :  { %v1687_v44 = vpop.f32.mrb[12].mxu1 }
0x24e3   :  { %v1689_v45 = vpop.f32.mrb[13].mxu1 }
0x24ea   :  { %v5873_v46 = vpop.f32.mrb[14].mxu1 }
0x24eb   :  { %v4317_v49 = vpop.f32.mrb[15].mxu1  ;;  %v5948_v40 = vadd.f32 %v5873_v46, %v5826_v21 }
0x24ed   :  { %v1764_v49 = vsel %vm1445_vm4, %v5948_v40, -inf }
0x24f2   :  { %v2003_v51 = vpop.f32.mrb[16].mxu1 }
0x24f3   :  { %v2005_v54 = vpop.f32.mrb[17].mxu1  ;;  %v5876_v43 = vadd.f32 %v2003_v51, %v5815_v13 }
0x24f4   :  { %v5879_v47 = vadd.f32 %v2005_v54, %v5817_v14 }
0x24f5   :  { %v2078_v48 = vsel %vm1445_vm4, %v5876_v43, -inf }
0x24f6   :  { %v2079_v52 = vsel %vm1445_vm4, %v5879_v47, -inf }
0x24f7   :  { %v2081_v58 = vmax.f32 %v2078_v48, %v2079_v52 }
0x24fa   :  { %v2074_v55 = vpop.f32.mrb[18].mxu1 }
0x24fb   :  { %v5886_v56 = vadd.f32 %v2074_v55, %v5826_v21  ;;  %v4347_v57 = vpop.f32.mrb[19].mxu1 }
0x24fd   :  { %v2080_v59 = vsel %vm1445_vm4, %v5886_v56, -inf }
0x24fe   :  { %v2082_v60 = vmax.f32 %v2081_v58, %v2080_v59 }
0x2500   :  { %2083 = vmax.xlane.f32.xlu0 %v2082_v60 }
0x2501   :  { %v3514_v53 = vpop.permute.xlu1 %3513 }
0x2502   :  { %v5890_v62 = vpop.f32.mrb[20].mxu1  ;;  %3914 = vmatmul.mubr.msk.f32.vlgmr.msra.gmra.mrb[36].mxu1 %vm91_vm2, %v3514_v53 }
0x2503   :  { %v5893_v63 = vpop.f32.mrb[21].mxu1  ;;  %4798 = vmatpush3.bf16.msra.mxu1 %v5722_v0  ;;  %4495 = vmatprep.mubr.msk.f32.mxu1 %vm5049_vm0, %v5050_v6 }
0x2504   :  { %4799 = vmatprep.subr.bf16.mxu1 %v5048_v3 }
0x2507   :  { %4801 = vmatpush3.bf16.msra.mxu1 %v5733_v5 }
0x2508   :  { %v5900_v10 = vpop.xlane.xlu0 %1451 }
0x2509   :  { %v1453_v1 = vsub.f32 %v5821_v19, %v5900_v10  ;;  %v1454_v2 = vsub.f32 %v5824_v20, %v5900_v10  ;;  %v1455_v0 = vsub.f32 %v5833_v31, %v5900_v10 }
0x250a   :  { %v5911_v39 = vpop.f32.mrb[22].mxu1  ;;  %4496 = vmatmul.mubr.msk.f32.vlgmr.msra.gmra.mrb[38].mxu1 %vm91_vm2, %v3514_v53 }
0x250b   :  { %v1456_v3 = vmul.f32 1.442695, %v1453_v1  ;;  %v1458_v5 = vmul.f32 1.442695, %v1454_v2  ;;  %v1460_v23 = vmul.f32 1.442695, %v1455_v0 }
0x250c   :  { %v4377_v4 = vpop.f32.mrb[23].mxu1 }
0x250d   :  { %4915 = vpow2.f32 %v1456_v3 }
0x250e   :  { %4917 = vpow2.f32 %v1458_v5 }
0x250f   :  { %4919 = vpow2.f32 %v1460_v23 }
0x2510   :  { %v1479_v8 = vpop.permute.xlu0 %1478 }
0x2511   :  { %vm1480_vm5 = vcmp.eq.s32.totalorder %v5903_v61, %v1479_v8  ;;  %vm1481_vm6 = vcmp.eq.s32.totalorder %v5915_v30, %v1479_v8  ;;  %vm1482_vm7 = vcmp.eq.s32.totalorder %v5918_v50, %v1479_v8 }
0x2512   :  { %v3841_v7 = vsel %vm1480_vm5, 1.0, %v5050_v6  ;;  %v3842_v9 = vsel %vm1481_vm6, 1.0, %v5050_v6  ;;  %v5924_v11 = vpop.f32.mrb[24].mxu1  ;;  %v3843_v33 = vsel %vm1482_vm7, 1.0, %v5050_v6 }
0x2513   :  { %v5926_v12 = vpop.f32.mrb[25].mxu1  ;;  %v1489_v15 = vmul.f32 %v3841_v7, %v5821_v19  ;;  %v1490_v18 = vmul.f32 %v3842_v9, %v5824_v20  ;;  %v5939_v19 = vadd.f32 %v1687_v44, %v5815_v13  ;;  %v5942_v20 = vadd.f32 %v1689_v45, %v5817_v14 }
0x2514   :  { %v1491_v35 = vmul.f32 %v3843_v33, %v5833_v31 }
0x2515   :  { %v1492_v28 = vsel %vm1445_vm4, %v1489_v15, 0.0  ;;  %v1493_v26 = vsel %vm1445_vm4, %v1490_v18, 0.0  ;;  %v1762_v37 = vsel %vm1445_vm4, %v5939_v19, -inf  ;;  %v1763_v44 = vsel %vm1445_vm4, %v5942_v20, -inf }
0x2516   :  { %v1494_v38 = vadd.f32 %v1493_v26, %v1492_v28  ;;  %v1495_v41 = vsel %vm1445_vm4, %v1491_v35, 0.0  ;;  %v1765_v31 = vmax.f32 %v1762_v37, %v1763_v44  ;;  %v5980_v15 = vsel %vm1499_vm8, 1.0, %v5050_v6 }
0x2517   :  { %v4916_v17 = vpop.eup %4915  ;;  %v1789_v26 = vstv %s5487_s27  ;;  %s5055_s27 = smov [#allocation8]  }
0x2518   :  { %v4918_v16 = vpop.eup %4917  ;;  %v1462_v22 = vsel %vm1445_vm4, %v4916_v17, 0.0  ;;  %v1496_v45 = vadd.f32 %v1495_v41, %v1494_v38  ;;  %v1766_v51 = vmax.f32 %v1765_v31, %v1764_v49 }
0x2519   :  { %v4920_v25 = vpop.eup %4919  ;;  %v1463_v24 = vsel %vm1445_vm4, %v4918_v16, 0.0 }
0x251a   :  { %v5936_v27 = vpop.f32.mrb[26].mxu1  ;;  %v1464_v29 = vadd.f32 %v1463_v24, %v1462_v22  ;;  %v1465_v34 = vsel %vm1445_vm4, %v4920_v25, 0.0 }
0x251b   :  { %v4407_v32 = vpop.f32.mrb[27].mxu1 }
0x251c   :  { %v1466_v36 = vadd.f32 %v1465_v34, %v1464_v29  ;;  %v1791_v29 = vstv %s5489_s28  ;;  %s3753_s28 = sshll.u32 %s5055_s27, 4  ;;  %s3754_s28 = int_to_ptr.vmem [resolvable:$true] %s3753_s28 }
0x251d   :  { %v1792_v35 = vsel %vm89_vm1, %v1789_v26, %v1791_v29  ;;  %p5022_p4 = scmp.lt.s32.totalorder %s3754_s28, %s3754_s28 }
0x251e   :  { %1467 = vadd.xlane.f32.xlu1 %v1466_v36  ;;  %vm1815_vm12 = vcmp.ne.s32.totalorder %v1792_v35, 258 }
0x2522   :  { %1497 = vadd.xlane.f32.xlu1 %v1496_v45 }
0x2526   :  { %1767 = vmax.xlane.f32.xlu1 %v1766_v51 }
0x2562   :  { %v5957_v54 = vpop.f32.mrb[28].mxu1 }
0x2563   :  { %v5959_v46 = vpop.f32.mrb[29].mxu1 }
0x256a   :  { %v5961_v48 = vpop.f32.mrb[30].mxu1 }
0x256b   :  { %v4437_v52 = vpop.f32.mrb[31].mxu1 }
0x2572   :  { %v5963_v55 = vpop.f32.mrb[32].mxu1 }
0x2573   :  { %v5965_v57 = vpop.f32.mrb[33].mxu1 }
0x257a   :  { %v5967_v58 = vpop.f32.mrb[34].mxu1 }
0x257b   :  { %v4467_v59 = vpop.f32.mrb[35].mxu1 }
0x258d   :  { %v5997_v41 = vpop.xlane.xlu0 %2083 }
0x258e   :  { %v2085_v37 = vsub.f32 %v5876_v43, %v5997_v41  ;;  %v2086_v44 = vsub.f32 %v5879_v47, %v5997_v41  ;;  %v2087_v31 = vsub.f32 %v5886_v56, %v5997_v41 }
0x2590   :  { %v2088_v45 = vmul.f32 1.442695, %v2085_v37  ;;  %v2090_v49 = vmul.f32 1.442695, %v2086_v44  ;;  %v2092_v51 = vmul.f32 1.442695, %v2087_v31 }
0x25ab   :  { %v1468_v60 = vpop.xlane.xlu1 %1467 }
0x25ac   :  { %4921 = vlog2.f32 %v1468_v60 }
0x25af   :  { %v1498_v53 = vpop.xlane.xlu1 %1497 }
0x25b3   :  { %v5969_v1 = vpop.xlane.xlu1 %1767 }
0x25b4   :  { %v1769_v2 = vsub.f32 %v5939_v19, %v5969_v1  ;;  %v1770_v0 = vsub.f32 %v5942_v20, %v5969_v1  ;;  %v1771_v3 = vsub.f32 %v5948_v40, %v5969_v1 }
0x25b6   :  { %v4922_v5 = vpop.eup %4921  ;;  %v1772_v23 = vmul.f32 1.442695, %v1769_v2  ;;  %v1774_v4 = vmul.f32 1.442695, %v1770_v0  ;;  %v1776_v8 = vmul.f32 1.442695, %v1771_v3 }
0x25b7   :  { %v1470_v7 = vmul.f32 0.6931472, %v4922_v5 }
0x25b8   :  { %4923 = vpow2.f32 %v1772_v23 }
0x25b9   :  { %v1471_v9 = vadd.f32 %v1470_v7, %v5900_v10  ;;  %4925 = vpow2.f32 %v1774_v4 }
0x25ba   :  { %4927 = vpow2.f32 %v1776_v8 }
0x25bb   :  { %v1502_v18 = vsub.f32 %v1498_v53, %v1471_v9  ;;  %4929 = vpow2.f32 %v2088_v45 }
0x25bc   :  { %4931 = vpow2.f32 %v2090_v49 }
0x25bd   :  { %v5983_v17 = vmul.f32 %v5980_v15, %v1502_v18  ;;  %4933 = vpow2.f32 %v2092_v51 }
0x25c2   :  { %v4924_v16 = vpop.eup %4923 }
0x25c3   :  { %v4926_v33 = vpop.eup %4925  ;;  %v1778_v22 = vsel %vm1445_vm4, %v4924_v16, 0.0 }
0x25c4   :  { %v4928_v42 = vpop.eup %4927  ;;  %v1779_v25 = vsel %vm1445_vm4, %v4926_v33, 0.0 }
0x25c5   :  { %v1780_v24 = vadd.f32 %v1779_v25, %v1778_v22  ;;  %v1781_v10 = vsel %vm1445_vm4, %v4928_v42, 0.0  ;;  %v4930_v60 = vpop.eup %4929 }
0x25c6   :  { %v4932_v53 = vpop.eup %4931  ;;  %v2094_v9 = vsel %vm1445_vm4, %v4930_v60, 0.0 }
0x25c7   :  { %v1782_v28 = vadd.f32 %v1781_v10, %v1780_v24  ;;  %v2095_v18 = vsel %vm1445_vm4, %v4932_v53, 0.0  ;;  %v4934_v22 = vpop.eup %4933  ;;  %v2107_v24 = vstv %s5522_s19  ;;  %s5021_s19 = scalar_lea.vmem %s3754_s28, 32 }
0x25c9   :  { %1783 = vadd.xlane.f32.xlu1 %v1782_v28 }
0x25d5   :  { %v5990_v32 = vpop.f32.mrb[36].mxu1 }
0x25d6   :  { %v5992_v34 = vpop.f32.mrb[37].mxu1 }
0x25da   :  { %1794 = vperm.xlu1 %4818, %v1792_v35  }
0x25dd   :  { %v5995_v36 = vpop.f32.mrb[38].mxu1 }
0x25de   :  { %v4497_v38 = vpop.f32.mrb[39].mxu1 }
0x25df   :  { %v6025_v38 = vsel %vm1815_vm12, 1.0, %v5050_v6 }
0x2656   :  { %v1784_v52 = vpop.xlane.xlu1 %1783 }
0x2657   :  { %4935 = vlog2.f32 %v1784_v52 }
0x265a   :  { %v1795_v59 = vpop.permute.xlu1 %1794 }
0x265b   :  { %vm1796_vm9 = vcmp.eq.s32.totalorder %v5903_v61, %v1795_v59  ;;  %vm1797_vm10 = vcmp.eq.s32.totalorder %v5915_v30, %v1795_v59  ;;  %vm1798_vm11 = vcmp.eq.s32.totalorder %v5918_v50, %v1795_v59 }
0x265c   :  { %v3852_v2 = vsel %vm1796_vm9, 1.0, %v5050_v6  ;;  %v3853_v0 = vsel %vm1797_vm10, 1.0, %v5050_v6  ;;  %v3854_v3 = vsel %vm1798_vm11, 1.0, %v5050_v6 }
0x265d   :  { %v1805_v5 = vmul.f32 %v3852_v2, %v5939_v19  ;;  %v1806_v23 = vmul.f32 %v3853_v0, %v5942_v20  ;;  %v1807_v4 = vmul.f32 %v3854_v3, %v5948_v40  ;;  %v2096_v19 = vadd.f32 %v2095_v18, %v2094_v9 }
0x265e   :  { %v2097_v20 = vsel %vm1445_vm4, %v4934_v22, 0.0  ;;  %v2105_v40 = vstv %s5520_s18  ;;  %s5017_s18 = scalar_lea.vmem %s3754_s28, 16 }
0x265f   :  { %v1808_v8 = vsel %vm1445_vm4, %v1805_v5, 0.0  ;;  %v1809_v7 = vsel %vm1445_vm4, %v1806_v23, 0.0  ;;  %v1811_v33 = vsel %vm1445_vm4, %v1807_v4, 0.0  ;;  %v2098_v25 = vadd.f32 %v2097_v20, %v2096_v19  ;;  %p5018_p3 = scmp.ne.s32.totalorder %s3754_s28, %s5017_s18  ;;  %p5023_p5 = scmp.lt.s32.totalorder %s5021_s19, %s5017_s18 }
0x2660   :  { %v1810_v16 = vadd.f32 %v1809_v7, %v1808_v8  ;;  %v2108_v10 = vsel %vm89_vm1, %v2105_v40, %v2107_v24 }
0x2661   :  { %v4936_v28 = vpop.eup %4935  ;;  %vm2131_vm0 = vcmp.ne.s32.totalorder %v2108_v10, 258  ;;  %p5024_p6 = por %p5023_p5, %p5022_p4 }
0x2662   :  { %v1812_v42 = vadd.f32 %v1811_v33, %v1810_v16  ;;  %v1786_v26 = vmul.f32 0.6931472, %v4936_v28  ;;  %v6061_v18 = vsel %vm2131_vm0, 1.0, %v5050_v6 }
0x2663   :  { %p5025_p7 = pnand %p5024_p6, %p5018_p3 }
0x2664   :  { %1813 = vadd.xlane.f32.xlu1 %v1812_v42  ;;  %v1787_v29 = vadd.f32 %v1786_v26, %v5969_v1  ;;  %v6034_v1 = vadd.f32 %v5890_v62, %v5815_v13  ;;  %v6048_v62 = vadd.f32 %v5911_v39, %v5826_v21 }
0x2668   :  { %2099 = vadd.xlane.f32.xlu1 %v2098_v25 }
0x2679   :  { %2110 = vperm.xlu1 %4818, %v2108_v10  }
0x26f1   :  { %v1814_v37 = vpop.xlane.xlu1 %1813 }
0x26f2   :  { %v1818_v44 = vsub.f32 %v1814_v37, %v1787_v29 }
0x26f4   :  { %v1819_v45 = vmul.f32 %v6025_v38, %v1818_v44 }
0x26f5   :  { %v2100_v49 = vpop.xlane.xlu1 %2099 }
0x26f6   :  { %v1820_v31 = vadd.f32 %v1819_v45, %v5983_v17  ;;  %v6041_v17 = vadd.f32 %v5893_v63, %v5817_v14  ;;  %v2394_v63 = vsel %vm1445_vm4, %v6034_v1, -inf  ;;  %4937 = vlog2.f32 %v2100_v49 }
0x26f9   :  { %v2111_v51 = vpop.permute.xlu1 %2110 }
0x26fa   :  { %vm2112_vm13 = vcmp.eq.s32.totalorder %v5903_v61, %v2111_v51  ;;  %vm2113_vm14 = vcmp.eq.s32.totalorder %v5915_v30, %v2111_v51  ;;  %vm2114_vm15 = vcmp.eq.s32.totalorder %v5918_v50, %v2111_v51  ;;  %v2421_v51 = vstv %s5553_s23 }
0x26fb   :  { %v3863_v35 = vsel %vm2112_vm13, 1.0, %v5050_v6  ;;  %v3864_v52 = vsel %vm2113_vm14, 1.0, %v5050_v6  ;;  %v3865_v59 = vsel %vm2114_vm15, 1.0, %v5050_v6 }
0x26fc   :  { %v2121_v60 = vmul.f32 %v3863_v35, %v5876_v43  ;;  %v2122_v53 = vmul.f32 %v3864_v52, %v5879_v47  ;;  %v2123_v2 = vmul.f32 %v3865_v59, %v5886_v56  ;;  %v2395_v43 = vsel %vm1445_vm4, %v6041_v17, -inf }
0x26fd   :  { %v2396_v56 = vsel %vm1445_vm4, %v6048_v62, -inf  ;;  %v2397_v39 = vmax.f32 %v2394_v63, %v2395_v43  ;;  %v2423_v35 = vstv %s5555_s24  ;;  %v6085_v59 = vadd.f32 %v5924_v11, %v5815_v13 }
0x26fe   :  { %v2124_v0 = vsel %vm1445_vm4, %v2121_v60, 0.0  ;;  %v2125_v3 = vsel %vm1445_vm4, %v2122_v53, 0.0  ;;  %v2127_v23 = vsel %vm1445_vm4, %v2123_v2, 0.0  ;;  %v6080_v52 = vsel %vm89_vm1, %v2421_v51, %v2423_v35 }
0x26ff   :  { %v2126_v5 = vadd.f32 %v2125_v3, %v2124_v0  ;;  %v2398_v4 = vmax.f32 %v2397_v39, %v2396_v56  ;;  %v6089_v60 = vadd.f32 %v5926_v12, %v5817_v14  ;;  %v6093_v53 = vadd.f32 %v5936_v27, %v5826_v21 }
0x2700   :  { %v4938_v8 = vpop.eup %4937  ;;  %v2710_v2 = vsel %vm1445_vm4, %v6085_v59, -inf  ;;  %v2737_v12 = vstv %s5586_s12  ;;  %v3685_v27 = vstv %s3916_s10  ;;  %v3687_v43 = vstv %s3917_s5 }
0x2701   :  { %v2128_v47 = vadd.f32 %v2127_v23, %v2126_v5  ;;  %v2102_v7 = vmul.f32 0.6931472, %v4938_v8  ;;  %v2711_v0 = vsel %vm1445_vm4, %v6089_v60, -inf  ;;  %v2712_v3 = vsel %vm1445_vm4, %v6093_v53, -inf }
0x2702   :  { %v2713_v5 = vmax.f32 %v2710_v2, %v2711_v0  ;;  %v2739_v23 = vstv %s5588_s4  ;;  %vm2447_vm6 = vcmp.ne.s32.totalorder %v6080_v52, 258 }
0x2703   :  { %2129 = vadd.xlane.f32.xlu0 %v2128_v47  ;;  %v2103_v9 = vadd.f32 %v2102_v7, %v5997_v41  ;;  %v6104_v63 = vsel %vm89_vm1, %v2737_v12, %v2739_v23  ;;  %v6108_v47 = vsel %vm89_vm1, %v3685_v27, %v3687_v43 }
0x2704   :  { %v2714_v11 = vmax.f32 %v2713_v5, %v2712_v3 }
0x2707   :  { %2399 = vmax.xlane.f32.xlu0 %v2398_v4  ;;  %v6118_v4 = vadd.f32 %v5957_v54, %v5815_v13  ;;  %v6132_v54 = vadd.f32 %v5961_v48, %v5826_v21 }
0x2790   :  { %v2130_v16 = vpop.xlane.xlu0 %2129 }
0x2791   :  { %v2134_v33 = vsub.f32 %v2130_v16, %v2103_v9  ;;  %v6125_v16 = vadd.f32 %v5959_v46, %v5817_v14  ;;  %v6140_v46 = vadd.f32 %v5963_v55, %v5815_v13 }
0x2793   :  { %v2135_v22 = vmul.f32 %v6061_v18, %v2134_v33  ;;  %v3027_v48 = vsel %vm1445_vm4, %v6125_v16, -inf }
0x2794   :  { %v6064_v42 = vpop.xlane.xlu0 %2399 }
0x2795   :  { %v6066_v19 = vadd.f32 %v2135_v22, %v1820_v31  ;;  %v2401_v20 = vsub.f32 %v6034_v1, %v6064_v42  ;;  %v2402_v25 = vsub.f32 %v6041_v17, %v6064_v42  ;;  %v2403_v41 = vsub.f32 %v6048_v62, %v6064_v42 }
0x2797   :  { %v2404_v40 = vmul.f32 1.442695, %v2401_v20  ;;  %v2406_v24 = vmul.f32 1.442695, %v2402_v25  ;;  %v2408_v10 = vmul.f32 1.442695, %v2403_v41 }
0x2799   :  { %4939 = vpow2.f32 %v2404_v40 }
0x279a   :  { %4941 = vpow2.f32 %v2406_v24  ;;  %v3026_v24 = vsel %vm1445_vm4, %v6118_v4, -inf }
0x279b   :  { %4943 = vpow2.f32 %v2408_v10  ;;  %v6151_v10 = vadd.f32 %v5967_v58, %v5826_v21  ;;  %v3029_v55 = vmax.f32 %v3026_v24, %v3027_v48 }
0x27a3   :  { %v4940_v28 = vpop.eup %4939 }
0x27a4   :  { %v4942_v26 = vpop.eup %4941  ;;  %v2410_v29 = vsel %vm1445_vm4, %v4940_v28, 0.0  ;;  %v3028_v28 = vsel %vm1445_vm4, %v6132_v54, -inf }
0x27a5   :  { %v4944_v37 = vpop.eup %4943  ;;  %v2411_v44 = vsel %vm1445_vm4, %v4942_v26, 0.0  ;;  %v3342_v26 = vsel %vm1445_vm4, %v6140_v46, -inf }
0x27a6   :  { %v2412_v45 = vadd.f32 %v2411_v44, %v2410_v29  ;;  %v2413_v49 = vsel %vm1445_vm4, %v4944_v37, 0.0  ;;  %v3030_v29 = vmax.f32 %v3029_v55, %v3028_v28  ;;  %v3344_v37 = vsel %vm1445_vm4, %v6151_v10, -inf }
0x27a8   :  { %v2414_v31 = vadd.f32 %v2413_v49, %v2412_v45 }
0x27aa   :  { %2415 = vadd.xlane.f32.xlu0 %v2414_v31 }
0x27c0   :  { %2426 = vperm.xlu0 %4817, %v6080_v52  }
0x27df   :  { %2715 = vmax.xlane.f32.xlu0 %v2714_v11 }
0x27f5   :  { %2742 = vperm.xlu0 %4817, %v6104_v63  }
0x27f9   :  { %3690 = vperm.xlu0 %4817, %v6108_v47  }
0x2837   :  { %v6111_v56 = vpop.xlane.xlu0 %2415 }
0x283f   :  { %v2427_v39 = vpop.permute.xlu0 %2426 }
0x2840   :  { %vm2428_vm2 = vcmp.eq.s32.totalorder %v5903_v61, %v2427_v39  ;;  %vm2429_vm3 = vcmp.eq.s32.totalorder %v5915_v30, %v2427_v39  ;;  %vm2430_vm5 = vcmp.eq.s32.totalorder %v5918_v50, %v2427_v39 }
0x2841   :  { %v3874_v8 = vsel %vm2428_vm2, 1.0, %v5050_v6  ;;  %v3875_v7 = vsel %vm2429_vm3, 1.0, %v5050_v6  ;;  %v3876_v9 = vsel %vm2430_vm5, 1.0, %v5050_v6  ;;  %vm2763_vm3 = vcmp.ne.s32.totalorder %v6104_v63, 258 }
0x2842   :  { %v2437_v33 = vmul.f32 %v3874_v8, %v6034_v1  ;;  %v2438_v22 = vmul.f32 %v3875_v7, %v6041_v17  ;;  %v2439_v20 = vmul.f32 %v3876_v9, %v6048_v62  ;;  %v6144_v1 = vadd.f32 %v5965_v57, %v5817_v14 }
0x2843   :  { %v3053_v8 = vstv %s5619_s15  ;;  %v3055_v7 = vstv %s5621_s16 }
0x2844   :  { %v2440_v25 = vsel %vm1445_vm4, %v2437_v33, 0.0  ;;  %v2441_v41 = vsel %vm1445_vm4, %v2438_v22, 0.0  ;;  %v2443_v17 = vsel %vm1445_vm4, %v2439_v20, 0.0  ;;  %v3343_v57 = vsel %vm1445_vm4, %v6144_v1, -inf }
0x2845   :  { %v2442_v40 = vadd.f32 %v2441_v41, %v2440_v25  ;;  %v3345_v44 = vmax.f32 %v3342_v26, %v3343_v57  ;;  %v6175_v9 = vsel %vm89_vm1, %v3053_v8, %v3055_v7  ;;  %v6180_v33 = vadd.f32 %v5990_v32, %v5815_v13 }
0x2846   :  { %v6184_v22 = vadd.f32 %v5992_v34, %v5817_v14  ;;  %v6188_v20 = vadd.f32 %v5995_v36, %v5826_v21  ;;  %v3369_v32 = vstv %s5651_s2  ;;  %vm3079_vm5 = vcmp.ne.s32.totalorder %v6175_v9, 258 }
0x2847   :  { %v2444_v62 = vadd.f32 %v2443_v17, %v2442_v40  ;;  %v3346_v45 = vmax.f32 %v3345_v44, %v3344_v37  ;;  %v3658_v25 = vsel %vm1445_vm4, %v6180_v33, -inf  ;;  %v3371_v17 = vstv %s5653_s17 }
0x2848   :  { %v3659_v41 = vsel %vm1445_vm4, %v6184_v22, -inf  ;;  %v3660_v40 = vsel %vm1445_vm4, %v6188_v20, -inf  ;;  %v6200_v14 = vsel %vm89_vm1, %v3369_v32, %v3371_v17 }
0x2849   :  { %2445 = vadd.xlane.f32.xlu1 %v2444_v62  ;;  %v3661_v24 = vmax.f32 %v3658_v25, %v3659_v41  ;;  %v6206_v62 = vsel %vm2447_vm6, 1.0, %v5050_v6  ;;  %vm3711_vm6 = vcmp.ne.s32.totalorder %v6108_v47, 258 }
0x284a   :  { %v3921_v63 = vsel %vm3711_vm6, 1.0, %v5050_v6 }
0x284b   :  { %v3662_v13 = vmax.f32 %v3661_v24, %v3660_v40 }
0x284d   :  { %3031 = vmax.xlane.f32.xlu1 %v3030_v29 }
0x2851   :  { %3347 = vmax.xlane.f32.xlu1 %v3346_v45 }
0x286c   :  { %v6161_v58 = vpop.xlane.xlu0 %2715 }
0x286d   :  { %v2717_v49 = vsub.f32 %v6085_v59, %v6161_v58  ;;  %v2718_v31 = vsub.f32 %v6089_v60, %v6161_v58  ;;  %v2719_v51 = vsub.f32 %v6093_v53, %v6161_v58 }
0x286f   :  { %v2720_v35 = vmul.f32 1.442695, %v2717_v49  ;;  %v2722_v2 = vmul.f32 1.442695, %v2718_v31  ;;  %v2724_v0 = vmul.f32 1.442695, %v2719_v51 }
0x2871   :  { %4945 = vpow2.f32 %v2720_v35 }
0x2872   :  { %4947 = vpow2.f32 %v2722_v2 }
0x2873   :  { %4949 = vpow2.f32 %v2724_v0 }
0x2874   :  { %4951 = vlog2.f32 %v6111_v56  ;;  %v2743_v36 = vpop.permute.xlu0 %2742 }
0x2875   :  { %vm2744_vm7 = vcmp.eq.s32.totalorder %v5903_v61, %v2743_v36  ;;  %vm2745_vm8 = vcmp.eq.s32.totalorder %v5915_v30, %v2743_v36  ;;  %vm2746_vm1 = vcmp.eq.s32.totalorder %v5918_v50, %v2743_v36 }
0x2876   :  { %v3885_v26 = vsel %vm2744_vm7, 1.0, %v5050_v6  ;;  %v3886_v57 = vsel %vm2745_vm8, 1.0, %v5050_v6  ;;  %vm3718_vm7 = vcmask 1024   ;;  %vm3745_vm8 = vcmask 0  }
0x2877   :  { %v2753_v51 = vmul.f32 %v3885_v26, %v6085_v59  ;;  %v2754_v35 = vmul.f32 %v3886_v57, %v6089_v60  ;;  %v3887_v59 = vsel %vm2746_vm1, 1.0, %v5050_v6 }
0x2879   :  { %v2756_v60 = vsel %vm1445_vm4, %v2753_v51, 0.0 }
0x287b   :  { %v4946_v3 = vpop.eup %4945 }
0x287c   :  { %v4948_v5 = vpop.eup %4947  ;;  %v2726_v11 = vsel %vm1445_vm4, %v4946_v3, 0.0 }
0x287d   :  { %v4950_v12 = vpop.eup %4949  ;;  %v2727_v23 = vsel %vm1445_vm4, %v4948_v5, 0.0 }
0x287e   :  { %v2728_v27 = vadd.f32 %v2727_v23, %v2726_v11  ;;  %v2729_v43 = vsel %vm1445_vm4, %v4950_v12, 0.0  ;;  %v4952_v21 = vpop.eup %4951  ;;  %v2757_v23 = vsel %vm1445_vm4, %v2754_v35, 0.0 }
0x287f   :  { %v2418_v34 = vmul.f32 0.6931472, %v4952_v21 }
0x2880   :  { %v2730_v39 = vadd.f32 %v2729_v43, %v2728_v27  ;;  %v2755_v27 = vmul.f32 %v3887_v59, %v6093_v53  ;;  %v2758_v43 = vadd.f32 %v2757_v23, %v2756_v60 }
0x2881   :  { %v2419_v48 = vadd.f32 %v2418_v34, %v6064_v42 }
0x2882   :  { %2731 = vadd.xlane.f32.xlu1 %v2730_v39  ;;  %v2759_v8 = vsel %vm1445_vm4, %v2755_v27, 0.0 }
0x2883   :  { %v2760_v25 = vadd.f32 %v2759_v8, %v2758_v43 }
0x2893   :  { %3058 = vperm.xlu1 %4818, %v6175_v9  }
0x28b7   :  { %3663 = vmax.xlane.f32.xlu1 %v3662_v13 }
0x28c8   :  { %3374 = vperm.xlu1 %4818, %v6200_v14  }
0x28d6   :  { %v2446_v28 = vpop.xlane.xlu1 %2445 }
0x28d7   :  { %v2450_v56 = vsub.f32 %v2446_v28, %v2419_v48 }
0x28d9   :  { %v2451_v55 = vmul.f32 %v6206_v62, %v2450_v56 }
0x28da   :  { %v6213_v29 = vpop.xlane.xlu1 %3031 }
0x28db   :  { %v6216_v52 = vadd.f32 %v2451_v55, %v6066_v19  ;;  %v3033_v42 = vsub.f32 %v6118_v4, %v6213_v29  ;;  %v3034_v37 = vsub.f32 %v6125_v16, %v6213_v29  ;;  %v3035_v44 = vsub.f32 %v6132_v54, %v6213_v29 }
0x28dd   :  { %v3036_v45 = vmul.f32 1.442695, %v3033_v42  ;;  %v3038_v49 = vmul.f32 1.442695, %v3034_v37  ;;  %v3040_v31 = vmul.f32 1.442695, %v3035_v44 }
0x28de   :  { %v6227_v19 = vpop.xlane.xlu1 %3347 }
0x28df   :  { %4953 = vpow2.f32 %v3036_v45  ;;  %v3349_v2 = vsub.f32 %v6140_v46, %v6227_v19  ;;  %v3350_v0 = vsub.f32 %v6144_v1, %v6227_v19  ;;  %v3351_v3 = vsub.f32 %v6151_v10, %v6227_v19 }
0x28e0   :  { %4955 = vpow2.f32 %v3038_v49 }
0x28e1   :  { %4957 = vpow2.f32 %v3040_v31  ;;  %v3352_v5 = vmul.f32 1.442695, %v3349_v2  ;;  %v3354_v11 = vmul.f32 1.442695, %v3350_v0  ;;  %v3356_v12 = vmul.f32 1.442695, %v3351_v3 }
0x28e3   :  { %4959 = vpow2.f32 %v3352_v5  ;;  %v3691_v5 = vpop.permute.xlu0 %3690 }
0x28e4   :  { %4961 = vpow2.f32 %v3354_v11  ;;  %vm3692_vm12 = vcmp.eq.s32.totalorder %v5903_v61, %v3691_v5  ;;  %vm3693_vm13 = vcmp.eq.s32.totalorder %v5915_v30, %v3691_v5  ;;  %vm3694_vm14 = vcmp.eq.s32.totalorder %v5918_v50, %v3691_v5 }
0x28e5   :  { %4963 = vpow2.f32 %v3356_v12 }
0x28e9   :  { %v4954_v39 = vpop.eup %4953 }
0x28ea   :  { %v4956_v7 = vpop.eup %4955  ;;  %v3042_v41 = vsel %vm1445_vm4, %v4954_v39, 0.0 }
0x28eb   :  { %v4958_v40 = vpop.eup %4957  ;;  %v3043_v24 = vsel %vm1445_vm4, %v4956_v7, 0.0 }
0x28ec   :  { %2761 = vadd.xlane.f32.xlu1 %v2760_v25  ;;  %v3044_v13 = vadd.f32 %v3043_v24, %v3042_v41  ;;  %v3045_v17 = vsel %vm1445_vm4, %v4958_v40, 0.0 }
0x28ed   :  { %v4960_v32 = vpop.eup %4959 }
0x28ee   :  { %v4962_v21 = vpop.eup %4961  ;;  %v3046_v34 = vadd.f32 %v3045_v17, %v3044_v13  ;;  %v3358_v53 = vsel %vm1445_vm4, %v4960_v32, 0.0 }
0x28ef   :  { %v4964_v36 = vpop.eup %4963  ;;  %v3359_v48 = vsel %vm1445_vm4, %v4962_v21, 0.0 }
0x28f0   :  { %3047 = vadd.xlane.f32.xlu0 %v3046_v34  ;;  %v3360_v28 = vadd.f32 %v3359_v48, %v3358_v53  ;;  %v3361_v56 = vsel %vm1445_vm4, %v4964_v36, 0.0 }
0x28f2   :  { %v3362_v55 = vadd.f32 %v3361_v56, %v3360_v28 }
0x28f4   :  { %3363 = vadd.xlane.f32.xlu1 %v3362_v55 }
0x290f   :  { %v6246_v26 = vpop.xlane.xlu1 %2731 }
0x2913   :  { %v3059_v57 = vpop.permute.xlu1 %3058 }
0x2914   :  { %vm3060_vm9 = vcmp.eq.s32.totalorder %v5903_v61, %v3059_v57  ;;  %vm3061_vm10 = vcmp.eq.s32.totalorder %v5915_v30, %v3059_v57  ;;  %vm3062_vm11 = vcmp.eq.s32.totalorder %v5918_v50, %v3059_v57 }
0x2915   :  { %v3896_v42 = vsel %vm3060_vm9, 1.0, %v5050_v6  ;;  %v3897_v37 = vsel %vm3061_vm10, 1.0, %v5050_v6  ;;  %v3898_v44 = vsel %vm3062_vm11, 1.0, %v5050_v6 }
0x2916   :  { %v3069_v45 = vmul.f32 %v3896_v42, %v6118_v4  ;;  %v3070_v49 = vmul.f32 %v3897_v37, %v6125_v16  ;;  %v3071_v31 = vmul.f32 %v3898_v44, %v6132_v54  ;;  %v3918_v4 = vsel %vm3692_vm12, 1.0, %v5050_v6 }
0x2917   :  { %v3919_v16 = vsel %vm3693_vm13, 1.0, %v5050_v6  ;;  %v3701_v43 = vmul.f32 %v3918_v4, %v6180_v33 }
0x2918   :  { %v3072_v51 = vsel %vm1445_vm4, %v3069_v45, 0.0  ;;  %v3073_v35 = vsel %vm1445_vm4, %v3070_v49, 0.0  ;;  %v3075_v0 = vsel %vm1445_vm4, %v3071_v31, 0.0  ;;  %v3702_v39 = vmul.f32 %v3919_v16, %v6184_v22 }
0x2919   :  { %v3074_v2 = vadd.f32 %v3073_v35, %v3072_v51  ;;  %v3704_v13 = vsel %vm1445_vm4, %v3701_v43, 0.0  ;;  %v3888_v45 = vsel %vm2763_vm3, 1.0, %v5050_v6  ;;  %v3899_v31 = vsel %vm3079_vm5, 1.0, %v5050_v6 }
0x291a   :  { %v3705_v32 = vsel %vm1445_vm4, %v3702_v39, 0.0 }
0x291b   :  { %v3076_v3 = vadd.f32 %v3075_v0, %v3074_v2  ;;  %v3706_v34 = vadd.f32 %v3705_v32, %v3704_v13 }
0x291d   :  { %3077 = vadd.xlane.f32.xlu0 %v3076_v3 }
0x2944   :  { %v6263_v11 = vpop.xlane.xlu1 %3663 }
0x2945   :  { %v3665_v54 = vsub.f32 %v6180_v33, %v6263_v11  ;;  %v3666_v12 = vsub.f32 %v6184_v22, %v6263_v11  ;;  %v3667_v59 = vsub.f32 %v6188_v20, %v6263_v11 }
0x2947   :  { %v3668_v60 = vmul.f32 1.442695, %v3665_v54  ;;  %v3670_v23 = vmul.f32 1.442695, %v3666_v12  ;;  %v3672_v27 = vmul.f32 1.442695, %v3667_v59 }
0x2948   :  { %v3375_v8 = vpop.permute.xlu1 %3374 }
0x2949   :  { %4965 = vpow2.f32 %v3668_v60  ;;  %vm3376_vm15 = vcmp.eq.s32.totalorder %v5903_v61, %v3375_v8  ;;  %vm3377_vm0 = vcmp.eq.s32.totalorder %v5915_v30, %v3375_v8  ;;  %vm3378_vm2 = vcmp.eq.s32.totalorder %v5918_v50, %v3375_v8 }
0x294a   :  { %4967 = vpow2.f32 %v3670_v23  ;;  %v3907_v7 = vsel %vm3376_vm15, 1.0, %v5050_v6  ;;  %v3908_v25 = vsel %vm3377_vm0, 1.0, %v5050_v6  ;;  %v3909_v41 = vsel %vm3378_vm2, 1.0, %v5050_v6 }
0x294b   :  { %4969 = vpow2.f32 %v3672_v27  ;;  %v3385_v33 = vmul.f32 %v3907_v7, %v6140_v46  ;;  %v3386_v22 = vmul.f32 %v3908_v25, %v6144_v1  ;;  %v3387_v40 = vmul.f32 %v3909_v41, %v6151_v10 }
0x294c   :  { %v3920_v61 = vsel %vm3694_vm14, 1.0, %v5050_v6  ;;  %4971 = vlog2.f32 %v6246_v26 }
0x294d   :  { %v3388_v30 = vsel %vm1445_vm4, %v3385_v33, 0.0  ;;  %v3389_v24 = vsel %vm1445_vm4, %v3386_v22, 0.0  ;;  %v3391_v21 = vsel %vm1445_vm4, %v3387_v40, 0.0  ;;  %v3703_v46 = vmul.f32 %v3920_v61, %v6188_v20 }
0x294e   :  { %v3390_v17 = vadd.f32 %v3389_v24, %v3388_v30  ;;  %v1821_v20 = vadd.f32 %v6025_v38, %v5980_v15 }
0x294f   :  { %v3707_v50 = vsel %vm1445_vm4, %v3703_v46, 0.0 }
0x2950   :  { %v3392_v1 = vadd.f32 %v3391_v21, %v3390_v17  ;;  %v3708_v36 = vadd.f32 %v3707_v50, %v3706_v34  ;;  %v2137_v37 = vadd.f32 %v6061_v18, %v1821_v20 }
0x2952   :  { %3393 = vadd.xlane.f32.xlu0 %v3392_v1  ;;  %v2453_v44 = vadd.f32 %v6206_v62, %v2137_v37 }
0x2953   :  { %v4966_v10 = vpop.eup %4965 }
0x2954   :  { %v4968_v53 = vpop.eup %4967  ;;  %v3674_v48 = vsel %vm1445_vm4, %v4966_v10, 0.0  ;;  %v2769_v49 = vadd.f32 %v3888_v45, %v2453_v44 }
0x2955   :  { %v4970_v28 = vpop.eup %4969  ;;  %v3675_v56 = vsel %vm1445_vm4, %v4968_v53, 0.0 }
0x2956   :  { %3709 = vadd.xlane.f32.xlu0 %v3708_v36  ;;  %v3676_v55 = vadd.f32 %v3675_v56, %v3674_v48  ;;  %v3677_v57 = vsel %vm1445_vm4, %v4970_v28, 0.0  ;;  %vm3395_vm4 = vcmp.ne.s32.totalorder %v6200_v14, 258  ;;  %v3085_v51 = vadd.f32 %v3899_v31, %v2769_v49  ;;  %v4972_v35 = vpop.eup %4971 }
0x2957   :  { %v3910_v15 = vsel %vm3395_vm4, 1.0, %v5050_v6  ;;  %v2734_v38 = vmul.f32 0.6931472, %v4972_v35 }
0x2958   :  { %v3678_v42 = vadd.f32 %v3677_v57, %v3676_v55  ;;  %v3401_v18 = vadd.f32 %v3910_v15, %v3085_v51 }
0x2959   :  { %v2735_v26 = vadd.f32 %v2734_v38, %v6161_v58 }
0x295a   :  { %3679 = vadd.xlane.f32.xlu1 %v3678_v42  ;;  %v3717_v62 = vadd.f32 %v3921_v63, %v3401_v18 }
0x295c   :  { %v3730_v9 = vsel %vm3718_vm7, %v3717_v62, 0.0 }
0x295d   :  { %3731 = vadd.xlane.f32.xlu0 %v3730_v9 }
0x2979   :  { %v2762_v2 = vpop.xlane.xlu1 %2761 }
0x297a   :  { %v2766_v0 = vsub.f32 %v2762_v2, %v2735_v26 }
0x297c   :  { %v2767_v14 = vmul.f32 %v3888_v45, %v2766_v0 }
0x297d   :  { %v3048_v5 = vpop.xlane.xlu0 %3047 }
0x297e   :  { %v2768_v3 = vadd.f32 %v2767_v14, %v6216_v52  ;;  %4973 = vlog2.f32 %v3048_v5 }
0x2981   :  { %v3364_v47 = vpop.xlane.xlu1 %3363 }
0x2982   :  { %4975 = vlog2.f32 %v3364_v47 }
0x2988   :  { %v4974_v4 = vpop.eup %4973 }
0x2989   :  { %v3050_v6 = vmul.f32 0.6931472, %v4974_v4 }
0x298b   :  { %v3051_v58 = vadd.f32 %v3050_v6, %v6213_v29 }
0x298c   :  { %v4976_v54 = vpop.eup %4975 }
0x298d   :  { %v3366_v59 = vmul.f32 0.6931472, %v4976_v54 }
0x298f   :  { %v3367_v27 = vadd.f32 %v3366_v59, %v6227_v19 }
0x29aa   :  { %v3078_v12 = vpop.xlane.xlu0 %3077 }
0x29ab   :  { %v3082_v23 = vsub.f32 %v3078_v12, %v3051_v58 }
0x29ad   :  { %v3083_v52 = vmul.f32 %v3899_v31, %v3082_v23 }
0x29af   :  { %v3084_v33 = vadd.f32 %v3083_v52, %v2768_v3 }
0x29df   :  { %v3394_v60 = vpop.xlane.xlu0 %3393 }
0x29e0   :  { %v3398_v43 = vsub.f32 %v3394_v60, %v3367_v27 }
0x29e2   :  { %v3399_v7 = vmul.f32 %v3910_v15, %v3398_v43 }
0x29e3   :  { %v3710_v41 = vpop.xlane.xlu0 %3709 }
0x29e4   :  { %v3400_v40 = vadd.f32 %v3399_v7, %v3084_v33 }
0x29e7   :  { %v3680_v16 = vpop.xlane.xlu1 %3679 }
0x29e8   :  { %4977 = vlog2.f32 %v3680_v16 }
0x29ea   :  { %v3732_v29 = vpop.xlane.xlu0 %3731 }
0x29eb   :  { %v3733_v13 = vrot.slane %v3732_v29, 4 }
0x29ed   :  { %v3734_v32 = vadd.f32 %v3733_v13, %v3732_v29 }
0x29ef   :  { %v3735_v19 = vrot.slane %v3734_v32, 2 }
0x29f1   :  { %v3736_v1 = vadd.f32 %v3735_v19, %v3734_v32 }
0x29f2   :  { %v4978_v39 = vpop.eup %4977 }
0x29f3   :  { %v3682_v8 = vmul.f32 0.6931472, %v4978_v39 }
0x29f5   :  { %v3683_v25 = vadd.f32 %v3682_v8, %v6263_v11  ;;  %v3737_v11 = vrot.slane %v3736_v1, 1 }
0x29f7   :  { %v3714_v22 = vsub.f32 %v3710_v41, %v3683_v25  ;;  %v3738_v36 = vadd.f32 %v3737_v11, %v3736_v1 }
0x29f9   :  { %v3715_v61 = vmul.f32 %v3921_v63, %v3714_v22 }
0x29fb   :  { %v3716_v30 = vadd.f32 %v3715_v61, %v3400_v40 }
0x29fd   :  { %v3719_v24 = vsel %vm3718_vm7, %v3716_v30, 0.0 }
0x29fe   :  { %3720 = vadd.xlane.f32.xlu1 %v3719_v24 }
0x2a8b   :  { %v3721_v17 = vpop.xlane.xlu1 %3720 }
0x2a8c   :  { %v3722_v21 = vrot.slane %v3721_v17, 4 }
0x2a8e   :  { %v3723_v46 = vadd.f32 %v3722_v21, %v3721_v17 }
0x2a90   :  { %v3724_v34 = vrot.slane %v3723_v46, 2 }
0x2a92   :  { %v3725_v10 = vadd.f32 %v3724_v34, %v3723_v46 }
0x2a94   :  { %v3726_v50 = vrot.slane %v3725_v10, 1 }
0x2a96   :  { %v3727_v53 = vadd.f32 %v3726_v50, %v3725_v10 }
0x2a98   :  { %4802 = vpush %v3727_v53 }
0x2a99   :  { %4804 = vpush %v3738_v36 }
0x2ac9   :  { %s4803_s8 = spop %4802 }
0x2aca   :  { %s4805_s22 = spop %4804  ;;  %v3729_v56 = vstv %s4803_s8 }
0x2acb   :  { %v3740_v48 = vstv %s4805_s22  ;;  %v3741_v55 = vsub.f32 0.0, %v3729_v56 }
0x2acc   :  { %v3742_v28 = vmax.f32 %v3740_v48, 1.0 }
0x2ace   :  { %4979 = vrcp.f32 %v3742_v28 }
0x2ad8   :  { %v4980_v57 = vpop.eup %4979 }
0x2ad9   :  { %v3744_v42 = vmul.f32 %v4980_v57, %v3741_v55 }
0x2adb   :  { %3746 = vst.msk [vmem:[#allocation8] sm:$0x1] %vm3745_vm8, %v3744_v42 }
0x2adc   :  { %5028 = shalt.err (!%p5025_p7)
}
0x2add   :  { %s5029_s12 = scalar_lea.hbm %s6340_s11, 16 }
0x2ade   :  { %p5030_p8 = scmp.ne.s32.totalorder %s6340_s11, %s5029_s12  ;;  %p5033_p9 = scmp.lt.u32.totalorder %s5029_s12, %s6340_s11 }
0x2ae0   :  { %p5035_p10 = pnand %p5033_p9, %p5030_p8 }
0x2ae2   :  { %5038 = shalt.err (!%p5035_p10)
}
0x2ae3   :  { %3756 = dma.vmem_to_hbm [thread:$0]  %s3754_s28, 16, %s6340_s11, [#allocation3]  }
0x2ae4   :  { %5043 = dma.done.wait [#allocation3], 16  }
0x2ae5   :  { %5044 = vsyncadd [#allocation3], 4294967280 }
0x2ae6   :  { %3760 = vsyncpa [#allocation3], 1 }
0x2ae7   :  { %3761 = vsyncpa [#allocation4], 1 }
0x2ae8   :  { %3762 = vsyncpa [#allocation6], 1 }

</bundles_post_ra>
